<compile_context>
chip_gen: v6e
topology: v6e:2x2x1
jax: 0.10.0
libtpu: 0.0.40
codegen_flags: <defaults>
</compile_context>

<pallas_src>
import jax
import jax.numpy as jnp
from jax.experimental import pallas as pl
from jax.experimental.pallas import tpu as pltpu


# ----------------------------------------------------------------------------
# Activations (applied in f32 inside the Pallas kernel)
# ----------------------------------------------------------------------------
def _apply_activation(x, name):
    if name == "relu":
        return jnp.maximum(x, 0.0)
    if name == "elu":
        return jnp.where(x > 0, x, jnp.expm1(jnp.minimum(x, 0.0)))
    if name == "sigmoid":
        z = jnp.exp(-jnp.abs(x))  # numerically stable sigmoid
        return jnp.where(x >= 0, 1.0 / (1.0 + z), z / (1.0 + z))
    if name == "tanh":
        return jnp.tanh(x)
    if name == "leaky_relu":
        return jnp.where(x > 0, x, 0.01 * x)
    raise ValueError(f"unknown activation {name!r}")


# ----------------------------------------------------------------------------
# Fused kernel factory.  One grid step = one image; all layers run back to
# back with the intermediate (spatially padded) activation held in VMEM.
#
#   refs layout: [x_pad, w_0, b_0, w_1, b_1, ..., out, act_scratch_0, ...]
#   x_pad ref : (Hp0, Wp0, Cin)            (batch dim squeezed by BlockSpec)
#   w_l   ref : (KH*KW, Cin_l, Cout_l)     VMEM-resident
#   b_l   ref : (1, Cout_l)                VMEM-resident
#   out   ref : (OH_L, OW_L, Cout_L)
#   act_l ref : (OH_l + 2p_{l+1}, OW_l + 2p_{l+1}, Cout_l)   VMEM scratch
# ----------------------------------------------------------------------------
def _make_fused_cnn_kernel(layer_cfgs, inter_pads, act_name):
    n_layers = len(layer_cfgs)

    def kernel(*refs):
        w_refs = refs[1:1 + 2 * n_layers:2]
        b_refs = refs[2:2 + 2 * n_layers:2]
        out_ref = refs[1 + 2 * n_layers]
        act_refs = refs[2 + 2 * n_layers:]

        cur = refs[0]  # padded input of the current layer (Ref)
        for l, (kh, kw, stride, oh, ow, cin, cout) in enumerate(layer_cfgs):
            w_l = w_refs[l]
            acc = None
            # Direct conv: KH*KW shifted GEMMs with K = Cin, f32 accumulation.
            for di in range(kh):
                for dj in range(kw):
                    if stride == 1:
                        slab = cur[di:di + oh, dj:dj + ow, :]
                    else:
                        slab = cur[pl.ds(di, oh, stride=stride),
                                   pl.ds(dj, ow, stride=stride), :]
                    contrib = jnp.dot(slab.reshape(oh * ow, cin),
                                      w_l[di * kw + dj],
                                      preferred_element_type=jnp.float32)
                    acc = contrib if acc is None else acc + contrib
            acc = _apply_activation(acc + b_refs[l][...], act_name)
            y = acc.reshape(oh, ow, cout)

            if l == n_layers - 1:
                out_ref[...] = y.astype(out_ref.dtype)
            else:
                nxt = act_refs[l]
                p = inter_pads[l]  # next layer's spatial padding
                if p == 0:
                    nxt[...] = y
                else:
                    nxt[...] = jnp.zeros_like(nxt)      # zero the padding ring
                    nxt[p:p + oh, p:p + ow, :] = y      # interior write
                cur = nxt

    return kernel


# ----------------------------------------------------------------------------
# CNN forward (equivalent to the PyTorch module's forward).  NCHW in, NCHW out.
# ----------------------------------------------------------------------------
def cnn_forward(x_nchw, params, conv_layers, activation="relu"):
    n = x_nchw.shape[0]
    x = jnp.transpose(x_nchw, (0, 2, 3, 1)).astype(jnp.float32)  # NCHW -> NHWC once

    # Static per-layer geometry: (kh, kw, stride, oh, ow, cin, cout).
    layer_cfgs = []
    h, w, c = x.shape[1], x.shape[2], x.shape[3]
    for (cout, k, s, p) in conv_layers:
        oh = (h - k + 2 * p) // s + 1
        ow = (w - k + 2 * p) // s + 1
        layer_cfgs.append((k, k, s, oh, ow, c, cout))
        h, w, c = oh, ow, cout
    n_layers = len(layer_cfgs)
    inter_pads = tuple(conv_layers[l + 1][3] for l in range(n_layers - 1))

    # Zero-pad the input spatially for layer 1 (the only wrapper-side data prep).
    p0 = conv_layers[0][3]
    xp = jnp.pad(x, ((0, 0), (p0, p0), (p0, p0), (0, 0)))
    _, hp0, wp0, c0 = xp.shape

    # Weights (Cout, Cin, KH, KW) -> (KH*KW, Cin, Cout); bias -> (1, Cout).
    inputs = [xp]
    in_specs = [pl.BlockSpec((None, hp0, wp0, c0), lambda b: (b, 0, 0, 0))]
    for (wt, bi), (kh, kw, _s, _oh, _ow, cin, cout) in zip(params, layer_cfgs):
        w_a = jnp.transpose(wt, (2, 3, 1, 0)).reshape(kh * kw, cin, cout)
        w_a = w_a.astype(jnp.float32)
        b_a = bi.reshape(1, cout).astype(jnp.float32)
        inputs.extend([w_a, b_a])
        in_specs.append(pl.BlockSpec(w_a.shape, lambda b: (0, 0, 0)))  # resident
        in_specs.append(pl.BlockSpec(b_a.shape, lambda b: (0, 0)))     # resident

    _kh, _kw, _s, oh_L, ow_L, _cin, cout_L = layer_cfgs[-1]
    out_spec = pl.BlockSpec((None, oh_L, ow_L, cout_L), lambda b: (b, 0, 0, 0))

    # Inter-layer activation buffers (padded for the NEXT layer) live in VMEM.
    scratch = []
    for l in range(n_layers - 1):
        _, _, _, oh, ow, _, cout = layer_cfgs[l]
        pn = inter_pads[l]
        scratch.append(pltpu.VMEM((oh + 2 * pn, ow + 2 * pn, cout), jnp.float32))

    kernel = _make_fused_cnn_kernel(tuple(layer_cfgs), inter_pads, activation)
    out_nhwc = pl.pallas_call(
        kernel,
        out_shape=jax.ShapeDtypeStruct((n, oh_L, ow_L, cout_L), jnp.float32),
        grid=(n,),
        in_specs=in_specs,
        out_specs=out_spec,
        scratch_shapes=scratch,
        compiler_params=pltpu.CompilerParams(
            dimension_semantics=("parallel",),       # batch images -> both TCs on v7x
            vmem_limit_bytes=32 * 1024 * 1024,       # far above the <1 MiB footprint
        ),
    )(*inputs)
    return jnp.transpose(out_nhwc, (0, 3, 1, 2))     # NHWC -> NCHW at the boundary


# ----------------------------------------------------------------------------
# Deterministic parameter init (synthetic; shapes follow nn.Conv2d defaults)
# ----------------------------------------------------------------------------
def init_params(key, in_channels, conv_layers):
    params = []
    cur = in_channels
    for channels, ksize, _, _ in conv_layers:
        key, kw_key, kb_key = jax.random.split(key, 3)
        fan_in = cur * ksize * ksize
        bound = 1.0 / (fan_in ** 0.5)
        w = jax.random.uniform(kw_key, (channels, cur, ksize, ksize),
                               jnp.float32, -bound, bound)
        b = jax.random.uniform(kb_key, (channels,), jnp.float32, -bound, bound)
        params.append((w, b))
        cur = channels
    return params


if __name__ == "__main__":
    # Small config consistent with CNN(in_channels=4, img_size=16, conv_layers=...)
    batch = 2
    in_channels = 4
    img_size = 16
    conv_layers = ((8, 3, 1, 1), (16, 3, 2, 1))   # (channels, ksize, stride, padding)
    activation = "relu"

    key = jax.random.PRNGKey(0)
    key, xkey = jax.random.split(key)
    x = jax.random.normal(xkey, (batch, in_channels, img_size, img_size), jnp.float32)
    params = init_params(key, in_channels, conv_layers)

    fwd = jax.jit(cnn_forward, static_argnames=("conv_layers", "activation"))
    out = jax.block_until_ready(
        fwd(x, params, conv_layers=conv_layers, activation=activation))

    # Silent correctness check against XLA's native f32 conv (same semantics as
    # PyTorch Conv2d); kernel is f32 end to end, so tolerance is tight.
    ref = x
    for (wt, bi), (_, k, s, p) in zip(params, conv_layers):
        ref = jax.lax.conv_general_dilated(
            ref, wt, window_strides=(s, s), padding=[(p, p), (p, p)],
            dimension_numbers=("NCHW", "OIHW", "NCHW"),
        ) + bi.reshape(1, -1, 1, 1)
        ref = jnp.maximum(ref, 0.0)   # activation == relu in this config
    ref = jax.block_until_ready(ref)

    assert out.shape == ref.shape
    assert bool(jnp.allclose(out, ref, atol=1e-4, rtol=1e-4))

    print("KERNEL_OK")
</pallas_src>

<mosaic_0001>
module attributes {stable_mosaic.version = 11 : i64} {
  func.func @kernel(%arg0: i32, %arg1: memref<1x18x18x4xf32, #tpu.memory_space<vmem>>, %arg2: memref<9x4x8xf32, #tpu.memory_space<vmem>>, %arg3: memref<1x8xf32, #tpu.memory_space<vmem>>, %arg4: memref<9x8x16xf32, #tpu.memory_space<vmem>>, %arg5: memref<1x16xf32, #tpu.memory_space<vmem>>, %arg6: memref<1x8x8x16xf32, #tpu.memory_space<vmem>>, %arg7: memref<18x18x8xf32, #tpu.memory_space<vmem>>) attributes {dimension_semantics = [#tpu.dimension_semantics<parallel>], iteration_bounds = array<i64: 2>, scalar_prefetch = 0 : i64, scratch_operands = 1 : i64, tpu.core_type = #tpu.core_type<tc>, window_params = [{transform_indices = @transform_0, window_bounds = array<i64: 1, 18, 18, 4>}, {pipeline_mode = #tpu.pipeline_mode<synchronous>, transform_indices = @transform_1, window_bounds = array<i64: 9, 4, 8>}, {pipeline_mode = #tpu.pipeline_mode<synchronous>, transform_indices = @transform_2, window_bounds = array<i64: 1, 8>}, {pipeline_mode = #tpu.pipeline_mode<synchronous>, transform_indices = @transform_3, window_bounds = array<i64: 9, 8, 16>}, {pipeline_mode = #tpu.pipeline_mode<synchronous>, transform_indices = @transform_4, window_bounds = array<i64: 1, 16>}, {transform_indices = @transform_5, window_bounds = array<i64: 1, 8, 8, 16>}]} {
    %c0 = arith.constant 0 : index
    %c0_0 = arith.constant 0 : index
    %c0_1 = arith.constant 0 : index
    %c0_2 = arith.constant 0 : index
    %0 = vector.load %arg1[%c0, %c0_0, %c0_1, %c0_2] : memref<1x18x18x4xf32, #tpu.memory_space<vmem>>, vector<1x16x16x4xf32>
    %1 = vector.shape_cast %0 : vector<1x16x16x4xf32> to vector<16x16x4xf32>
    %2 = vector.shape_cast %1 : vector<16x16x4xf32> to vector<256x4xf32>
    %c0_3 = arith.constant 0 : index
    %c0_4 = arith.constant 0 : index
    %c0_5 = arith.constant 0 : index
    %3 = vector.load %arg2[%c0_3, %c0_4, %c0_5] : memref<9x4x8xf32, #tpu.memory_space<vmem>>, vector<1x4x8xf32>
    %4 = vector.shape_cast %3 : vector<1x4x8xf32> to vector<4x8xf32>
    %cst = arith.constant dense<0.000000e+00> : vector<256x8xf32>
    %5 = tpu.matmul %2, %4, %cst {dimension_numbers = #tpu.dot_dimension_numbers<[1], [0], [0], [1], [0, 0, 1, 1], [], []>} : vector<256x4xf32>, vector<4x8xf32>, vector<256x8xf32> -> vector<256x8xf32>
    %c0_6 = arith.constant 0 : index
    %c0_7 = arith.constant 0 : index
    %c1 = arith.constant 1 : index
    %c0_8 = arith.constant 0 : index
    %6 = vector.load %arg1[%c0_6, %c0_7, %c1, %c0_8] : memref<1x18x18x4xf32, #tpu.memory_space<vmem>>, vector<1x16x16x4xf32>
    %7 = vector.shape_cast %6 : vector<1x16x16x4xf32> to vector<16x16x4xf32>
    %8 = vector.shape_cast %7 : vector<16x16x4xf32> to vector<256x4xf32>
    %c1_9 = arith.constant 1 : index
    %c0_10 = arith.constant 0 : index
    %c0_11 = arith.constant 0 : index
    %9 = vector.load %arg2[%c1_9, %c0_10, %c0_11] : memref<9x4x8xf32, #tpu.memory_space<vmem>>, vector<1x4x8xf32>
    %10 = vector.shape_cast %9 : vector<1x4x8xf32> to vector<4x8xf32>
    %cst_12 = arith.constant dense<0.000000e+00> : vector<256x8xf32>
    %11 = tpu.matmul %8, %10, %cst_12 {dimension_numbers = #tpu.dot_dimension_numbers<[1], [0], [0], [1], [0, 0, 1, 1], [], []>} : vector<256x4xf32>, vector<4x8xf32>, vector<256x8xf32> -> vector<256x8xf32>
    %12 = arith.addf %5, %11 : vector<256x8xf32>
    %c0_13 = arith.constant 0 : index
    %c0_14 = arith.constant 0 : index
    %c2 = arith.constant 2 : index
    %c0_15 = arith.constant 0 : index
    %13 = vector.load %arg1[%c0_13, %c0_14, %c2, %c0_15] : memref<1x18x18x4xf32, #tpu.memory_space<vmem>>, vector<1x16x16x4xf32>
    %14 = vector.shape_cast %13 : vector<1x16x16x4xf32> to vector<16x16x4xf32>
    %15 = vector.shape_cast %14 : vector<16x16x4xf32> to vector<256x4xf32>
    %c2_16 = arith.constant 2 : index
    %c0_17 = arith.constant 0 : index
    %c0_18 = arith.constant 0 : index
    %16 = vector.load %arg2[%c2_16, %c0_17, %c0_18] : memref<9x4x8xf32, #tpu.memory_space<vmem>>, vector<1x4x8xf32>
    %17 = vector.shape_cast %16 : vector<1x4x8xf32> to vector<4x8xf32>
    %cst_19 = arith.constant dense<0.000000e+00> : vector<256x8xf32>
    %18 = tpu.matmul %15, %17, %cst_19 {dimension_numbers = #tpu.dot_dimension_numbers<[1], [0], [0], [1], [0, 0, 1, 1], [], []>} : vector<256x4xf32>, vector<4x8xf32>, vector<256x8xf32> -> vector<256x8xf32>
    %19 = arith.addf %12, %18 : vector<256x8xf32>
    %c0_20 = arith.constant 0 : index
    %c1_21 = arith.constant 1 : index
    %c0_22 = arith.constant 0 : index
    %c0_23 = arith.constant 0 : index
    %20 = vector.load %arg1[%c0_20, %c1_21, %c0_22, %c0_23] : memref<1x18x18x4xf32, #tpu.memory_space<vmem>>, vector<1x16x16x4xf32>
    %21 = vector.shape_cast %20 : vector<1x16x16x4xf32> to vector<16x16x4xf32>
    %22 = vector.shape_cast %21 : vector<16x16x4xf32> to vector<256x4xf32>
    %c3 = arith.constant 3 : index
    %c0_24 = arith.constant 0 : index
    %c0_25 = arith.constant 0 : index
    %23 = vector.load %arg2[%c3, %c0_24, %c0_25] : memref<9x4x8xf32, #tpu.memory_space<vmem>>, vector<1x4x8xf32>
    %24 = vector.shape_cast %23 : vector<1x4x8xf32> to vector<4x8xf32>
    %cst_26 = arith.constant dense<0.000000e+00> : vector<256x8xf32>
    %25 = tpu.matmul %22, %24, %cst_26 {dimension_numbers = #tpu.dot_dimension_numbers<[1], [0], [0], [1], [0, 0, 1, 1], [], []>} : vector<256x4xf32>, vector<4x8xf32>, vector<256x8xf32> -> vector<256x8xf32>
    %26 = arith.addf %19, %25 : vector<256x8xf32>
    %c0_27 = arith.constant 0 : index
    %c1_28 = arith.constant 1 : index
    %c1_29 = arith.constant 1 : index
    %c0_30 = arith.constant 0 : index
    %27 = vector.load %arg1[%c0_27, %c1_28, %c1_29, %c0_30] : memref<1x18x18x4xf32, #tpu.memory_space<vmem>>, vector<1x16x16x4xf32>
    %28 = vector.shape_cast %27 : vector<1x16x16x4xf32> to vector<16x16x4xf32>
    %29 = vector.shape_cast %28 : vector<16x16x4xf32> to vector<256x4xf32>
    %c4 = arith.constant 4 : index
    %c0_31 = arith.constant 0 : index
    %c0_32 = arith.constant 0 : index
    %30 = vector.load %arg2[%c4, %c0_31, %c0_32] : memref<9x4x8xf32, #tpu.memory_space<vmem>>, vector<1x4x8xf32>
    %31 = vector.shape_cast %30 : vector<1x4x8xf32> to vector<4x8xf32>
    %cst_33 = arith.constant dense<0.000000e+00> : vector<256x8xf32>
    %32 = tpu.matmul %29, %31, %cst_33 {dimension_numbers = #tpu.dot_dimension_numbers<[1], [0], [0], [1], [0, 0, 1, 1], [], []>} : vector<256x4xf32>, vector<4x8xf32>, vector<256x8xf32> -> vector<256x8xf32>
    %33 = arith.addf %26, %32 : vector<256x8xf32>
    %c0_34 = arith.constant 0 : index
    %c1_35 = arith.constant 1 : index
    %c2_36 = arith.constant 2 : index
    %c0_37 = arith.constant 0 : index
    %34 = vector.load %arg1[%c0_34, %c1_35, %c2_36, %c0_37] : memref<1x18x18x4xf32, #tpu.memory_space<vmem>>, vector<1x16x16x4xf32>
    %35 = vector.shape_cast %34 : vector<1x16x16x4xf32> to vector<16x16x4xf32>
    %36 = vector.shape_cast %35 : vector<16x16x4xf32> to vector<256x4xf32>
    %c5 = arith.constant 5 : index
    %c0_38 = arith.constant 0 : index
    %c0_39 = arith.constant 0 : index
    %37 = vector.load %arg2[%c5, %c0_38, %c0_39] : memref<9x4x8xf32, #tpu.memory_space<vmem>>, vector<1x4x8xf32>
    %38 = vector.shape_cast %37 : vector<1x4x8xf32> to vector<4x8xf32>
    %cst_40 = arith.constant dense<0.000000e+00> : vector<256x8xf32>
    %39 = tpu.matmul %36, %38, %cst_40 {dimension_numbers = #tpu.dot_dimension_numbers<[1], [0], [0], [1], [0, 0, 1, 1], [], []>} : vector<256x4xf32>, vector<4x8xf32>, vector<256x8xf32> -> vector<256x8xf32>
    %40 = arith.addf %33, %39 : vector<256x8xf32>
    %c0_41 = arith.constant 0 : index
    %c2_42 = arith.constant 2 : index
    %c0_43 = arith.constant 0 : index
    %c0_44 = arith.constant 0 : index
    %41 = vector.load %arg1[%c0_41, %c2_42, %c0_43, %c0_44] : memref<1x18x18x4xf32, #tpu.memory_space<vmem>>, vector<1x16x16x4xf32>
    %42 = vector.shape_cast %41 : vector<1x16x16x4xf32> to vector<16x16x4xf32>
    %43 = vector.shape_cast %42 : vector<16x16x4xf32> to vector<256x4xf32>
    %c6 = arith.constant 6 : index
    %c0_45 = arith.constant 0 : index
    %c0_46 = arith.constant 0 : index
    %44 = vector.load %arg2[%c6, %c0_45, %c0_46] : memref<9x4x8xf32, #tpu.memory_space<vmem>>, vector<1x4x8xf32>
    %45 = vector.shape_cast %44 : vector<1x4x8xf32> to vector<4x8xf32>
    %cst_47 = arith.constant dense<0.000000e+00> : vector<256x8xf32>
    %46 = tpu.matmul %43, %45, %cst_47 {dimension_numbers = #tpu.dot_dimension_numbers<[1], [0], [0], [1], [0, 0, 1, 1], [], []>} : vector<256x4xf32>, vector<4x8xf32>, vector<256x8xf32> -> vector<256x8xf32>
    %47 = arith.addf %40, %46 : vector<256x8xf32>
    %c0_48 = arith.constant 0 : index
    %c2_49 = arith.constant 2 : index
    %c1_50 = arith.constant 1 : index
    %c0_51 = arith.constant 0 : index
    %48 = vector.load %arg1[%c0_48, %c2_49, %c1_50, %c0_51] : memref<1x18x18x4xf32, #tpu.memory_space<vmem>>, vector<1x16x16x4xf32>
    %49 = vector.shape_cast %48 : vector<1x16x16x4xf32> to vector<16x16x4xf32>
    %50 = vector.shape_cast %49 : vector<16x16x4xf32> to vector<256x4xf32>
    %c7 = arith.constant 7 : index
    %c0_52 = arith.constant 0 : index
    %c0_53 = arith.constant 0 : index
    %51 = vector.load %arg2[%c7, %c0_52, %c0_53] : memref<9x4x8xf32, #tpu.memory_space<vmem>>, vector<1x4x8xf32>
    %52 = vector.shape_cast %51 : vector<1x4x8xf32> to vector<4x8xf32>
    %cst_54 = arith.constant dense<0.000000e+00> : vector<256x8xf32>
    %53 = tpu.matmul %50, %52, %cst_54 {dimension_numbers = #tpu.dot_dimension_numbers<[1], [0], [0], [1], [0, 0, 1, 1], [], []>} : vector<256x4xf32>, vector<4x8xf32>, vector<256x8xf32> -> vector<256x8xf32>
    %54 = arith.addf %47, %53 : vector<256x8xf32>
    %c0_55 = arith.constant 0 : index
    %c2_56 = arith.constant 2 : index
    %c2_57 = arith.constant 2 : index
    %c0_58 = arith.constant 0 : index
    %55 = vector.load %arg1[%c0_55, %c2_56, %c2_57, %c0_58] : memref<1x18x18x4xf32, #tpu.memory_space<vmem>>, vector<1x16x16x4xf32>
    %56 = vector.shape_cast %55 : vector<1x16x16x4xf32> to vector<16x16x4xf32>
    %57 = vector.shape_cast %56 : vector<16x16x4xf32> to vector<256x4xf32>
    %c8 = arith.constant 8 : index
    %c0_59 = arith.constant 0 : index
    %c0_60 = arith.constant 0 : index
    %58 = vector.load %arg2[%c8, %c0_59, %c0_60] : memref<9x4x8xf32, #tpu.memory_space<vmem>>, vector<1x4x8xf32>
    %59 = vector.shape_cast %58 : vector<1x4x8xf32> to vector<4x8xf32>
    %cst_61 = arith.constant dense<0.000000e+00> : vector<256x8xf32>
    %60 = tpu.matmul %57, %59, %cst_61 {dimension_numbers = #tpu.dot_dimension_numbers<[1], [0], [0], [1], [0, 0, 1, 1], [], []>} : vector<256x4xf32>, vector<4x8xf32>, vector<256x8xf32> -> vector<256x8xf32>
    %61 = arith.addf %54, %60 : vector<256x8xf32>
    %c0_62 = arith.constant 0 : index
    %c0_63 = arith.constant 0 : index
    %62 = vector.load %arg3[%c0_62, %c0_63] : memref<1x8xf32, #tpu.memory_space<vmem>>, vector<1x8xf32>
    %63 = vector.broadcast %62 : vector<1x8xf32> to vector<256x8xf32>
    %64 = arith.addf %61, %63 : vector<256x8xf32>
    %cst_64 = arith.constant 0.000000e+00 : f32
    %65 = vector.broadcast %cst_64 : f32 to vector<256x8xf32>
    %66 = arith.maximumf %64, %65 : vector<256x8xf32>
    %67 = vector.shape_cast %66 : vector<256x8xf32> to vector<16x16x8xf32>
    %cst_65 = arith.constant 0.000000e+00 : f32
    %68 = vector.broadcast %cst_65 : f32 to vector<18x18x8xf32>
    %c0_66 = arith.constant 0 : index
    %c0_67 = arith.constant 0 : index
    %c0_68 = arith.constant 0 : index
    %69 = vector.load %arg7[%c0_66, %c0_67, %c0_68] : memref<18x18x8xf32, #tpu.memory_space<vmem>>, vector<18x18x8xf32>
    tpu.vector_store %arg7[%c0_66, %c0_67, %c0_68], %68 {strides = array<i32>} : memref<18x18x8xf32, #tpu.memory_space<vmem>>, vector<18x18x8xf32>,
    %c1_69 = arith.constant 1 : index
    %c1_70 = arith.constant 1 : index
    %c0_71 = arith.constant 0 : index
    %70 = vector.load %arg7[%c1_69, %c1_70, %c0_71] : memref<18x18x8xf32, #tpu.memory_space<vmem>>, vector<16x16x8xf32>
    tpu.vector_store %arg7[%c1_69, %c1_70, %c0_71], %67 {strides = array<i32>} : memref<18x18x8xf32, #tpu.memory_space<vmem>>, vector<16x16x8xf32>,
    %c0_72 = arith.constant 0 : index
    %c0_73 = arith.constant 0 : index
    %c0_74 = arith.constant 0 : index
    %71 = tpu.strided_load %arg7[%c0_72, %c0_73, %c0_74] {strides = array<i32: 2, 2, 1>} : memref<18x18x8xf32, #tpu.memory_space<vmem>>, vector<8x8x8xf32>
    %72 = vector.shape_cast %71 : vector<8x8x8xf32> to vector<64x8xf32>
    %c0_75 = arith.constant 0 : index
    %c0_76 = arith.constant 0 : index
    %c0_77 = arith.constant 0 : index
    %73 = vector.load %arg4[%c0_75, %c0_76, %c0_77] : memref<9x8x16xf32, #tpu.memory_space<vmem>>, vector<1x8x16xf32>
    %74 = vector.shape_cast %73 : vector<1x8x16xf32> to vector<8x16xf32>
    %cst_78 = arith.constant dense<0.000000e+00> : vector<64x16xf32>
    %75 = tpu.matmul %72, %74, %cst_78 {dimension_numbers = #tpu.dot_dimension_numbers<[1], [0], [0], [1], [0, 0, 1, 1], [], []>} : vector<64x8xf32>, vector<8x16xf32>, vector<64x16xf32> -> vector<64x16xf32>
    %c0_79 = arith.constant 0 : index
    %c1_80 = arith.constant 1 : index
    %c0_81 = arith.constant 0 : index
    %76 = tpu.strided_load %arg7[%c0_79, %c1_80, %c0_81] {strides = array<i32: 2, 2, 1>} : memref<18x18x8xf32, #tpu.memory_space<vmem>>, vector<8x8x8xf32>
    %77 = vector.shape_cast %76 : vector<8x8x8xf32> to vector<64x8xf32>
    %c1_82 = arith.constant 1 : index
    %c0_83 = arith.constant 0 : index
    %c0_84 = arith.constant 0 : index
    %78 = vector.load %arg4[%c1_82, %c0_83, %c0_84] : memref<9x8x16xf32, #tpu.memory_space<vmem>>, vector<1x8x16xf32>
    %79 = vector.shape_cast %78 : vector<1x8x16xf32> to vector<8x16xf32>
    %cst_85 = arith.constant dense<0.000000e+00> : vector<64x16xf32>
    %80 = tpu.matmul %77, %79, %cst_85 {dimension_numbers = #tpu.dot_dimension_numbers<[1], [0], [0], [1], [0, 0, 1, 1], [], []>} : vector<64x8xf32>, vector<8x16xf32>, vector<64x16xf32> -> vector<64x16xf32>
    %81 = arith.addf %75, %80 : vector<64x16xf32>
    %c0_86 = arith.constant 0 : index
    %c2_87 = arith.constant 2 : index
    %c0_88 = arith.constant 0 : index
    %82 = tpu.strided_load %arg7[%c0_86, %c2_87, %c0_88] {strides = array<i32: 2, 2, 1>} : memref<18x18x8xf32, #tpu.memory_space<vmem>>, vector<8x8x8xf32>
    %83 = vector.shape_cast %82 : vector<8x8x8xf32> to vector<64x8xf32>
    %c2_89 = arith.constant 2 : index
    %c0_90 = arith.constant 0 : index
    %c0_91 = arith.constant 0 : index
    %84 = vector.load %arg4[%c2_89, %c0_90, %c0_91] : memref<9x8x16xf32, #tpu.memory_space<vmem>>, vector<1x8x16xf32>
    %85 = vector.shape_cast %84 : vector<1x8x16xf32> to vector<8x16xf32>
    %cst_92 = arith.constant dense<0.000000e+00> : vector<64x16xf32>
    %86 = tpu.matmul %83, %85, %cst_92 {dimension_numbers = #tpu.dot_dimension_numbers<[1], [0], [0], [1], [0, 0, 1, 1], [], []>} : vector<64x8xf32>, vector<8x16xf32>, vector<64x16xf32> -> vector<64x16xf32>
    %87 = arith.addf %81, %86 : vector<64x16xf32>
    %c1_93 = arith.constant 1 : index
    %c0_94 = arith.constant 0 : index
    %c0_95 = arith.constant 0 : index
    %88 = tpu.strided_load %arg7[%c1_93, %c0_94, %c0_95] {strides = array<i32: 2, 2, 1>} : memref<18x18x8xf32, #tpu.memory_space<vmem>>, vector<8x8x8xf32>
    %89 = vector.shape_cast %88 : vector<8x8x8xf32> to vector<64x8xf32>
    %c3_96 = arith.constant 3 : index
    %c0_97 = arith.constant 0 : index
    %c0_98 = arith.constant 0 : index
    %90 = vector.load %arg4[%c3_96, %c0_97, %c0_98] : memref<9x8x16xf32, #tpu.memory_space<vmem>>, vector<1x8x16xf32>
    %91 = vector.shape_cast %90 : vector<1x8x16xf32> to vector<8x16xf32>
    %cst_99 = arith.constant dense<0.000000e+00> : vector<64x16xf32>
    %92 = tpu.matmul %89, %91, %cst_99 {dimension_numbers = #tpu.dot_dimension_numbers<[1], [0], [0], [1], [0, 0, 1, 1], [], []>} : vector<64x8xf32>, vector<8x16xf32>, vector<64x16xf32> -> vector<64x16xf32>
    %93 = arith.addf %87, %92 : vector<64x16xf32>
    %c1_100 = arith.constant 1 : index
    %c1_101 = arith.constant 1 : index
    %c0_102 = arith.constant 0 : index
    %94 = tpu.strided_load %arg7[%c1_100, %c1_101, %c0_102] {strides = array<i32: 2, 2, 1>} : memref<18x18x8xf32, #tpu.memory_space<vmem>>, vector<8x8x8xf32>
    %95 = vector.shape_cast %94 : vector<8x8x8xf32> to vector<64x8xf32>
    %c4_103 = arith.constant 4 : index
    %c0_104 = arith.constant 0 : index
    %c0_105 = arith.constant 0 : index
    %96 = vector.load %arg4[%c4_103, %c0_104, %c0_105] : memref<9x8x16xf32, #tpu.memory_space<vmem>>, vector<1x8x16xf32>
    %97 = vector.shape_cast %96 : vector<1x8x16xf32> to vector<8x16xf32>
    %cst_106 = arith.constant dense<0.000000e+00> : vector<64x16xf32>
    %98 = tpu.matmul %95, %97, %cst_106 {dimension_numbers = #tpu.dot_dimension_numbers<[1], [0], [0], [1], [0, 0, 1, 1], [], []>} : vector<64x8xf32>, vector<8x16xf32>, vector<64x16xf32> -> vector<64x16xf32>
    %99 = arith.addf %93, %98 : vector<64x16xf32>
    %c1_107 = arith.constant 1 : index
    %c2_108 = arith.constant 2 : index
    %c0_109 = arith.constant 0 : index
    %100 = tpu.strided_load %arg7[%c1_107, %c2_108, %c0_109] {strides = array<i32: 2, 2, 1>} : memref<18x18x8xf32, #tpu.memory_space<vmem>>, vector<8x8x8xf32>
    %101 = vector.shape_cast %100 : vector<8x8x8xf32> to vector<64x8xf32>
    %c5_110 = arith.constant 5 : index
    %c0_111 = arith.constant 0 : index
    %c0_112 = arith.constant 0 : index
    %102 = vector.load %arg4[%c5_110, %c0_111, %c0_112] : memref<9x8x16xf32, #tpu.memory_space<vmem>>, vector<1x8x16xf32>
    %103 = vector.shape_cast %102 : vector<1x8x16xf32> to vector<8x16xf32>
    %cst_113 = arith.constant dense<0.000000e+00> : vector<64x16xf32>
    %104 = tpu.matmul %101, %103, %cst_113 {dimension_numbers = #tpu.dot_dimension_numbers<[1], [0], [0], [1], [0, 0, 1, 1], [], []>} : vector<64x8xf32>, vector<8x16xf32>, vector<64x16xf32> -> vector<64x16xf32>
    %105 = arith.addf %99, %104 : vector<64x16xf32>
    %c2_114 = arith.constant 2 : index
    %c0_115 = arith.constant 0 : index
    %c0_116 = arith.constant 0 : index
    %106 = tpu.strided_load %arg7[%c2_114, %c0_115, %c0_116] {strides = array<i32: 2, 2, 1>} : memref<18x18x8xf32, #tpu.memory_space<vmem>>, vector<8x8x8xf32>
    %107 = vector.shape_cast %106 : vector<8x8x8xf32> to vector<64x8xf32>
    %c6_117 = arith.constant 6 : index
    %c0_118 = arith.constant 0 : index
    %c0_119 = arith.constant 0 : index
    %108 = vector.load %arg4[%c6_117, %c0_118, %c0_119] : memref<9x8x16xf32, #tpu.memory_space<vmem>>, vector<1x8x16xf32>
    %109 = vector.shape_cast %108 : vector<1x8x16xf32> to vector<8x16xf32>
    %cst_120 = arith.constant dense<0.000000e+00> : vector<64x16xf32>
    %110 = tpu.matmul %107, %109, %cst_120 {dimension_numbers = #tpu.dot_dimension_numbers<[1], [0], [0], [1], [0, 0, 1, 1], [], []>} : vector<64x8xf32>, vector<8x16xf32>, vector<64x16xf32> -> vector<64x16xf32>
    %111 = arith.addf %105, %110 : vector<64x16xf32>
    %c2_121 = arith.constant 2 : index
    %c1_122 = arith.constant 1 : index
    %c0_123 = arith.constant 0 : index
    %112 = tpu.strided_load %arg7[%c2_121, %c1_122, %c0_123] {strides = array<i32: 2, 2, 1>} : memref<18x18x8xf32, #tpu.memory_space<vmem>>, vector<8x8x8xf32>
    %113 = vector.shape_cast %112 : vector<8x8x8xf32> to vector<64x8xf32>
    %c7_124 = arith.constant 7 : index
    %c0_125 = arith.constant 0 : index
    %c0_126 = arith.constant 0 : index
    %114 = vector.load %arg4[%c7_124, %c0_125, %c0_126] : memref<9x8x16xf32, #tpu.memory_space<vmem>>, vector<1x8x16xf32>
    %115 = vector.shape_cast %114 : vector<1x8x16xf32> to vector<8x16xf32>
    %cst_127 = arith.constant dense<0.000000e+00> : vector<64x16xf32>
    %116 = tpu.matmul %113, %115, %cst_127 {dimension_numbers = #tpu.dot_dimension_numbers<[1], [0], [0], [1], [0, 0, 1, 1], [], []>} : vector<64x8xf32>, vector<8x16xf32>, vector<64x16xf32> -> vector<64x16xf32>
    %117 = arith.addf %111, %116 : vector<64x16xf32>
    %c2_128 = arith.constant 2 : index
    %c2_129 = arith.constant 2 : index
    %c0_130 = arith.constant 0 : index
    %118 = tpu.strided_load %arg7[%c2_128, %c2_129, %c0_130] {strides = array<i32: 2, 2, 1>} : memref<18x18x8xf32, #tpu.memory_space<vmem>>, vector<8x8x8xf32>
    %119 = vector.shape_cast %118 : vector<8x8x8xf32> to vector<64x8xf32>
    %c8_131 = arith.constant 8 : index
    %c0_132 = arith.constant 0 : index
    %c0_133 = arith.constant 0 : index
    %120 = vector.load %arg4[%c8_131, %c0_132, %c0_133] : memref<9x8x16xf32, #tpu.memory_space<vmem>>, vector<1x8x16xf32>
    %121 = vector.shape_cast %120 : vector<1x8x16xf32> to vector<8x16xf32>
    %cst_134 = arith.constant dense<0.000000e+00> : vector<64x16xf32>
    %122 = tpu.matmul %119, %121, %cst_134 {dimension_numbers = #tpu.dot_dimension_numbers<[1], [0], [0], [1], [0, 0, 1, 1], [], []>} : vector<64x8xf32>, vector<8x16xf32>, vector<64x16xf32> -> vector<64x16xf32>
    %123 = arith.addf %117, %122 : vector<64x16xf32>
    %c0_135 = arith.constant 0 : index
    %c0_136 = arith.constant 0 : index
    %124 = vector.load %arg5[%c0_135, %c0_136] : memref<1x16xf32, #tpu.memory_space<vmem>>, vector<1x16xf32>
    %125 = vector.broadcast %124 : vector<1x16xf32> to vector<64x16xf32>
    %126 = arith.addf %123, %125 : vector<64x16xf32>
    %cst_137 = arith.constant 0.000000e+00 : f32
    %127 = vector.broadcast %cst_137 : f32 to vector<64x16xf32>
    %128 = arith.maximumf %126, %127 : vector<64x16xf32>
    %129 = vector.shape_cast %128 : vector<64x16xf32> to vector<8x8x16xf32>
    %c0_138 = arith.constant 0 : index
    %c0_139 = arith.constant 0 : index
    %c0_140 = arith.constant 0 : index
    %c0_141 = arith.constant 0 : index
    %130 = vector.load %arg6[%c0_138, %c0_139, %c0_140, %c0_141] : memref<1x8x8x16xf32, #tpu.memory_space<vmem>>, vector<1x8x8x16xf32>
    %131 = vector.shape_cast %130 : vector<1x8x8x16xf32> to vector<8x8x16xf32>
    %132 = vector.shape_cast %129 : vector<8x8x16xf32> to vector<1x8x8x16xf32>
    tpu.vector_store %arg6[%c0_138, %c0_139, %c0_140, %c0_141], %132 {strides = array<i32>} : memref<1x8x8x16xf32, #tpu.memory_space<vmem>>, vector<1x8x8x16xf32>,
    return
  }
  func.func @transform_0(%arg0: i32) -> (i32, i32, i32, i32) {
    %c0_i32 = arith.constant 0 : i32
    %c0_i32_0 = arith.constant 0 : i32
    %c0_i32_1 = arith.constant 0 : i32
    %c0_i32_2 = arith.constant 0 : i32
    return %arg0, %c0_i32, %c0_i32_0, %c0_i32_1 : i32, i32, i32, i32
  }
  func.func @transform_1(%arg0: i32) -> (i32, i32, i32) {
    %c0_i32 = arith.constant 0 : i32
    %c0_i32_0 = arith.constant 0 : i32
    %c0_i32_1 = arith.constant 0 : i32
    %c0_i32_2 = arith.constant 0 : i32
    return %c0_i32, %c0_i32_0, %c0_i32_1 : i32, i32, i32
  }
  func.func @transform_2(%arg0: i32) -> (i32, i32) {
    %c0_i32 = arith.constant 0 : i32
    %c0_i32_0 = arith.constant 0 : i32
    %c0_i32_1 = arith.constant 0 : i32
    return %c0_i32, %c0_i32_0 : i32, i32
  }
  func.func @transform_3(%arg0: i32) -> (i32, i32, i32) {
    %c0_i32 = arith.constant 0 : i32
    %c0_i32_0 = arith.constant 0 : i32
    %c0_i32_1 = arith.constant 0 : i32
    %c0_i32_2 = arith.constant 0 : i32
    return %c0_i32, %c0_i32_0, %c0_i32_1 : i32, i32, i32
  }
  func.func @transform_4(%arg0: i32) -> (i32, i32) {
    %c0_i32 = arith.constant 0 : i32
    %c0_i32_0 = arith.constant 0 : i32
    %c0_i32_1 = arith.constant 0 : i32
    return %c0_i32, %c0_i32_0 : i32, i32
  }
  func.func @transform_5(%arg0: i32) -> (i32, i32, i32, i32) {
    %c0_i32 = arith.constant 0 : i32
    %c0_i32_0 = arith.constant 0 : i32
    %c0_i32_1 = arith.constant 0 : i32
    %c0_i32_2 = arith.constant 0 : i32
    return %arg0, %c0_i32, %c0_i32_0, %c0_i32_1 : i32, i32, i32, i32
  }
}

</mosaic_0001>

<bundles_post_ra>
// kernel: cnn_forward.1
= control target key start
LH: loop header
LB: loop body
LE: loop exit
PB: predicated region body
PF: predicated region fallthrough
CT: control target
= control target key end

     0   :  { %10 = vsyncpa [#allocation4], 0  ;;  %s9032_s0 = inlined_call_operand.vmem [shape: f32[2,18,18,4], index: 0, kind: input, shape index: {}]   ;;  %s9033_s1 = inlined_call_operand.vmem [shape: f32[9,4,8], index: 1, kind: input, shape index: {}]   ;;  %s9034_s2 = inlined_call_operand.vmem [shape: f32[1,8], index: 2, kind: input, shape index: {}]   ;;  %s9035_s3 = inlined_call_operand.vmem [shape: f32[9,8,16], index: 3, kind: input, shape index: {}]   ;;  %s9036_s4 = inlined_call_operand.vmem [shape: f32[1,16], index: 4, kind: input, shape index: {}]   ;;  %s9037_s5 = inlined_call_operand.hbm [shape: f32[2,8,8,16], index: 5, kind: output, shape index: {}]  }
   0x1   :  { %12 = vsyncpa [#allocation4 + $0x1], 0  ;;  %s7048_s18 = smov 0   ;;  %s7050_s19 = smov 0  }
   0x2   :  { %s7052_s20 = smov 0   ;;  %s7054_s21 = smov 0  }
   0x3 LB: > { %s7069_s22 = sadd.s32 4294967295, %s7012_s21   ;;  %s5362_s23 = sadd.s32 4294967294, %s7012_s21   ;;  %s7012_s21 = sphi %s7054_s21, %s9323_s21   ;;  %s7008_s20 = sphi %s7052_s20, %s9322_s20   ;;  %s7004_s19 = sphi %s7050_s19, %s9321_s19   ;;  %s7000_s18 = sphi %s7048_s18, %s9320_s18  }
   0x4   : > { %s7073_s24 = sadd.s32 1, %s7012_s21   ;;  %s135_s25 = sadd.s32 1, %s7008_s20 }
   0x5   : > { %s132_s26 = ssub.s32 %s7012_s21, %s7073_s24  ;;  %p145_p0 = scmp.ne.s32.totalorder %s7008_s20, %s7004_s19 }
   0x6   : > { %p133_p1 = scmp.eq.s32.totalorder %s132_s26, 0  ;;  %p146_p2 = scmp.eq.s32.totalorder %s7069_s22, 1 }
   0x7   : > { %p151_p3 = scmp.ne.s32.totalorder %s7004_s19, %s7000_s18  ;;  %p152_p4 = scmp.eq.s32.totalorder %s5362_s23, 1 }
   0x8   : > { %s7084_s27 = scalar_select %p133_p1, %s7008_s20, %s135_s25  }
   0x9   : > { %p7086_p5 = por %p146_p2, %p145_p0  ;;  %p7090_p6 = por %p152_p4, %p151_p3 }
   0xa   : > { %p5365_p7 = scmp.ge.s32.totalorder %s7012_s21, 1  ;;  %p190_p8 = scmp.lt.s32.totalorder %s7012_s21, 3 }
   0xc   : > { %p191_p9 = pnand %p5365_p7, %p190_p8 }
   0xe   : > { %194 = sbr.rel (%p191_p9) target bundleno = 845 (0x34d), region = 40 }
  0x13   : > { %v5368_v0 = vld [vmem:[%s9033_s1 + $0x4] sm:$0xf]  ;;  %vm387_vm0 = vcmask 1043456   ;;  %p218_p10 = scmp.lt.s32.totalorder %s7069_s22, 1  ;;  %v5435_v1 = vld [vmem:[%s9033_s1 + $0x8] sm:$0xf] }
  0x14   : > { %6331 = vmatprep.subr.msk.mxu0 %vm387_vm0, %v5368_v0  ;;  %6907 = vmatprep.subr.msk.mxu1 %vm387_vm0, %v5368_v0  ;;  %v255_v2 = vld [vmem:[%s9033_s1] sm:$0xf]  ;;  %vm290_vm1 = vcmask 31744   ;;  %v5501_v9 = vld [vmem:[%s9033_s1 + $0xc] sm:$0xf]  ;;  %vm3743_vm2 = vcmask 64512  }
  0x15   : > { %6332 = vmatpush3.msk.msra.mxu0 %vm387_vm0, %v5368_v0  ;;  %6908 = vmatpush3.msk.msra.mxu1 %vm387_vm0, %v5368_v0  ;;  %s219_s11 = scalar_select %p218_p10, %s7069_s22, 1  ;;  %v7144_v10 = vld [vmem:[%s9033_s1 + $0x10] sm:$0xf]  ;;  %v7188_v19 = vld [vmem:[%s9033_s1 + $0x14] sm:$0xf]  ;;  %vm3746_vm3 = vcmask 58368  }
  0x16   : > { %6431 = vmatprep.subr.msk.mxu0 %vm387_vm0, %v5435_v1  ;;  %6381 = vmatprep.subr.msk.mxu1 %vm387_vm0, %v255_v2  ;;  %s215_s16 = sand.u32 1, %s7004_s19   ;;  %vm5231_vm4 = vcmask 130048   ;;  %s5952_s30 = sshll.u32 %s7069_s22, 10 }
  0x17   : > { %s6909_s12 = smul.u32 432, %s219_s11  ;;  %s5366_s25 = sshll.u32 %s215_s16, 6 }
  0x18   : > { %s8955_s26 = scalar_lea.vmem [#allocation3], %s5366_s25  ;;  %s8982_s9 = scalar_lea.hbm %s9037_s5, %s5952_s30 }
  0x19   : > { %s7116_s15 = scalar_lea.vmem %s9032_s0, %s6909_s12  ;;  %s5254_s6 = sshll.u32 %s8955_s26, 4  ;;  %s8984_s6 = int_to_ptr.vmem [resolvable:$true] %s5254_s6 }
  0x1a   : > { %v256_v3 = vld [vmem:[%s7116_s15 + $0x1] sm:$0xff]  ;;  %v7120_v4 = vld [vmem:[%s7116_s15 + $0x151] sm:$0xff]  ;;  %v257_v5 = vld [vmem:[%s7116_s15 + $0x9] sm:$0xff]  ;;  %s8992_s22 = scalar_lea.sflag [#allocation4], %s215_s16  ;;  %s6952_s10 = scalar_lea.vmem %s8984_s6, 1024 }
  0x1b   : > { %9084 = vst [vmem:[#allocation6_spill] sm:$0xff] %v7120_v4  ;;  %6333 = vmatprep.mubr.msk.f32.mxu0 %vm290_vm1, %v256_v3  ;;  %6375 = vmatprep.mubr.msk.f32.mxu1 %vm290_vm1, %v7120_v4  ;;  %v7127_v6 = vld [vmem:[%s7116_s15 + $0x159] sm:$0xff]  ;;  %v7133_v8 = vld [vmem:[%s7116_s15 + $0x169] sm:$0xff]  ;;  %v7150_v11 = vld [vmem:[%s7116_s15 + $0x21] sm:$0xff]  ;;  %p6953_p11 = scmp.ne.s32.totalorder %s8984_s6, %s6952_s10  ;;  %s7015_s11 = smov [#allocation3]  }
  0x1c   : > { %9085 = vst [vmem:[#allocation7_spill] sm:$0xff] %v7127_v6  ;;  %v7130_v7 = vld [vmem:[%s7116_s15 + $0x19] sm:$0xff]  ;;  %9086 = vst [vmem:[#allocation8_spill] sm:$0xff] %v7133_v8  ;;  %6334 = vmatmul.mubr.msk.f32.vlgmr.msra.gmra.mxu0 %vm290_vm1, %v257_v5  ;;  %6376 = vmatmul.mubr.msk.f32.vlgmr.msra.gmra.mxu1 %vm290_vm1, %v7127_v6  ;;  %v7153_v12 = vld [vmem:[%s7116_s15 + $0x171] sm:$0xff]  ;;  %s6956_s12 = sshll.u32 %s7015_s11, 4  ;;  %s6957_s12 = int_to_ptr.vmem [resolvable:$false] %s6956_s12 }
  0x1d   : > { %6432 = vmatpush3.msk.msra.mxu0 %vm387_vm0, %v5435_v1  ;;  %6336 = vmatprep.mubr.msk.f32.mxu0 %vm290_vm1, %v7130_v7  ;;  %9087 = vst [vmem:[#allocation9_spill] sm:$0xff] %v7153_v12  ;;  %v7158_v13 = vld [vmem:[%s7116_s15 + $0x31] sm:$0xff]  ;;  %v223_v14 = vld [vmem:[%s7116_s15] sm:$0xff]  ;;  %v224_v16 = vld [vmem:[%s7116_s15 + $0x8] sm:$0xff]  ;;  %p6954_p12 = pnand %p6953_p11, %p7086_p5  ;;  %s6958_s13 = scalar_lea.vmem %s6957_s12, 2048 }
  0x1e   : > { %6378 = vmatprep.mubr.msk.f32.mxu1 %vm290_vm1, %v7133_v8  ;;  %6382 = vmatpush3.msk.msra.mxu1 %vm387_vm0, %v255_v2  ;;  %v7173_v15 = vld [vmem:[%s7116_s15 + $0x39] sm:$0xff]  ;;  %v7177_v17 = vld [vmem:[%s7116_s15 + $0x49] sm:$0xff]  ;;  %v7195_v20 = vld [vmem:[%s7116_s15 + $0x51] sm:$0xff]  ;;  %p6959_p0 = scmp.lt.s32.totalorder %s8984_s6, %s6957_s12  ;;  %p6960_p1 = scmp.lt.s32.totalorder %s6958_s13, %s6952_s10 }
  0x1f   : > { %6481 = vmatprep.subr.msk.mxu1 %vm387_vm0, %v5501_v9  ;;  %6531 = vmatprep.subr.msk.mxu0 %vm387_vm0, %v7144_v10  ;;  %v7180_v18 = vld [vmem:[%s7116_s15 + $0x18] sm:$0xff]  ;;  %v7198_v21 = vld [vmem:[%s7116_s15 + $0x20] sm:$0xff]  ;;  %v7204_v23 = vld [vmem:[%s7116_s15 + $0x30] sm:$0xff]  ;;  %p6955_p13 = pneg %p6954_p12 }
  0x20   : > { %6337 = vmatmul.mubr.msk.f32.gmra.mxu0 %vm290_vm1, %v7150_v11  ;;  %6379 = vmatmul.mubr.msk.f32.gmra.mxu1 %vm290_vm1, %v7153_v12  ;;  %v7201_v22 = vld [vmem:[%s7116_s15 + $0x61] sm:$0xff]  ;;  %9088 = vst [vmem:[#allocation10_spill] sm:$0xff] %v7204_v23  ;;  %v7218_v24 = vld [vmem:[%s7116_s15 + $0x69] sm:$0xff]  ;;  %v7221_v25 = vld [vmem:[%s7116_s15 + $0x38] sm:$0xff]  ;;  %p6961_p2 = por %p6960_p1, %p6959_p0 }
  0x21   : > { %6339 = vmatprep.mubr.msk.f32.mxu0 %vm290_vm1, %v7158_v13  ;;  %6383 = vmatprep.mubr.msk.f32.mxu1 %vm290_vm1, %v223_v14  ;;  %9089 = vst [vmem:[#allocation11_spill] sm:$0xff] %v7221_v25  ;;  %v7224_v26 = vld [vmem:[%s7116_s15 + $0x79] sm:$0xff]  ;;  %v7227_v27 = vld [vmem:[%s7116_s15 + $0x48] sm:$0xff]  ;;  %v7241_v29 = vld [vmem:[%s7116_s15 + $0x50] sm:$0xff] }
  0x22   : > { %9090 = vst [vmem:[#allocation12_spill] sm:$0xff] %v7227_v27  ;;  %v7238_v28 = vld [vmem:[%s7116_s15 + $0x81] sm:$0xff]  ;;  %9091 = vst [vmem:[#allocation13_spill] sm:$0xff] %v7241_v29  ;;  %v7244_v30 = vld [vmem:[%s7116_s15 + $0x91] sm:$0xff]  ;;  %p6962_p3 = pnand %p6961_p2, %p6955_p13 }
  0x23   : > { %v7247_v31 = vld [vmem:[%s7116_s15 + $0x60] sm:$0xff]  ;;  %v7261_v33 = vld [vmem:[%s7116_s15 + $0x68] sm:$0xff]  ;;  %v7267_v35 = vld [vmem:[%s7116_s15 + $0x78] sm:$0xff] }
  0x24   : > { %6340 = vmatmul.mubr.msk.f32.gmra.mxu0 %vm290_vm1, %v7173_v15  ;;  %6384 = vmatmul.mubr.msk.f32.vlgmr.msra.gmra.mxu1 %vm290_vm1, %v224_v16  ;;  %9092 = vst [vmem:[#allocation14_spill] sm:$0xff] %v7247_v31  ;;  %v7258_v32 = vld [vmem:[%s7116_s15 + $0x99] sm:$0xff]  ;;  %9093 = vst [vmem:[#allocation15_spill] sm:$0xff] %v7261_v33  ;;  %v7264_v34 = vld [vmem:[%s7116_s15 + $0xa9] sm:$0xff] }
  0x25   : > { %6342 = vmatprep.mubr.msk.f32.mxu0 %vm290_vm1, %v7177_v17  ;;  %6386 = vmatprep.mubr.msk.f32.mxu1 %vm290_vm1, %v7180_v18  ;;  %9094 = vst [vmem:[#allocation16_spill] sm:$0xff] %v7267_v35  ;;  %v7278_v36 = vld [vmem:[%s7116_s15 + $0xb1] sm:$0xff]  ;;  %v7281_v37 = vld [vmem:[%s7116_s15 + $0x80] sm:$0xff]  ;;  %v7298_v40 = vld [vmem:[%s7116_s15 + $0xc9] sm:$0xff] }
  0x26   : > { %6482 = vmatpush3.msk.msra.mxu1 %vm387_vm0, %v5501_v9  ;;  %9095 = vst [vmem:[#allocation17_spill] sm:$0xff] %v7281_v37  ;;  %v7284_v38 = vld [vmem:[%s7116_s15 + $0xc1] sm:$0xff]  ;;  %v7287_v39 = vld [vmem:[%s7116_s15 + $0x90] sm:$0xff]  ;;  %v7301_v41 = vld [vmem:[%s7116_s15 + $0x98] sm:$0xff] }
  0x27   : > { %6581 = vmatprep.subr.msk.mxu1 %vm387_vm0, %v7188_v19  ;;  %9096 = vst [vmem:[#allocation18_spill] sm:$0xff] %v7287_v39  ;;  %9097 = vst [vmem:[#allocation19_spill] sm:$0xff] %v7301_v41  ;;  %v7304_v42 = vld [vmem:[%s7116_s15 + $0xd9] sm:$0xff]  ;;  %v7307_v43 = vld [vmem:[%s7116_s15 + $0xa8] sm:$0xff] }
  0x28   : > { %6343 = vmatmul.mubr.msk.f32.gmra.mxu0 %vm290_vm1, %v7195_v20  ;;  %6387 = vmatmul.mubr.msk.f32.gmra.mxu1 %vm290_vm1, %v7198_v21  ;;  %9098 = vst [vmem:[#allocation20_spill] sm:$0xff] %v7307_v43  ;;  %v7318_v44 = vld [vmem:[%s7116_s15 + $0xe1] sm:$0xff]  ;;  %v7321_v45 = vld [vmem:[%s7116_s15 + $0xb0] sm:$0xff]  ;;  %v7338_v48 = vld [vmem:[%s7116_s15 + $0xf9] sm:$0xff] }
  0x29   : > { %6345 = vmatprep.mubr.msk.f32.mxu0 %vm290_vm1, %v7201_v22  ;;  %6389 = vmatprep.mubr.msk.f32.mxu1 %vm290_vm1, %v7204_v23  ;;  %9099 = vst [vmem:[#allocation21_spill] sm:$0xff] %v7321_v45  ;;  %v7324_v46 = vld [vmem:[%s7116_s15 + $0xf1] sm:$0xff]  ;;  %v7327_v47 = vld [vmem:[%s7116_s15 + $0xc0] sm:$0xff]  ;;  %v7341_v49 = vld [vmem:[%s7116_s15 + $0xc8] sm:$0xff] }
  0x2a   : > { %9100 = vst [vmem:[#allocation22_spill] sm:$0xff] %v7327_v47  ;;  %9101 = vst [vmem:[#allocation23_spill] sm:$0xff] %v7341_v49  ;;  %v7344_v50 = vld [vmem:[%s7116_s15 + $0x109] sm:$0xff]  ;;  %v7347_v51 = vld [vmem:[%s7116_s15 + $0xd8] sm:$0xff] }
  0x2b   : > { %9102 = vst [vmem:[#allocation24_spill] sm:$0xff] %v7347_v51  ;;  %v7358_v52 = vld [vmem:[%s7116_s15 + $0x111] sm:$0xff]  ;;  %v7361_v53 = vld [vmem:[%s7116_s15 + $0xe0] sm:$0xff]  ;;  %v7378_v56 = vld [vmem:[%s7116_s15 + $0x129] sm:$0xff] }
  0x2c   : > { %6346 = vmatmul.mubr.msk.f32.gmra.mxu0 %vm290_vm1, %v7218_v24  ;;  %6390 = vmatmul.mubr.msk.f32.gmra.mxu1 %vm290_vm1, %v7221_v25  ;;  %9103 = vst [vmem:[#allocation25_spill] sm:$0xff] %v7358_v52  ;;  %9104 = vst [vmem:[#allocation26_spill] sm:$0xff] %v7361_v53  ;;  %v7364_v54 = vld [vmem:[%s7116_s15 + $0x121] sm:$0xff]  ;;  %v7367_v55 = vld [vmem:[%s7116_s15 + $0xf0] sm:$0xff] }
  0x2d   : > { %6348 = vmatprep.mubr.msk.f32.mxu0 %vm290_vm1, %v7224_v26  ;;  %6392 = vmatprep.mubr.msk.f32.mxu1 %vm290_vm1, %v7227_v27  ;;  %9105 = vst [vmem:[#allocation27_spill] sm:$0xff] %v7364_v54  ;;  %9106 = vst [vmem:[#allocation28_spill] sm:$0xff] %v7378_v56  ;;  %v7381_v57 = vld [vmem:[%s7116_s15 + $0xf8] sm:$0xff]  ;;  %v7387_v59 = vld [vmem:[%s7116_s15 + $0x108] sm:$0xff] }
  0x2e   : > { %9107 = vst [vmem:[#allocation29_spill] sm:$0xff] %v7381_v57  ;;  %v7384_v58 = vld [vmem:[%s7116_s15 + $0x139] sm:$0xff]  ;;  %v7398_v60 = vld [vmem:[%s7116_s15 + $0x141] sm:$0xff]  ;;  %v7401_v61 = vld [vmem:[%s7116_s15 + $0x110] sm:$0xff] }
  0x2f   : > { %9108 = vst [vmem:[#allocation30_spill] sm:$0xff] %v7384_v58  ;;  %9109 = vst [vmem:[#allocation31_spill] sm:$0xff] %v7398_v60  ;;  %v7404_v62 = vld [vmem:[%s7116_s15 + $0x120] sm:$0xff]  ;;  %v7415_v0 = vld [vmem:[%s7116_s15 + $0x128] sm:$0xff] }
  0x30   : > { %6349 = vmatmul.mubr.msk.f32.gmra.mxu0 %vm290_vm1, %v7238_v28  ;;  %6393 = vmatmul.mubr.msk.f32.gmra.mxu1 %vm290_vm1, %v7241_v29  ;;  %9110 = vst [vmem:[#allocation32_spill] sm:$0xff] %v7401_v61  ;;  %v940_v63 = vld [vmem:[%s7116_s15 + $0x2] sm:$0xff]  ;;  %v941_v1 = vld [vmem:[%s7116_s15 + $0xa] sm:$0xff]  ;;  %v7419_v2 = vld [vmem:[%s7116_s15 + $0x138] sm:$0xff] }
  0x31   : > { %6351 = vmatprep.mubr.msk.f32.mxu0 %vm290_vm1, %v7244_v30  ;;  %6395 = vmatprep.mubr.msk.f32.mxu1 %vm290_vm1, %v7247_v31  ;;  %v7422_v3 = vld [vmem:[%s7116_s15 + $0x1a] sm:$0xff]  ;;  %v7440_v14 = vld [vmem:[%s7116_s15 + $0x22] sm:$0xff]  ;;  %v7445_v16 = vld [vmem:[%s7116_s15 + $0x150] sm:$0xff] }
  0x32   : > { %v7427_v5 = vld [vmem:[%s9033_s1 + $0x18] sm:$0xf]  ;;  %v7437_v9 = vld [vmem:[%s7116_s15 + $0x140] sm:$0xff]  ;;  %v7467_v12 = vld [vmem:[%s7116_s15 + $0x168] sm:$0xff] }
  0x33   : > { %v7470_v8 = vld [vmem:[%s7116_s15 + $0x4a] sm:$0xff]  ;;  %v7484_v4 = vld [vmem:[%s7116_s15 + $0x52] sm:$0xff] }
  0x34   : > { %6352 = vmatmul.mubr.msk.f32.gmra.mxu0 %vm290_vm1, %v7258_v32  ;;  %6396 = vmatmul.mubr.msk.f32.gmra.mxu1 %vm290_vm1, %v7261_v33  ;;  %v7481_v6 = vld [vmem:[%s7116_s15 + $0x170] sm:$0xff] }
  0x35   : > { %6354 = vmatprep.mubr.msk.f32.mxu0 %vm290_vm1, %v7264_v34  ;;  %6398 = vmatprep.mubr.msk.f32.mxu1 %vm290_vm1, %v7267_v35 }
  0x38   : > { %6355 = vmatmul.mubr.msk.f32.gmra.mxu0 %vm290_vm1, %v7278_v36  ;;  %6399 = vmatmul.mubr.msk.f32.gmra.mxu1 %vm290_vm1, %v7281_v37 }
  0x39   : > { %6357 = vmatprep.mubr.msk.f32.mxu0 %vm290_vm1, %v7284_v38  ;;  %6401 = vmatprep.mubr.msk.f32.mxu1 %vm290_vm1, %v7287_v39 }
  0x3c   : > { %6358 = vmatmul.mubr.msk.f32.gmra.mxu0 %vm290_vm1, %v7298_v40  ;;  %6402 = vmatmul.mubr.msk.f32.gmra.mxu1 %vm290_vm1, %v7301_v41 }
  0x3d   : > { %6360 = vmatprep.mubr.msk.f32.mxu0 %vm290_vm1, %v7304_v42  ;;  %6404 = vmatprep.mubr.msk.f32.mxu1 %vm290_vm1, %v7307_v43 }
  0x40   : > { %6361 = vmatmul.mubr.msk.f32.gmra.mxu0 %vm290_vm1, %v7318_v44  ;;  %6405 = vmatmul.mubr.msk.f32.gmra.mxu1 %vm290_vm1, %v7321_v45 }
  0x41   : > { %6363 = vmatprep.mubr.msk.f32.mxu0 %vm290_vm1, %v7324_v46  ;;  %6407 = vmatprep.mubr.msk.f32.mxu1 %vm290_vm1, %v7327_v47 }
  0x44   : > { %6364 = vmatmul.mubr.msk.f32.gmra.mxu0 %vm290_vm1, %v7338_v48  ;;  %6408 = vmatmul.mubr.msk.f32.gmra.mxu1 %vm290_vm1, %v7341_v49 }
  0x45   : > { %6366 = vmatprep.mubr.msk.f32.mxu0 %vm290_vm1, %v7344_v50  ;;  %6410 = vmatprep.mubr.msk.f32.mxu1 %vm290_vm1, %v7347_v51 }
  0x48   : > { %6367 = vmatmul.mubr.msk.f32.gmra.mxu0 %vm290_vm1, %v7358_v52  ;;  %6411 = vmatmul.mubr.msk.f32.gmra.mxu1 %vm290_vm1, %v7361_v53  ;;  %v7520_v52 = vld [vmem:[%s7116_s15 + $0x92] sm:$0xff] }
  0x49   : > { %6369 = vmatprep.mubr.msk.f32.mxu0 %vm290_vm1, %v7364_v54  ;;  %6413 = vmatprep.mubr.msk.f32.mxu1 %vm290_vm1, %v7367_v55  ;;  %v7510_v54 = vld [vmem:[%s9033_s1 + $0x1c] sm:$0xf] }
  0x4c   : > { %6370 = vmatmul.mubr.msk.f32.gmra.mxu0 %vm290_vm1, %v7378_v56  ;;  %6414 = vmatmul.mubr.msk.f32.gmra.mxu1 %vm290_vm1, %v7381_v57  ;;  %v7501_v56 = vld [vmem:[%s7116_s15 + $0x7a] sm:$0xff] }
  0x4d   : > { %6372 = vmatprep.mubr.msk.f32.mxu0 %vm290_vm1, %v7384_v58  ;;  %6416 = vmatprep.mubr.msk.f32.mxu1 %vm290_vm1, %v7387_v59  ;;  %v7498_v58 = vld [vmem:[%s7116_s15 + $0x6a] sm:$0xff] }
  0x50   : > { %6373 = vmatmul.mubr.msk.f32.gmra.mxu0 %vm290_vm1, %v7398_v60  ;;  %6417 = vmatmul.mubr.msk.f32.gmra.mxu1 %vm290_vm1, %v7401_v61  ;;  %v7487_v60 = vld [vmem:[%s7116_s15 + $0x62] sm:$0xff] }
  0x51   : > { %6419 = vmatprep.mubr.msk.f32.mxu1 %vm290_vm1, %v7404_v62  ;;  %6433 = vmatprep.mubr.msk.f32.mxu0 %vm290_vm1, %v940_v63  ;;  %v7448_v63 = vld [vmem:[%s7116_s15 + $0x32] sm:$0xff] }
  0x54   : > { %6420 = vmatmul.mubr.msk.f32.gmra.mxu1 %vm290_vm1, %v7415_v0  ;;  %6434 = vmatmul.mubr.msk.f32.vlgmr.msra.gmra.mxu0 %vm290_vm1, %v941_v1  ;;  %v7464_v1 = vld [vmem:[%s7116_s15 + $0x3a] sm:$0xff] }
  0x55   : > { %6532 = vmatpush3.msk.msra.mxu0 %vm387_vm0, %v7144_v10  ;;  %6422 = vmatprep.mubr.msk.f32.mxu1 %vm290_vm1, %v7419_v2  ;;  %v7461_v10 = vld [vmem:[%s7116_s15 + $0x158] sm:$0xff] }
  0x56   : > { %6436 = vmatprep.mubr.msk.f32.mxu0 %vm290_vm1, %v7422_v3  ;;  %6631 = vmatprep.subr.msk.mxu0 %vm387_vm0, %v7427_v5 }
  0x58   : > { %6423 = vmatmul.mubr.msk.f32.gmra.mxu1 %vm290_vm1, %v7437_v9  ;;  %6437 = vmatmul.mubr.msk.f32.gmra.mxu0 %vm290_vm1, %v7440_v14 }
  0x59   : > { %6425 = vmatprep.mubr.msk.f32.mxu1 %vm290_vm1, %v7445_v16  ;;  %6439 = vmatprep.mubr.msk.f32.mxu0 %vm290_vm1, %v7448_v63 }
  0x5c   : > { %6426 = vmatmul.mubr.msk.f32.gmra.mxu1 %vm290_vm1, %v7461_v10  ;;  %6440 = vmatmul.mubr.msk.f32.gmra.mxu0 %vm290_vm1, %v7464_v1 }
  0x5d   : > { %6428 = vmatprep.mubr.msk.f32.mxu1 %vm290_vm1, %v7467_v12  ;;  %6442 = vmatprep.mubr.msk.f32.mxu0 %vm290_vm1, %v7470_v8 }
  0x60   : > { %6429 = vmatmul.mubr.msk.f32.gmra.mxu1 %vm290_vm1, %v7481_v6  ;;  %6443 = vmatmul.mubr.msk.f32.gmra.mxu0 %vm290_vm1, %v7484_v4 }
  0x61   : > { %6445 = vmatprep.mubr.msk.f32.mxu0 %vm290_vm1, %v7487_v60  ;;  %6483 = vmatprep.mubr.msk.f32.mxu1 %vm290_vm1, %v7180_v18  ;;  %v7517_v18 = vld [vmem:[%s7116_s15 + $0x82] sm:$0xff] }
  0x64   : > { %6446 = vmatmul.mubr.msk.f32.gmra.mxu0 %vm290_vm1, %v7498_v58  ;;  %6484 = vmatmul.mubr.msk.f32.vlgmr.msra.gmra.mxu1 %vm290_vm1, %v7198_v21  ;;  %v7535_v21 = vld [vmem:[%s7116_s15 + $0x9a] sm:$0xff] }
  0x65   : > { %6448 = vmatprep.mubr.msk.f32.mxu0 %vm290_vm1, %v7501_v56  ;;  %6486 = vmatprep.mubr.msk.f32.mxu1 %vm290_vm1, %v7204_v23  ;;  %v7650_v23 = vld [vmem:[%s7116_s15 + $0x16a] sm:$0xff] }
  0x66   : > { %6582 = vmatpush3.msk.msra.mxu1 %vm387_vm0, %v7188_v19  ;;  %v7538_v19 = vld [vmem:[%s7116_s15 + $0xaa] sm:$0xff] }
  0x67   : > { %6681 = vmatprep.subr.msk.mxu1 %vm387_vm0, %v7510_v54  ;;  %9111 = vst [vmem:[#allocation33_spill] sm:$0xff] %v7538_v19 }
  0x68   : > { %6449 = vmatmul.mubr.msk.f32.gmra.mxu0 %vm290_vm1, %v7517_v18  ;;  %6487 = vmatmul.mubr.msk.f32.gmra.mxu1 %vm290_vm1, %v7221_v25  ;;  %v7549_v25 = vld [vmem:[%s7116_s15 + $0xb2] sm:$0xff] }
  0x69   : > { %6451 = vmatprep.mubr.msk.f32.mxu0 %vm290_vm1, %v7520_v52  ;;  %6489 = vmatprep.mubr.msk.f32.mxu1 %vm290_vm1, %v7227_v27  ;;  %9112 = vst [vmem:[#allocation34_spill] sm:$0xff] %v7549_v25  ;;  %v7552_v27 = vld [vmem:[%s7116_s15 + $0xc2] sm:$0xff] }
  0x6a   : > { %9113 = vst [vmem:[#allocation35_spill] sm:$0xff] %v7552_v27 }
  0x6c   : > { %6452 = vmatmul.mubr.msk.f32.gmra.mxu0 %vm290_vm1, %v7535_v21  ;;  %6490 = vmatmul.mubr.msk.f32.gmra.mxu1 %vm290_vm1, %v7241_v29  ;;  %v7563_v29 = vld [vmem:[%s7116_s15 + $0xca] sm:$0xff] }
  0x6d   : > { %6454 = vmatprep.mubr.msk.f32.mxu0 %vm290_vm1, %v7538_v19  ;;  %6492 = vmatprep.mubr.msk.f32.mxu1 %vm290_vm1, %v7247_v31  ;;  %9114 = vst [vmem:[#allocation36_spill] sm:$0xff] %v7563_v29  ;;  %v7566_v31 = vld [vmem:[%s7116_s15 + $0xda] sm:$0xff] }
  0x6e   : > { %9115 = vst [vmem:[#allocation37_spill] sm:$0xff] %v7566_v31 }
  0x70   : > { %6455 = vmatmul.mubr.msk.f32.gmra.mxu0 %vm290_vm1, %v7549_v25  ;;  %6493 = vmatmul.mubr.msk.f32.gmra.mxu1 %vm290_vm1, %v7261_v33  ;;  %v7577_v33 = vld [vmem:[%s7116_s15 + $0xe2] sm:$0xff] }
  0x71   : > { %6457 = vmatprep.mubr.msk.f32.mxu0 %vm290_vm1, %v7552_v27  ;;  %6495 = vmatprep.mubr.msk.f32.mxu1 %vm290_vm1, %v7267_v35  ;;  %9116 = vst [vmem:[#allocation38_spill] sm:$0xff] %v7577_v33  ;;  %v7580_v35 = vld [vmem:[%s7116_s15 + $0xf2] sm:$0xff] }
  0x72   : > { %9117 = vst [vmem:[#allocation39_spill] sm:$0xff] %v7580_v35 }
  0x74   : > { %6458 = vmatmul.mubr.msk.f32.gmra.mxu0 %vm290_vm1, %v7563_v29  ;;  %6496 = vmatmul.mubr.msk.f32.gmra.mxu1 %vm290_vm1, %v7281_v37  ;;  %v7591_v37 = vld [vmem:[%s7116_s15 + $0xfa] sm:$0xff] }
  0x75   : > { %6460 = vmatprep.mubr.msk.f32.mxu0 %vm290_vm1, %v7566_v31  ;;  %6498 = vmatprep.mubr.msk.f32.mxu1 %vm290_vm1, %v7287_v39  ;;  %9118 = vst [vmem:[#allocation40_spill] sm:$0xff] %v7591_v37  ;;  %v7594_v39 = vld [vmem:[%s7116_s15 + $0x10a] sm:$0xff] }
  0x76   : > { %9119 = vst [vmem:[#allocation41_spill] sm:$0xff] %v7594_v39 }
  0x78   : > { %6461 = vmatmul.mubr.msk.f32.gmra.mxu0 %vm290_vm1, %v7577_v33  ;;  %6499 = vmatmul.mubr.msk.f32.gmra.mxu1 %vm290_vm1, %v7301_v41  ;;  %v7605_v41 = vld [vmem:[%s7116_s15 + $0x112] sm:$0xff] }
  0x79   : > { %6463 = vmatprep.mubr.msk.f32.mxu0 %vm290_vm1, %v7580_v35  ;;  %6501 = vmatprep.mubr.msk.f32.mxu1 %vm290_vm1, %v7307_v43  ;;  %v7608_v43 = vld [vmem:[%s7116_s15 + $0x122] sm:$0xff] }
  0x7c   : > { %6464 = vmatmul.mubr.msk.f32.gmra.mxu0 %vm290_vm1, %v7591_v37  ;;  %6502 = vmatmul.mubr.msk.f32.gmra.mxu1 %vm290_vm1, %v7321_v45  ;;  %v7619_v45 = vld [vmem:[%s7116_s15 + $0x12a] sm:$0xff] }
  0x7d   : > { %6466 = vmatprep.mubr.msk.f32.mxu0 %vm290_vm1, %v7594_v39  ;;  %6504 = vmatprep.mubr.msk.f32.mxu1 %vm290_vm1, %v7327_v47  ;;  %v7622_v47 = vld [vmem:[%s7116_s15 + $0x13a] sm:$0xff] }
  0x80   : > { %6467 = vmatmul.mubr.msk.f32.gmra.mxu0 %vm290_vm1, %v7605_v41  ;;  %6505 = vmatmul.mubr.msk.f32.gmra.mxu1 %vm290_vm1, %v7341_v49  ;;  %v7633_v49 = vld [vmem:[%s7116_s15 + $0x142] sm:$0xff] }
  0x81   : > { %6469 = vmatprep.mubr.msk.f32.mxu0 %vm290_vm1, %v7608_v43  ;;  %6507 = vmatprep.mubr.msk.f32.mxu1 %vm290_vm1, %v7347_v51  ;;  %v7636_v51 = vld [vmem:[%s7116_s15 + $0x152] sm:$0xff] }
  0x84   : > { %6470 = vmatmul.mubr.msk.f32.gmra.mxu0 %vm290_vm1, %v7619_v45  ;;  %6508 = vmatmul.mubr.msk.f32.gmra.mxu1 %vm290_vm1, %v7361_v53  ;;  %v7647_v53 = vld [vmem:[%s7116_s15 + $0x15a] sm:$0xff] }
  0x85   : > { %6472 = vmatprep.mubr.msk.f32.mxu0 %vm290_vm1, %v7622_v47  ;;  %6510 = vmatprep.mubr.msk.f32.mxu1 %vm290_vm1, %v7367_v55 }
  0x88   : > { %6473 = vmatmul.mubr.msk.f32.gmra.mxu0 %vm290_vm1, %v7633_v49  ;;  %6511 = vmatmul.mubr.msk.f32.gmra.mxu1 %vm290_vm1, %v7381_v57  ;;  %v7661_v57 = vld [vmem:[%s7116_s15 + $0x172] sm:$0xff] }
  0x89   : > { %6475 = vmatprep.mubr.msk.f32.mxu0 %vm290_vm1, %v7636_v51  ;;  %6513 = vmatprep.mubr.msk.f32.mxu1 %vm290_vm1, %v7387_v59 }
  0x8c   : > { %6476 = vmatmul.mubr.msk.f32.gmra.mxu0 %vm290_vm1, %v7647_v53  ;;  %6514 = vmatmul.mubr.msk.f32.gmra.mxu1 %vm290_vm1, %v7401_v61  ;;  %v7674_v61 = vld [vmem:[%s9033_s1 + $0x20] sm:$0xf] }
  0x8d   : > { %6478 = vmatprep.mubr.msk.f32.mxu0 %vm290_vm1, %v7650_v23  ;;  %6516 = vmatprep.mubr.msk.f32.mxu1 %vm290_vm1, %v7404_v62 }
  0x90   : > { %6479 = vmatmul.mubr.msk.f32.gmra.mxu0 %vm290_vm1, %v7661_v57  ;;  %6517 = vmatmul.mubr.msk.f32.gmra.mxu1 %vm290_vm1, %v7415_v0 }
  0x91   : > { %6519 = vmatprep.mubr.msk.f32.mxu1 %vm290_vm1, %v7419_v2  ;;  %6533 = vmatprep.mubr.msk.f32.mxu0 %vm290_vm1, %v7130_v7  ;;  %v7697_v7 = vld [vmem:[%s7116_s15 + $0x180] sm:$0xff] }
  0x94   : > { %6520 = vmatmul.mubr.msk.f32.gmra.mxu1 %vm290_vm1, %v7437_v9  ;;  %6534 = vmatmul.mubr.msk.f32.vlgmr.msra.gmra.mxu0 %vm290_vm1, %v7150_v11  ;;  %v7708_v11 = vld [vmem:[%s7116_s15 + $0x188] sm:$0xff] }
  0x95   : > { %6632 = vmatpush3.msk.msra.mxu0 %vm387_vm0, %v7427_v5  ;;  %6522 = vmatprep.mubr.msk.f32.mxu1 %vm290_vm1, %v7445_v16  ;;  %v9122_v5 = vld [vmem:[#allocation28_spill] sm:$0xff] }
  0x96   : > { %6536 = vmatprep.mubr.msk.f32.mxu0 %vm290_vm1, %v7158_v13  ;;  %6731 = vmatprep.subr.msk.mxu0 %vm387_vm0, %v7674_v61 }
  0x98   : > { %6523 = vmatmul.mubr.msk.f32.gmra.mxu1 %vm290_vm1, %v7461_v10  ;;  %6537 = vmatmul.mubr.msk.f32.gmra.mxu0 %vm290_vm1, %v7173_v15 }
  0x99   : > { %6525 = vmatprep.mubr.msk.f32.mxu1 %vm290_vm1, %v7467_v12  ;;  %6539 = vmatprep.mubr.msk.f32.mxu0 %vm290_vm1, %v7177_v17 }
  0x9c   : > { %6526 = vmatmul.mubr.msk.f32.gmra.mxu1 %vm290_vm1, %v7481_v6  ;;  %6540 = vmatmul.mubr.msk.f32.gmra.mxu0 %vm290_vm1, %v7195_v20 }
  0x9d   : > { %6528 = vmatprep.mubr.msk.f32.mxu1 %vm290_vm1, %v7697_v7  ;;  %6542 = vmatprep.mubr.msk.f32.mxu0 %vm290_vm1, %v7201_v22 }
  0xa0   : > { %6529 = vmatmul.mubr.msk.f32.gmra.mxu1 %vm290_vm1, %v7708_v11  ;;  %6543 = vmatmul.mubr.msk.f32.gmra.mxu0 %vm290_vm1, %v7218_v24 }
  0xa1   : > { %6545 = vmatprep.mubr.msk.f32.mxu0 %vm290_vm1, %v7224_v26  ;;  %6583 = vmatprep.mubr.msk.f32.mxu1 %vm290_vm1, %v7422_v3  ;;  %v9121_v3 = vld [vmem:[#allocation27_spill] sm:$0xff] }
  0xa4   : > { %6546 = vmatmul.mubr.msk.f32.gmra.mxu0 %vm290_vm1, %v7238_v28  ;;  %6584 = vmatmul.mubr.msk.f32.vlgmr.msra.gmra.mxu1 %vm290_vm1, %v7440_v14  ;;  %v9123_v14 = vld [vmem:[#allocation30_spill] sm:$0xff] }
  0xa5   : > { %6548 = vmatprep.mubr.msk.f32.mxu0 %vm290_vm1, %v7244_v30  ;;  %6586 = vmatprep.mubr.msk.f32.mxu1 %vm290_vm1, %v7448_v63 }
  0xa6   : > { %6682 = vmatpush3.msk.msra.mxu1 %vm387_vm0, %v7510_v54  ;;  %v9120_v54 = vld [vmem:[#allocation25_spill] sm:$0xff] }
  0xa8   : > { %6549 = vmatmul.mubr.msk.f32.gmra.mxu0 %vm290_vm1, %v7258_v32  ;;  %6587 = vmatmul.mubr.msk.f32.gmra.mxu1 %vm290_vm1, %v7464_v1 }
  0xa9   : > { %6551 = vmatprep.mubr.msk.f32.mxu0 %vm290_vm1, %v7264_v34  ;;  %6589 = vmatprep.mubr.msk.f32.mxu1 %vm290_vm1, %v7470_v8 }
  0xac   : > { %6552 = vmatmul.mubr.msk.f32.gmra.mxu0 %vm290_vm1, %v7278_v36  ;;  %6590 = vmatmul.mubr.msk.f32.gmra.mxu1 %vm290_vm1, %v7484_v4 }
  0xad   : > { %6554 = vmatprep.mubr.msk.f32.mxu0 %vm290_vm1, %v7284_v38  ;;  %6592 = vmatprep.mubr.msk.f32.mxu1 %vm290_vm1, %v7487_v60 }
  0xb0   : > { %6555 = vmatmul.mubr.msk.f32.gmra.mxu0 %vm290_vm1, %v7298_v40  ;;  %6593 = vmatmul.mubr.msk.f32.gmra.mxu1 %vm290_vm1, %v7498_v58 }
  0xb1   : > { %6557 = vmatprep.mubr.msk.f32.mxu0 %vm290_vm1, %v7304_v42  ;;  %6595 = vmatprep.mubr.msk.f32.mxu1 %vm290_vm1, %v7501_v56 }
  0xb4   : > { %6558 = vmatmul.mubr.msk.f32.gmra.mxu0 %vm290_vm1, %v7318_v44  ;;  %6596 = vmatmul.mubr.msk.f32.gmra.mxu1 %vm290_vm1, %v7517_v18 }
  0xb5   : > { %6560 = vmatprep.mubr.msk.f32.mxu0 %vm290_vm1, %v7324_v46  ;;  %6598 = vmatprep.mubr.msk.f32.mxu1 %vm290_vm1, %v7520_v52 }
  0xb8   : > { %6561 = vmatmul.mubr.msk.f32.gmra.mxu0 %vm290_vm1, %v7338_v48  ;;  %6599 = vmatmul.mubr.msk.f32.gmra.mxu1 %vm290_vm1, %v7535_v21 }
  0xb9   : > { %6563 = vmatprep.mubr.msk.f32.mxu0 %vm290_vm1, %v7344_v50  ;;  %6601 = vmatprep.mubr.msk.f32.mxu1 %vm290_vm1, %v7538_v19  ;;  %v9127_v19 = vld [vmem:[#allocation8_spill] sm:$0xff] }
  0xbc   : > { %6564 = vmatmul.mubr.msk.f32.gmra.mxu0 %vm290_vm1, %v9120_v54  ;;  %6602 = vmatmul.mubr.msk.f32.gmra.mxu1 %vm290_vm1, %v7549_v25  ;;  %v9124_v25 = vld [vmem:[#allocation31_spill] sm:$0xff] }
  0xbd   : > { %6566 = vmatprep.mubr.msk.f32.mxu0 %vm290_vm1, %v9121_v3  ;;  %6604 = vmatprep.mubr.msk.f32.mxu1 %vm290_vm1, %v7552_v27  ;;  %v9125_v27 = vld [vmem:[#allocation6_spill] sm:$0xff] }
  0xc0   : > { %6567 = vmatmul.mubr.msk.f32.gmra.mxu0 %vm290_vm1, %v9122_v5  ;;  %6605 = vmatmul.mubr.msk.f32.gmra.mxu1 %vm290_vm1, %v7563_v29  ;;  %v9126_v29 = vld [vmem:[#allocation7_spill] sm:$0xff] }
  0xc1   : > { %6569 = vmatprep.mubr.msk.f32.mxu0 %vm290_vm1, %v9123_v14  ;;  %6607 = vmatprep.mubr.msk.f32.mxu1 %vm290_vm1, %v7566_v31  ;;  %v7801_v31 = vld [vmem:[%s7116_s15 + $0x181] sm:$0xff] }
  0xc4   : > { %6570 = vmatmul.mubr.msk.f32.gmra.mxu0 %vm290_vm1, %v9124_v25  ;;  %6608 = vmatmul.mubr.msk.f32.gmra.mxu1 %vm290_vm1, %v7577_v33  ;;  %v9128_v33 = vld [vmem:[#allocation9_spill] sm:$0xff] }
  0xc5   : > { %6572 = vmatprep.mubr.msk.f32.mxu0 %vm290_vm1, %v9125_v27  ;;  %6610 = vmatprep.mubr.msk.f32.mxu1 %vm290_vm1, %v7580_v35  ;;  %v7812_v27 = vld [vmem:[%s7116_s15 + $0x189] sm:$0xff] }
  0xc6   : > { %v9144_v35 = vld [vmem:[#allocation21_spill] sm:$0xff] }
  0xc8   : > { %6573 = vmatmul.mubr.msk.f32.gmra.mxu0 %vm290_vm1, %v9126_v29  ;;  %6611 = vmatmul.mubr.msk.f32.gmra.mxu1 %vm290_vm1, %v7591_v37  ;;  %v9129_v29 = vld [vmem:[#allocation10_spill] sm:$0xff] }
  0xc9   : > { %6575 = vmatprep.mubr.msk.f32.mxu0 %vm290_vm1, %v9127_v19  ;;  %6613 = vmatprep.mubr.msk.f32.mxu1 %vm290_vm1, %v7594_v39 }
  0xcc   : > { %6576 = vmatmul.mubr.msk.f32.gmra.mxu0 %vm290_vm1, %v9128_v33  ;;  %6614 = vmatmul.mubr.msk.f32.gmra.mxu1 %vm290_vm1, %v7605_v41  ;;  %v9130_v33 = vld [vmem:[#allocation11_spill] sm:$0xff]  ;;  %v9131_v41 = vld [vmem:[#allocation12_spill] sm:$0xff] }
  0xcd   : > { %6578 = vmatprep.mubr.msk.f32.mxu0 %vm290_vm1, %v7801_v31  ;;  %6616 = vmatprep.mubr.msk.f32.mxu1 %vm290_vm1, %v7608_v43  ;;  %v9132_v43 = vld [vmem:[#allocation13_spill] sm:$0xff] }
  0xd0   : > { %6579 = vmatmul.mubr.msk.f32.gmra.mxu0 %vm290_vm1, %v7812_v27  ;;  %6617 = vmatmul.mubr.msk.f32.gmra.mxu1 %vm290_vm1, %v7619_v45  ;;  %v9133_v45 = vld [vmem:[#allocation14_spill] sm:$0xff] }
  0xd1   : > { %6619 = vmatprep.mubr.msk.f32.mxu1 %vm290_vm1, %v7622_v47  ;;  %6633 = vmatprep.mubr.msk.f32.mxu0 %vm290_vm1, %v9129_v29  ;;  %v7841_v47 = vld [vmem:[%s7116_s15 + $0x182] sm:$0xff] }
  0xd2   : > { %9134 = vst [vmem:[#allocation25_spill] sm:$0xff] %v7841_v47 }
  0xd4   : > { %6620 = vmatmul.mubr.msk.f32.gmra.mxu1 %vm290_vm1, %v7633_v49  ;;  %6634 = vmatmul.mubr.msk.f32.vlgmr.msra.gmra.mxu0 %vm290_vm1, %v9130_v33 }
  0xd5   : > { %6732 = vmatpush3.msk.msra.mxu0 %vm387_vm0, %v7674_v61  ;;  %6622 = vmatprep.mubr.msk.f32.mxu1 %vm290_vm1, %v7636_v51  ;;  %v9135_v51 = vld [vmem:[#allocation15_spill] sm:$0xff] }
  0xd6   : > { %6636 = vmatprep.mubr.msk.f32.mxu0 %vm290_vm1, %v9131_v41 }
  0xd8   : > { %6623 = vmatmul.mubr.msk.f32.gmra.mxu1 %vm290_vm1, %v7647_v53  ;;  %6637 = vmatmul.mubr.msk.f32.gmra.mxu0 %vm290_vm1, %v9132_v43  ;;  %v9136_v53 = vld [vmem:[#allocation16_spill] sm:$0xff]  ;;  %v9140_v43 = vld [vmem:[#allocation18_spill] sm:$0xff] }
  0xd9   : > { %6625 = vmatprep.mubr.msk.f32.mxu1 %vm290_vm1, %v7650_v23  ;;  %6639 = vmatprep.mubr.msk.f32.mxu0 %vm290_vm1, %v9133_v45  ;;  %v7854_v23 = vld [vmem:[%s7116_s15 + $0x18a] sm:$0xff] }
  0xda   : > { %9137 = vst [vmem:[#allocation27_spill] sm:$0xff] %v7854_v23 }
  0xdc   : > { %v6335_v49 = vpop.f32.mrf.mxu0  ;;  %v7843_v61 = vpop.f32.mrf.mxu1  ;;  %6626 = vmatmul.mubr.msk.f32.gmra.mxu1 %vm290_vm1, %v7661_v57  ;;  %6640 = vmatmul.mubr.msk.f32.gmra.mxu0 %vm290_vm1, %v9135_v51  ;;  %v9139_v57 = vld [vmem:[#allocation17_spill] sm:$0xff] }
  0xdd   : > { %6628 = vmatprep.mubr.msk.f32.mxu1 %vm290_vm1, %v7841_v47  ;;  %6642 = vmatprep.mubr.msk.f32.mxu0 %vm290_vm1, %v9136_v53  ;;  %v9142_v47 = vld [vmem:[#allocation19_spill] sm:$0xff] }
  0xde   : > { %v457_v19 = vpop.f32.mrf.mxu0  ;;  %v7856_v29 = vpop.f32.mrf.mxu1 }
  0xdf   : > { %9138 = vst [vmem:[#allocation28_spill] sm:$0xff] %v7856_v29 }
  0xe0   : > { %v6338_v33 = vpop.f32.mrf.mxu0  ;;  %v7858_v41 = vpop.f32.mrf.mxu1  ;;  %6629 = vmatmul.mubr.msk.f32.gmra.mxu1 %vm290_vm1, %v7854_v23  ;;  %6643 = vmatmul.mubr.msk.f32.gmra.mxu0 %vm290_vm1, %v9139_v57  ;;  %v9143_v57 = vld [vmem:[#allocation20_spill] sm:$0xff] }
  0xe1   : > { %6645 = vmatprep.mubr.msk.f32.mxu0 %vm290_vm1, %v9140_v43  ;;  %6683 = vmatprep.mubr.msk.f32.mxu1 %vm290_vm1, %v7158_v13 }
  0xe2   : > { %v467_v45 = vpop.f32.mrf.mxu0  ;;  %v7868_v51 = vpop.f32.mrf.mxu1 }
  0xe3   : > { %9141 = vst [vmem:[#allocation30_spill] sm:$0xff] %v7868_v51 }
  0xe4   : > { %v6341_v53 = vpop.f32.mrf.mxu0  ;;  %v6385_v29 = vpop.f32.mrf.mxu1  ;;  %6646 = vmatmul.mubr.msk.f32.gmra.mxu0 %vm290_vm1, %v9142_v47  ;;  %6684 = vmatmul.mubr.msk.f32.vlgmr.msra.gmra.mxu1 %vm290_vm1, %v7173_v15  ;;  %v9145_v47 = vld [vmem:[#allocation22_spill] sm:$0xff] }
  0xe5   : > { %v7874_v23 = vadd.f32 %v6385_v29, %v6335_v49  ;;  %6648 = vmatprep.mubr.msk.f32.mxu0 %vm290_vm1, %v9143_v57  ;;  %6686 = vmatprep.mubr.msk.f32.mxu1 %vm290_vm1, %v7177_v17 }
  0xe6   : > { %v477_v13 = vpop.f32.mrf.mxu0  ;;  %v781_v43 = vpop.f32.mrf.mxu1 }
  0xe7   : > { %v7880_v39 = vadd.f32 %v781_v43, %v457_v19  ;;  %v9146_v43 = vld [vmem:[#allocation23_spill] sm:$0xff] }
  0xe8   : > { %v6344_v51 = vpop.f32.mrf.mxu0  ;;  %v6388_v37 = vpop.f32.mrf.mxu1  ;;  %6649 = vmatmul.mubr.msk.f32.gmra.mxu0 %vm290_vm1, %v9144_v35  ;;  %6687 = vmatmul.mubr.msk.f32.gmra.mxu1 %vm290_vm1, %v7195_v20  ;;  %v9147_v35 = vld [vmem:[#allocation24_spill] sm:$0xff] }
  0xe9   : > { %v7886_v15 = vadd.f32 %v6388_v37, %v6338_v33  ;;  %6651 = vmatprep.mubr.msk.f32.mxu0 %vm290_vm1, %v9145_v47  ;;  %6689 = vmatprep.mubr.msk.f32.mxu1 %vm290_vm1, %v7201_v22 }
  0xea   : > { %v487_v17 = vpop.f32.mrf.mxu0  ;;  %v791_v49 = vpop.f32.mrf.mxu1 }
  0xeb   : > { %v7892_v19 = vadd.f32 %v791_v49, %v467_v45  ;;  %v9148_v49 = vld [vmem:[#allocation26_spill] sm:$0xff] }
  0xec   : > { %v6347_v29 = vpop.f32.mrf.mxu0  ;;  %v6391_v57 = vpop.f32.mrf.mxu1  ;;  %6652 = vmatmul.mubr.msk.f32.gmra.mxu0 %vm290_vm1, %v9146_v43  ;;  %6690 = vmatmul.mubr.msk.f32.gmra.mxu1 %vm290_vm1, %v7218_v24 }
  0xed   : > { %v7898_v20 = vadd.f32 %v6391_v57, %v6341_v53  ;;  %6654 = vmatprep.mubr.msk.f32.mxu0 %vm290_vm1, %v9147_v35  ;;  %6692 = vmatprep.mubr.msk.f32.mxu1 %vm290_vm1, %v7224_v26  ;;  %v9149_v35 = vld [vmem:[#allocation29_spill] sm:$0xff] }
  0xee   : > { %v497_v22 = vpop.f32.mrf.mxu0  ;;  %v801_v37 = vpop.f32.mrf.mxu1 }
  0xef   : > { %v7904_v33 = vadd.f32 %v801_v37, %v477_v13 }
  0xf0   : > { %v6350_v45 = vpop.f32.mrf.mxu0  ;;  %v6394_v47 = vpop.f32.mrf.mxu1  ;;  %6655 = vmatmul.mubr.msk.f32.gmra.mxu0 %vm290_vm1, %v9148_v49  ;;  %6693 = vmatmul.mubr.msk.f32.gmra.mxu1 %vm290_vm1, %v7238_v28 }
  0xf1   : > { %v7910_v24 = vadd.f32 %v6394_v47, %v6344_v51  ;;  %6657 = vmatprep.mubr.msk.f32.mxu0 %vm290_vm1, %v7367_v55  ;;  %6695 = vmatprep.mubr.msk.f32.mxu1 %vm290_vm1, %v7244_v30  ;;  %v9150_v47 = vld [vmem:[#allocation32_spill] sm:$0xff] }
  0xf2   : > { %v507_v26 = vpop.f32.mrf.mxu0  ;;  %v811_v53 = vpop.f32.mrf.mxu1 }
  0xf3   : > { %v7916_v13 = vadd.f32 %v811_v53, %v487_v17 }
  0xf4   : > { %v6353_v57 = vpop.f32.mrf.mxu0  ;;  %v6397_v43 = vpop.f32.mrf.mxu1  ;;  %6658 = vmatmul.mubr.msk.f32.gmra.mxu0 %vm290_vm1, %v9149_v35  ;;  %6696 = vmatmul.mubr.msk.f32.gmra.mxu1 %vm290_vm1, %v7258_v32 }
  0xf5   : > { %v7922_v28 = vadd.f32 %v6397_v43, %v6347_v29  ;;  %6660 = vmatprep.mubr.msk.f32.mxu0 %vm290_vm1, %v7387_v59  ;;  %6698 = vmatprep.mubr.msk.f32.mxu1 %vm290_vm1, %v7264_v34 }
  0xf6   : > { %v517_v30 = vpop.f32.mrf.mxu0  ;;  %v821_v55 = vpop.f32.mrf.mxu1 }
  0xf7   : > { %v7928_v51 = vadd.f32 %v821_v55, %v497_v22 }
  0xf8   : > { %v6356_v17 = vpop.f32.mrf.mxu0  ;;  %v6400_v37 = vpop.f32.mrf.mxu1  ;;  %6661 = vmatmul.mubr.msk.f32.gmra.mxu0 %vm290_vm1, %v9150_v47  ;;  %6699 = vmatmul.mubr.msk.f32.gmra.mxu1 %vm290_vm1, %v7278_v36 }
  0xf9   : > { %v7934_v32 = vadd.f32 %v6400_v37, %v6350_v45  ;;  %6663 = vmatprep.mubr.msk.f32.mxu0 %vm290_vm1, %v7404_v62  ;;  %6701 = vmatprep.mubr.msk.f32.mxu1 %vm290_vm1, %v7284_v38 }
  0xfa   : > { %v527_v34 = vpop.f32.mrf.mxu0  ;;  %v831_v59 = vpop.f32.mrf.mxu1 }
  0xfb   : > { %v7940_v29 = vadd.f32 %v831_v59, %v507_v26  ;;  %v5759_v59 = vld [vmem:[%s7116_s15 + $0x169] sm:$0xff] }
  0xfc   : > { %v6359_v22 = vpop.f32.mrf.mxu0  ;;  %v6403_v49 = vpop.f32.mrf.mxu1  ;;  %6664 = vmatmul.mubr.msk.f32.gmra.mxu0 %vm290_vm1, %v7415_v0  ;;  %6702 = vmatmul.mubr.msk.f32.gmra.mxu1 %vm290_vm1, %v7298_v40 }
  0xfd   : > { %v7946_v36 = vadd.f32 %v6403_v49, %v6353_v57  ;;  %6666 = vmatprep.mubr.msk.f32.mxu0 %vm290_vm1, %v7419_v2  ;;  %6704 = vmatprep.mubr.msk.f32.mxu1 %vm290_vm1, %v7304_v42 }
  0xfe   : > { %v7952_v38 = vpop.f32.mrf.mxu0  ;;  %v841_v62 = vpop.f32.mrf.mxu1 }
  0xff   : > { %v7954_v45 = vadd.f32 %v841_v62, %v517_v30 }
 0x100   : > { %v6362_v26 = vpop.f32.mrf.mxu0  ;;  %v6406_v53 = vpop.f32.mrf.mxu1  ;;  %6667 = vmatmul.mubr.msk.f32.gmra.mxu0 %vm290_vm1, %v7437_v9  ;;  %6705 = vmatmul.mubr.msk.f32.gmra.mxu1 %vm290_vm1, %v7318_v44 }
 0x101   : > { %v7960_v40 = vadd.f32 %v6406_v53, %v6356_v17  ;;  %6669 = vmatprep.mubr.msk.f32.mxu0 %vm290_vm1, %v7445_v16  ;;  %6707 = vmatprep.mubr.msk.f32.mxu1 %vm290_vm1, %v7324_v46  ;;  %v5757_v17 = vld [vmem:[%s7116_s15 + $0x151] sm:$0xff] }
 0x102   : > { %v7966_v42 = vpop.f32.mrf.mxu0  ;;  %v851_v0 = vpop.f32.mrf.mxu1 }
 0x103   : > { %v7968_v2 = vadd.f32 %v851_v0, %v527_v34 }
 0x104   : > { %v6365_v57 = vpop.f32.mrf.mxu0  ;;  %v6409_v43 = vpop.f32.mrf.mxu1  ;;  %6670 = vmatmul.mubr.msk.f32.gmra.mxu0 %vm290_vm1, %v7461_v10  ;;  %6708 = vmatmul.mubr.msk.f32.gmra.mxu1 %vm290_vm1, %v7338_v48  ;;  %v5697_v10 = vld [vmem:[%s7116_s15 + $0x198] sm:$0xff] }
 0x105   : > { %v7974_v44 = vadd.f32 %v6409_v43, %v6359_v22  ;;  %6672 = vmatprep.mubr.msk.f32.mxu0 %vm290_vm1, %v7467_v12  ;;  %6710 = vmatprep.mubr.msk.f32.mxu1 %vm290_vm1, %v7344_v50 }
 0x106   : > { %v7980_v46 = vpop.f32.mrf.mxu0  ;;  %v7982_v9 = vpop.f32.mrf.mxu1 }
 0x108   : > { %v6368_v16 = vpop.f32.mrf.mxu0  ;;  %v6412_v35 = vpop.f32.mrf.mxu1  ;;  %6673 = vmatmul.mubr.msk.f32.gmra.mxu0 %vm290_vm1, %v7481_v6  ;;  %6711 = vmatmul.mubr.msk.f32.gmra.mxu1 %vm290_vm1, %v9120_v54 }
 0x109   : > { %v7988_v48 = vadd.f32 %v6412_v35, %v6362_v26  ;;  %6675 = vmatprep.mubr.msk.f32.mxu0 %vm290_vm1, %v7697_v7  ;;  %6713 = vmatprep.mubr.msk.f32.mxu1 %vm290_vm1, %v9121_v3  ;;  %v5698_v7 = vld [vmem:[%s7116_s15 + $0x1a0] sm:$0xff] }
 0x10a   : > { %v7994_v12 = vpop.f32.mrf.mxu0  ;;  %v7996_v50 = vpop.f32.mrf.mxu1 }
 0x10c   : > { %v6371_v30 = vpop.f32.mrf.mxu0  ;;  %v6415_v55 = vpop.f32.mrf.mxu1  ;;  %6676 = vmatmul.mubr.msk.f32.gmra.mxu0 %vm290_vm1, %v7708_v11  ;;  %6714 = vmatmul.mubr.msk.f32.gmra.mxu1 %vm290_vm1, %v9122_v5 }
 0x10d   : > { %v8003_v6 = vadd.f32 %v6415_v55, %v6365_v57  ;;  %6678 = vmatprep.mubr.msk.f32.mxu0 %vm290_vm1, %v5697_v10  ;;  %6716 = vmatprep.mubr.msk.f32.mxu1 %vm290_vm1, %v9123_v14  ;;  %v5758_v14 = vld [vmem:[%s7116_s15 + $0x159] sm:$0xff] }
 0x10e   : > { %v8009_v54 = vpop.f32.mrf.mxu0  ;;  %v8011_v3 = vpop.f32.mrf.mxu1 }
 0x110   : > { %v6374_v37 = vpop.f32.mrf.mxu0  ;;  %v6418_v11 = vpop.f32.mrf.mxu1  ;;  %6679 = vmatmul.mubr.msk.f32.gmra.mxu0 %vm290_vm1, %v5698_v7  ;;  %6717 = vmatmul.mubr.msk.f32.gmra.mxu1 %vm290_vm1, %v9124_v25 }
 0x111   : > { %v8017_v5 = vadd.f32 %v6418_v11, %v6368_v16  ;;  %6719 = vmatprep.mubr.msk.f32.mxu1 %vm290_vm1, %v5757_v17  ;;  %6733 = vmatprep.mubr.msk.f32.mxu0 %vm290_vm1, %v7448_v63  ;;  %v5760_v63 = vld [vmem:[%s7116_s15 + $0x171] sm:$0xff]  ;;  %v5763_v16 = vld [vmem:[%s7116_s15 + $0x199] sm:$0xff]  ;;  %v9154_v11 = vld [vmem:[#allocation33_spill] sm:$0xff] }
 0x112   : > { %v8023_v47 = vpop.f32.mrf.mxu0  ;;  %v8025_v34 = vpop.f32.mrf.mxu1 }
 0x114   : > { %v6421_v22 = vpop.f32.mrf.mxu1  ;;  %v6435_v49 = vpop.f32.mrf.mxu0  ;;  %6720 = vmatmul.mubr.msk.f32.gmra.mxu1 %vm290_vm1, %v5758_v14  ;;  %6734 = vmatmul.mubr.msk.f32.vlgmr.msra.gmra.mxu0 %vm290_vm1, %v7464_v1 }
 0x115   : > { %v8031_v25 = vadd.f32 %v6421_v22, %v6371_v30  ;;  %v1299_v62 = vadd.f32 %v6435_v49, %v7874_v23  ;;  %6722 = vmatprep.mubr.msk.f32.mxu1 %vm290_vm1, %v5759_v59  ;;  %6736 = vmatprep.mubr.msk.f32.mxu0 %vm290_vm1, %v7470_v8  ;;  %v9155_v22 = vld [vmem:[#allocation34_spill] sm:$0xff] }
 0x116   : > { %v8038_v26 = vpop.f32.mrf.mxu1  ;;  %v1139_v53 = vpop.f32.mrf.mxu0 }
 0x117   : > { %v8041_v0 = vadd.f32 %v1139_v53, %v7880_v39 }
 0x118   : > { %v6424_v57 = vpop.f32.mrf.mxu1  ;;  %v6438_v43 = vpop.f32.mrf.mxu0  ;;  %6723 = vmatmul.mubr.msk.f32.gmra.mxu1 %vm290_vm1, %v5760_v63  ;;  %6737 = vmatmul.mubr.msk.f32.gmra.mxu0 %vm290_vm1, %v7484_v4 }
 0x119   : > { %v8046_v1 = vadd.f32 %v6424_v57, %v6374_v37  ;;  %v1301_v23 = vadd.f32 %v6438_v43, %v7886_v15  ;;  %6725 = vmatprep.mubr.msk.f32.mxu1 %vm290_vm1, %v7801_v31  ;;  %6739 = vmatprep.mubr.msk.f32.mxu0 %vm290_vm1, %v7487_v60  ;;  %v5764_v15 = vld [vmem:[%s7116_s15 + $0x1a1] sm:$0xff] }
 0x11a   : > { %v8053_v8 = vpop.f32.mrf.mxu1  ;;  %v1149_v39 = vpop.f32.mrf.mxu0  ;;  %v9158_v43 = vld [vmem:[#allocation36_spill] sm:$0xff] }
 0x11b   : > { %v8057_v35 = vadd.f32 %v1149_v39, %v7892_v19 }
 0x11c   : > { %v6427_v10 = vpop.f32.mrf.mxu1  ;;  %v6441_v4 = vpop.f32.mrf.mxu0  ;;  %6726 = vmatmul.mubr.msk.f32.gmra.mxu1 %vm290_vm1, %v7812_v27  ;;  %6740 = vmatmul.mubr.msk.f32.gmra.mxu0 %vm290_vm1, %v7498_v58 }
 0x11d   : > { %9151 = vst [vmem:[#allocation31_spill] sm:$0xff] %v8057_v35  ;;  %v8064_v31 = vadd.f32 %v6427_v10, %v7843_v61  ;;  %v1303_v60 = vadd.f32 %v6441_v4, %v7898_v20  ;;  %6728 = vmatprep.mubr.msk.f32.mxu1 %vm290_vm1, %v5763_v16  ;;  %6742 = vmatprep.mubr.msk.f32.mxu0 %vm290_vm1, %v7501_v56 }
 0x11e   : > { %v8071_v19 = vpop.f32.mrf.mxu1  ;;  %v1159_v30 = vpop.f32.mrf.mxu0 }
 0x11f   : > { %v8074_v55 = vadd.f32 %v1159_v30, %v7904_v33  ;;  %v9161_v30 = vld [vmem:[#allocation38_spill] sm:$0xff] }
 0x120   : > { %v6430_v27 = vpop.f32.mrf.mxu1  ;;  %v6444_v7 = vpop.f32.mrf.mxu0  ;;  %6729 = vmatmul.mubr.msk.f32.gmra.mxu1 %vm290_vm1, %v5764_v15  ;;  %6743 = vmatmul.mubr.msk.f32.gmra.mxu0 %vm290_vm1, %v7517_v18 }
 0x121   : > { %9152 = vst [vmem:[#allocation6_spill] sm:$0xff] %v8074_v55  ;;  %v8080_v58 = vadd.f32 %v6430_v27, %v7858_v41  ;;  %v1305_v61 = vadd.f32 %v6444_v7, %v7910_v24  ;;  %6745 = vmatprep.mubr.msk.f32.mxu0 %vm290_vm1, %v7520_v52  ;;  %v9162_v27 = vld [vmem:[#allocation39_spill] sm:$0xff] }
 0x122   : > { %v8085_v56 = vpop.f32.mrf.mxu1  ;;  %v1169_v20 = vpop.f32.mrf.mxu0 }
 0x123   : > { %v8088_v33 = vadd.f32 %v1169_v20, %v7916_v13 }
 0x124   : > { %v6447_v17 = vpop.f32.mrf.mxu0  ;;  %v6485_v37 = vpop.f32.mrf.mxu1  ;;  %6746 = vmatmul.mubr.msk.f32.gmra.mxu0 %vm290_vm1, %v7535_v21 }
 0x125   : > { %9153 = vst [vmem:[#allocation7_spill] sm:$0xff] %v8088_v33  ;;  %v1307_v18 = vadd.f32 %v6447_v17, %v7922_v28  ;;  %v8093_v41 = vadd.f32 %v6485_v37, %v1299_v62  ;;  %6748 = vmatprep.mubr.msk.f32.mxu0 %vm290_vm1, %v9154_v11  ;;  %v9156_v28 = vld [vmem:[#allocation35_spill] sm:$0xff]  ;;  %v9164_v11 = vld [vmem:[#allocation40_spill] sm:$0xff] }
 0x126   : > { %v1179_v24 = vpop.f32.mrf.mxu0  ;;  %v8097_v52 = vpop.f32.mrf.mxu1 }
 0x127   : > { %v8100_v14 = vadd.f32 %v1179_v24, %v7928_v51 }
 0x128   : > { %v6450_v13 = vpop.f32.mrf.mxu0  ;;  %v6488_v59 = vpop.f32.mrf.mxu1  ;;  %6749 = vmatmul.mubr.msk.f32.gmra.mxu0 %vm290_vm1, %v9155_v22 }
 0x129   : > { %v1309_v21 = vadd.f32 %v6450_v13, %v7934_v32  ;;  %v8105_v49 = vadd.f32 %v6488_v59, %v1301_v23  ;;  %6751 = vmatprep.mubr.msk.f32.mxu0 %vm290_vm1, %v9156_v28  ;;  %v9159_v32 = vld [vmem:[#allocation37_spill] sm:$0xff]  ;;  %v5818_v13 = vld [vmem:[%s7116_s15 + $0x112] sm:$0xff] }
 0x12a   : > { %v1189_v62 = vpop.f32.mrf.mxu0  ;;  %v8109_v63 = vpop.f32.mrf.mxu1 }
 0x12b   : > { %9157 = vst [vmem:[#allocation8_spill] sm:$0xff] %v8109_v63  ;;  %v8112_v53 = vadd.f32 %v1189_v62, %v7940_v29 }
 0x12c   : > { %v6453_v51 = vpop.f32.mrf.mxu0  ;;  %v6491_v57 = vpop.f32.mrf.mxu1  ;;  %6752 = vmatmul.mubr.msk.f32.gmra.mxu0 %vm290_vm1, %v9158_v43 }
 0x12d   : > { %v1311_v39 = vadd.f32 %v6453_v51, %v7946_v36  ;;  %v8117_v16 = vadd.f32 %v6491_v57, %v1303_v60  ;;  %6754 = vmatprep.mubr.msk.f32.mxu0 %vm290_vm1, %v9159_v32  ;;  %v5821_v32 = vld [vmem:[%s7116_s15 + $0x13a] sm:$0xff] }
 0x12e   : > { %v1199_v23 = vpop.f32.mrf.mxu0  ;;  %v8121_v10 = vpop.f32.mrf.mxu1 }
 0x12f   : > { %9160 = vst [vmem:[#allocation9_spill] sm:$0xff] %v8121_v10  ;;  %v8124_v4 = vadd.f32 %v1199_v23, %v7954_v45 }
 0x130   : > { %v6456_v29 = vpop.f32.mrf.mxu0  ;;  %v6494_v15 = vpop.f32.mrf.mxu1  ;;  %6755 = vmatmul.mubr.msk.f32.gmra.mxu0 %vm290_vm1, %v9161_v30 }
 0x131   : > { %v1313_v36 = vadd.f32 %v6456_v29, %v7960_v40  ;;  %v8129_v60 = vadd.f32 %v6494_v15, %v1305_v61  ;;  %6757 = vmatprep.mubr.msk.f32.mxu0 %vm290_vm1, %v9162_v27  ;;  %v9165_v61 = vld [vmem:[#allocation41_spill] sm:$0xff] }
 0x132   : > { %v1209_v7 = vpop.f32.mrf.mxu0  ;;  %v8133_v20 = vpop.f32.mrf.mxu1 }
 0x133   : > { %9163 = vst [vmem:[#allocation10_spill] sm:$0xff] %v8133_v20  ;;  %v8136_v45 = vadd.f32 %v1209_v7, %v7968_v2  ;;  %v5819_v2 = vld [vmem:[%s7116_s15 + $0x122] sm:$0xff]  ;;  %v5823_v7 = vld [vmem:[%s7116_s15 + $0x152] sm:$0xff] }
 0x134   : > { %v6459_v17 = vpop.f32.mrf.mxu0  ;;  %v6497_v37 = vpop.f32.mrf.mxu1  ;;  %6758 = vmatmul.mubr.msk.f32.gmra.mxu0 %vm290_vm1, %v9164_v11 }
 0x135   : > { %v1315_v24 = vadd.f32 %v6459_v17, %v7974_v44  ;;  %v8141_v40 = vadd.f32 %v6497_v37, %v1307_v18  ;;  %6760 = vmatprep.mubr.msk.f32.mxu0 %vm290_vm1, %v9165_v61  ;;  %v5820_v18 = vld [vmem:[%s7116_s15 + $0x12a] sm:$0xff] }
 0x136   : > { %v8146_v59 = vpop.f32.mrf.mxu0  ;;  %v8148_v22 = vpop.f32.mrf.mxu1 }
 0x138   : > { %v6462_v28 = vpop.f32.mrf.mxu0  ;;  %v6500_v62 = vpop.f32.mrf.mxu1  ;;  %6761 = vmatmul.mubr.msk.f32.gmra.mxu0 %vm290_vm1, %v5818_v13 }
 0x139   : > { %v1317_v51 = vadd.f32 %v6462_v28, %v7988_v48  ;;  %v8153_v44 = vadd.f32 %v6500_v62, %v1309_v21  ;;  %6763 = vmatprep.mubr.msk.f32.mxu0 %vm290_vm1, %v5819_v2  ;;  %v5822_v21 = vld [vmem:[%s7116_s15 + $0x142] sm:$0xff]  ;;  %v5825_v2 = vld [vmem:[%s7116_s15 + $0x16a] sm:$0xff] }
 0x13a   : > { %v8157_v57 = vpop.f32.mrf.mxu0  ;;  %v8159_v43 = vpop.f32.mrf.mxu1 }
 0x13c   : > { %v6465_v23 = vpop.f32.mrf.mxu0  ;;  %v6503_v29 = vpop.f32.mrf.mxu1  ;;  %6764 = vmatmul.mubr.msk.f32.gmra.mxu0 %vm290_vm1, %v5820_v18 }
 0x13d   : > { %v1319_v15 = vadd.f32 %v6465_v23, %v8003_v6  ;;  %v8164_v48 = vadd.f32 %v6503_v29, %v1311_v39  ;;  %6766 = vmatprep.mubr.msk.f32.mxu0 %vm290_vm1, %v5821_v32  ;;  %v5824_v6 = vld [vmem:[%s7116_s15 + $0x15a] sm:$0xff] }
 0x13e   : > { %v8168_v30 = vpop.f32.mrf.mxu0  ;;  %v8170_v27 = vpop.f32.mrf.mxu1 }
 0x140   : > { %v6468_v17 = vpop.f32.mrf.mxu0  ;;  %v6506_v37 = vpop.f32.mrf.mxu1  ;;  %6767 = vmatmul.mubr.msk.f32.gmra.mxu0 %vm290_vm1, %v5822_v21 }
 0x141   : > { %v1321_v11 = vadd.f32 %v6468_v17, %v8017_v5  ;;  %v8175_v61 = vadd.f32 %v6506_v37, %v1313_v36  ;;  %6769 = vmatprep.mubr.msk.f32.mxu0 %vm290_vm1, %v5823_v7  ;;  %v5826_v5 = vld [vmem:[%s7116_s15 + $0x172] sm:$0xff]  ;;  %v9166_v37 = vld [vmem:[#allocation25_spill] sm:$0xff] }
 0x142   : > { %v8179_v39 = vpop.f32.mrf.mxu0  ;;  %v8181_v13 = vpop.f32.mrf.mxu1 }
 0x144   : > { %v6471_v28 = vpop.f32.mrf.mxu0  ;;  %v6509_v62 = vpop.f32.mrf.mxu1  ;;  %6770 = vmatmul.mubr.msk.f32.gmra.mxu0 %vm290_vm1, %v5824_v6  ;;  %v5829_v6 = vld [vmem:[%s7116_s15 + $0x19a] sm:$0xff] }
 0x145   : > { %v1323_v18 = vadd.f32 %v6471_v28, %v8031_v25  ;;  %v8186_v32 = vadd.f32 %v6509_v62, %v1315_v24  ;;  %6772 = vmatprep.mubr.msk.f32.mxu0 %vm290_vm1, %v5825_v2  ;;  %v9167_v62 = vld [vmem:[#allocation27_spill] sm:$0xff] }
 0x146   : > { %v8190_v36 = vpop.f32.mrf.mxu0  ;;  %v8192_v23 = vpop.f32.mrf.mxu1 }
 0x148   : > { %v6474_v29 = vpop.f32.mrf.mxu0  ;;  %v6512_v21 = vpop.f32.mrf.mxu1  ;;  %6773 = vmatmul.mubr.msk.f32.gmra.mxu0 %vm290_vm1, %v5826_v5 }
 0x149   : > { %v1325_v7 = vadd.f32 %v6474_v29, %v8046_v1  ;;  %v8196_v17 = vadd.f32 %v6512_v21, %v1317_v51  ;;  %6775 = vmatprep.mubr.msk.f32.mxu0 %vm290_vm1, %v9166_v37  ;;  %v5830_v1 = vld [vmem:[%s7116_s15 + $0x1a2] sm:$0xff] }
 0x14a   : > { %v8200_v25 = vpop.f32.mrf.mxu0  ;;  %v8202_v24 = vpop.f32.mrf.mxu1  ;;  %v5866_v51 = vld [vmem:[%s9035_s3 + $0x8] sm:$0xff] }
 0x14b   : > { %6781 = vmatprep.subr.mxu1 %v5866_v51 }
 0x14c   : > { %v6477_v2 = vpop.f32.mrf.mxu0  ;;  %v6515_v28 = vpop.f32.mrf.mxu1  ;;  %6776 = vmatmul.mubr.msk.f32.gmra.mxu0 %vm290_vm1, %v9167_v62  ;;  %6782 = vmatpush3.msra.mxu1 %v5866_v51 }
 0x14d   : > { %v8208_v20 = vadd.f32 %v6477_v2, %v8064_v31  ;;  %v8210_v5 = vadd.f32 %v6515_v28, %v1319_v15  ;;  %6778 = vmatprep.mubr.msk.f32.mxu0 %vm290_vm1, %v5829_v6 }
 0x14e   : > { %v8217_v29 = vpop.f32.mrf.mxu0  ;;  %v8219_v21 = vpop.f32.mrf.mxu1 }
 0x150   : > { %v6480_v37 = vpop.f32.mrf.mxu0  ;;  %v6518_v62 = vpop.f32.mrf.mxu1  ;;  %6779 = vmatmul.mubr.msk.f32.gmra.mxu0 %vm290_vm1, %v5830_v1 }
 0x151   : > { %v8223_v31 = vadd.f32 %v6480_v37, %v8080_v58  ;;  %v8225_v15 = vadd.f32 %v6518_v62, %v1321_v11 }
 0x152   : > { %v8227_v6 = vpop.f32.mrf.mxu0  ;;  %v8229_v2 = vpop.f32.mrf.mxu1 }
 0x154   : > { %v6521_v28 = vpop.f32.mrf.mxu1  ;;  %v6535_v33 = vpop.f32.mrf.mxu0 }
 0x155   : > { %v8231_v10 = vadd.f32 %v6521_v28, %v1323_v18  ;;  %v8234_v55 = vadd.f32 %v6535_v33, %v8093_v41  ;;  %v7014_v18 = vmov 0.0  }
 0x156   : > { %v8236_v51 = vpop.f32.mrf.mxu1  ;;  %v8238_v63 = vpop.f32.mrf.mxu0  ;;  %3749 = vst.msk [vmem:[#allocation2 + $0x20] sm:$0xff] %vm3743_vm2, %v7014_v18  ;;  %3744 = vst.msk [vmem:[#allocation2] sm:$0xff] %vm3743_vm2, %v7014_v18 }
 0x157   : > { %9168 = vst [vmem:[#allocation11_spill] sm:$0xff] %v8234_v55  ;;  %9169 = vst [vmem:[#allocation12_spill] sm:$0xff] %v8238_v63 }
 0x158   : > { %v6524_v1 = vpop.f32.mrf.mxu1  ;;  %v6538_v58 = vpop.f32.mrf.mxu0  ;;  %3745 = vst.msk [vmem:[#allocation2 + $0x8] sm:$0xff] %vm3743_vm2, %v7014_v18  ;;  %3748 = vst.msk [vmem:[#allocation2 + $0x18] sm:$0xff] %vm3743_vm2, %v7014_v18 }
 0x159   : > { %v8240_v37 = vadd.f32 %v6524_v1, %v1325_v7  ;;  %v8243_v11 = vadd.f32 %v6538_v58, %v8105_v49  ;;  %3751 = vst.msk [vmem:[#allocation2 + $0x30] sm:$0xff] %vm3743_vm2, %v7014_v18  ;;  %3752 = vst.msk [vmem:[#allocation2 + $0x38] sm:$0xff] %vm3743_vm2, %v7014_v18 }
 0x15a   : > { %v8245_v62 = vpop.f32.mrf.mxu1  ;;  %v8247_v35 = vpop.f32.mrf.mxu0  ;;  %3754 = vst.msk [vmem:[#allocation2 + $0x48] sm:$0xff] %vm3743_vm2, %v7014_v18  ;;  %3755 = vst.msk [vmem:[#allocation2 + $0x50] sm:$0xff] %vm3743_vm2, %v7014_v18 }
 0x15b   : > { %9170 = vst [vmem:[#allocation13_spill] sm:$0xff] %v8243_v11  ;;  %9171 = vst [vmem:[#allocation14_spill] sm:$0xff] %v8247_v35 }
 0x15c   : > { %3757 = vst.msk [vmem:[#allocation2 + $0x60] sm:$0xff] %vm3743_vm2, %v7014_v18  ;;  %3758 = vst.msk [vmem:[#allocation2 + $0x68] sm:$0xff] %vm3743_vm2, %v7014_v18  ;;  %v6527_v33 = vpop.f32.mrf.mxu1  ;;  %v6541_v41 = vpop.f32.mrf.mxu0 }
 0x15d   : > { %3760 = vst.msk [vmem:[#allocation2 + $0x78] sm:$0xff] %vm3743_vm2, %v7014_v18  ;;  %3761 = vst.msk [vmem:[#allocation2 + $0x80] sm:$0xff] %vm3743_vm2, %v7014_v18  ;;  %v8301_v49 = vadd.f32 %v6527_v33, %v8208_v20  ;;  %v8304_v7 = vadd.f32 %v6541_v41, %v8117_v16  ;;  %v1697_v16 = vadd.f32 %v8148_v22, %v8100_v14  ;;  %v5901_v22 = vld [vmem:[%s9035_s3 + $0x20] sm:$0xff] }
 0x15e   : > { %3763 = vst.msk [vmem:[#allocation2 + $0x90] sm:$0xff] %vm3743_vm2, %v7014_v18  ;;  %3764 = vst.msk [vmem:[#allocation2 + $0x98] sm:$0xff] %vm3743_vm2, %v7014_v18  ;;  %v8306_v28 = vpop.f32.mrf.mxu1  ;;  %v8308_v1 = vpop.f32.mrf.mxu0  ;;  %6837 = vmatprep.subr.mxu0 %v5901_v22 }
 0x15f   : > { %3766 = vst.msk [vmem:[#allocation2 + $0xa8] sm:$0xff] %vm3743_vm2, %v7014_v18  ;;  %3767 = vst.msk [vmem:[#allocation2 + $0xb0] sm:$0xff] %vm3743_vm2, %v7014_v18  ;;  %6838 = vmatpush3.msra.mxu0 %v5901_v22 }
 0x160   : > { %3769 = vst.msk [vmem:[#allocation2 + $0xc0] sm:$0xff] %vm3743_vm2, %v7014_v18  ;;  %3770 = vst.msk [vmem:[#allocation2 + $0xc8] sm:$0xff] %vm3743_vm2, %v7014_v18  ;;  %v6530_v58 = vpop.f32.mrf.mxu1  ;;  %v6544_v11 = vpop.f32.mrf.mxu0 }
 0x161   : > { %3772 = vst.msk [vmem:[#allocation2 + $0xd8] sm:$0xff] %vm3743_vm2, %v7014_v18  ;;  %3773 = vst.msk [vmem:[#allocation2 + $0xe0] sm:$0xff] %vm3743_vm2, %v7014_v18  ;;  %v8311_v35 = vadd.f32 %v6530_v58, %v8223_v31  ;;  %v8314_v55 = vadd.f32 %v6544_v11, %v8129_v60  ;;  %v3849_v60 = vld [vmem:[#allocation2 + $0x1] ss:$2 sm:$0xff] }
 0x162   : > { %3775 = vst.msk [vmem:[#allocation2 + $0xf0] sm:$0xff] %vm3743_vm2, %v7014_v18  ;;  %3776 = vst.msk [vmem:[#allocation2 + $0xf8] sm:$0xff] %vm3743_vm2, %v7014_v18  ;;  %v8318_v63 = vpop.f32.mrf.mxu0  ;;  %6783 = vmatprep.mubr.msk.f32.mxu1 %vm3743_vm2, %v3849_v60 }
 0x163   : > { %3778 = vst.msk [vmem:[#allocation2 + $0x108] sm:$0xff] %vm3743_vm2, %v7014_v18  ;;  %3779 = vst.msk [vmem:[#allocation2 + $0x110] sm:$0xff] %vm3743_vm2, %v7014_v18 }
 0x164   : > { %3781 = vst.msk [vmem:[#allocation2 + $0x120] sm:$0xff] %vm3743_vm2, %v7014_v18  ;;  %3782 = vst.msk [vmem:[#allocation2 + $0x128] sm:$0xff] %vm3743_vm2, %v7014_v18  ;;  %v6547_v20 = vpop.f32.mrf.mxu0 }
 0x165   : > { %3784 = vst.msk [vmem:[#allocation2 + $0x138] sm:$0xff] %vm3743_vm2, %v7014_v18  ;;  %3785 = vst.msk [vmem:[#allocation2 + $0x140] sm:$0xff] %vm3743_vm2, %v7014_v18  ;;  %v8325_v41 = vadd.f32 %v6547_v20, %v8141_v40 }
 0x166   : > { %3787 = vst.msk [vmem:[#allocation2 + $0x150] sm:$0xff] %vm3743_vm2, %v7014_v18  ;;  %3788 = vst.msk [vmem:[#allocation2 + $0x158] sm:$0xff] %vm3743_vm2, %v7014_v18 }
 0x167   : > { %3790 = vst.msk [vmem:[#allocation2 + $0x168] sm:$0xff] %vm3743_vm2, %v7014_v18  ;;  %3791 = vst.msk [vmem:[#allocation2 + $0x170] sm:$0xff] %vm3743_vm2, %v7014_v18 }
 0x168   : > { %3793 = vst.msk [vmem:[#allocation2 + $0x180] sm:$0xff] %vm3743_vm2, %v7014_v18  ;;  %3794 = vst.msk [vmem:[#allocation2 + $0x188] sm:$0xff] %vm3743_vm2, %v7014_v18 }
 0x169   : > { %3750 = vst.msk [vmem:[#allocation2 + $0x28] sm:$0x3] %vm3746_vm3, %v7014_v18  ;;  %3747 = vst.msk [vmem:[#allocation2 + $0x10] sm:$0x3] %vm3746_vm3, %v7014_v18 }
 0x16a   : > { %3753 = vst.msk [vmem:[#allocation2 + $0x40] sm:$0x3] %vm3746_vm3, %v7014_v18  ;;  %3756 = vst.msk [vmem:[#allocation2 + $0x58] sm:$0x3] %vm3746_vm3, %v7014_v18 }
 0x16b   : > { %3759 = vst.msk [vmem:[#allocation2 + $0x70] sm:$0x3] %vm3746_vm3, %v7014_v18  ;;  %3762 = vst.msk [vmem:[#allocation2 + $0x88] sm:$0x3] %vm3746_vm3, %v7014_v18 }
 0x16c   : > { %3765 = vst.msk [vmem:[#allocation2 + $0xa0] sm:$0x3] %vm3746_vm3, %v7014_v18  ;;  %3768 = vst.msk [vmem:[#allocation2 + $0xb8] sm:$0x3] %vm3746_vm3, %v7014_v18 }
 0x16d   : > { %3771 = vst.msk [vmem:[#allocation2 + $0xd0] sm:$0x3] %vm3746_vm3, %v7014_v18  ;;  %3774 = vst.msk [vmem:[#allocation2 + $0xe8] sm:$0x3] %vm3746_vm3, %v7014_v18 }
 0x16e   : > { %3777 = vst.msk [vmem:[#allocation2 + $0x100] sm:$0x3] %vm3746_vm3, %v7014_v18  ;;  %3780 = vst.msk [vmem:[#allocation2 + $0x118] sm:$0x3] %vm3746_vm3, %v7014_v18 }
 0x16f   : > { %3783 = vst.msk [vmem:[#allocation2 + $0x130] sm:$0x3] %vm3746_vm3, %v7014_v18  ;;  %3786 = vst.msk [vmem:[#allocation2 + $0x148] sm:$0x3] %vm3746_vm3, %v7014_v18 }
 0x170   : > { %3789 = vst.msk [vmem:[#allocation2 + $0x160] sm:$0x3] %vm3746_vm3, %v7014_v18  ;;  %3792 = vst.msk [vmem:[#allocation2 + $0x178] sm:$0x3] %vm3746_vm3, %v7014_v18 }
 0x171   : > { %3795 = vst.msk [vmem:[#allocation2 + $0x190] sm:$0x3] %vm3746_vm3, %v7014_v18  ;;  %9172 = vst [vmem:[#allocation15_spill] sm:$0xff] %v8304_v7  ;;  %v8316_v18 = vpop.f32.mrf.mxu1  ;;  %v1960_v7 = vpop.f32.mrf.mxu0 }
 0x172   : > { %9173 = vst [vmem:[#allocation16_spill] sm:$0xff] %v8308_v1  ;;  %9174 = vst [vmem:[#allocation17_spill] sm:$0xff] %v8314_v55  ;;  %v8329_v31 = vadd.f32 %v1960_v7, %v1697_v16  ;;  %v1699_v55 = vadd.f32 %v8159_v43, %v8112_v53  ;;  %v1701_v53 = vadd.f32 %v8170_v27, %v8124_v4 }
 0x173   : > { %9175 = vst [vmem:[#allocation18_spill] sm:$0xff] %v8318_v63  ;;  %v8320_v33 = vpop.f32.mrf.mxu1  ;;  %v6550_v11 = vpop.f32.mrf.mxu0 }
 0x174   : > { %9176 = vst [vmem:[#allocation19_spill] sm:$0xff] %v8329_v31  ;;  %v8337_v63 = vadd.f32 %v6550_v11, %v8153_v44 }
 0x175   : > { %v8327_v1 = vpop.f32.mrf.mxu1  ;;  %v1970_v14 = vpop.f32.mrf.mxu0 }
 0x176   : > { %9177 = vst [vmem:[#allocation20_spill] sm:$0xff] %v8337_v63  ;;  %v8344_v7 = vadd.f32 %v1970_v14, %v1699_v55  ;;  %v862_v55 = vadd.f32 %v7982_v9, %v7952_v38  ;;  %v1703_v14 = vadd.f32 %v8181_v13, %v8136_v45 }
 0x177   : > { %v8331_v58 = vpop.f32.mrf.mxu1  ;;  %v6553_v20 = vpop.f32.mrf.mxu0 }
 0x178   : > { %v8351_v44 = vadd.f32 %v6553_v20, %v8164_v48  ;;  %v1314_v27 = vadd.f32 %v8146_v59, %v862_v55 }
 0x179   : > { %v8339_v40 = vpop.f32.mrf.mxu1  ;;  %v1980_v43 = vpop.f32.mrf.mxu0 }
 0x17a   : > { %v8355_v11 = vadd.f32 %v1980_v43, %v1701_v53  ;;  %v1705_v38 = vadd.f32 %v8192_v23, %v1314_v27 }
 0x17b   : > { %v8346_v16 = vpop.f32.mrf.mxu1  ;;  %v6556_v63 = vpop.f32.mrf.mxu0 }
 0x17c   : > { %9178 = vst [vmem:[#allocation21_spill] sm:$0xff] %v8355_v11  ;;  %v8364_v22 = vadd.f32 %v6556_v63, %v8175_v61  ;;  %v872_v11 = vadd.f32 %v7996_v50, %v7966_v42 }
 0x17d   : > { %v8353_v60 = vpop.f32.mrf.mxu1  ;;  %v1990_v4 = vpop.f32.mrf.mxu0 }
 0x17e   : > { %v8369_v20 = vadd.f32 %v1990_v4, %v1703_v14  ;;  %v1316_v61 = vadd.f32 %v8157_v57, %v872_v11  ;;  %v882_v14 = vadd.f32 %v8011_v3, %v7980_v46 }
 0x17f   : > { %v8357_v31 = vpop.f32.mrf.mxu1  ;;  %v6559_v53 = vpop.f32.mrf.mxu0 }
 0x180   : > { %9179 = vst [vmem:[#allocation22_spill] sm:$0xff] %v8369_v20  ;;  %v8377_v9 = vadd.f32 %v6559_v53, %v8186_v32  ;;  %v1707_v42 = vadd.f32 %v8202_v24, %v1316_v61  ;;  %v1318_v4 = vadd.f32 %v8168_v30, %v882_v14  ;;  %v892_v53 = vadd.f32 %v8025_v34, %v7994_v12 }
 0x181   : > { %v8366_v48 = vpop.f32.mrf.mxu1  ;;  %v2000_v63 = vpop.f32.mrf.mxu0 }
 0x182   : > { %9180 = vst [vmem:[#allocation23_spill] sm:$0xff] %v8377_v9  ;;  %v8382_v13 = vadd.f32 %v2000_v63, %v1705_v38  ;;  %v1709_v46 = vadd.f32 %v8219_v21, %v1318_v4  ;;  %v1320_v38 = vadd.f32 %v8179_v39, %v892_v53  ;;  %v912_v4 = vadd.f32 %v8053_v8, %v8023_v47  ;;  %v9237_v9 = vld [vmem:[#allocation11_spill] sm:$0xff] }
 0x183   : > { %v8371_v43 = vpop.f32.mrf.mxu1  ;;  %v6562_v59 = vpop.f32.mrf.mxu0 }
 0x184   : > { %9181 = vst [vmem:[#allocation24_spill] sm:$0xff] %v8382_v13  ;;  %v8390_v50 = vadd.f32 %v6562_v59, %v8196_v17  ;;  %v902_v59 = vadd.f32 %v8038_v26, %v8009_v54  ;;  %v1711_v12 = vadd.f32 %v8229_v2, %v1320_v38 }
 0x185   : > { %v8379_v45 = vpop.f32.mrf.mxu1  ;;  %v2010_v32 = vpop.f32.mrf.mxu0 }
 0x186   : > { %9182 = vst [vmem:[#allocation26_spill] sm:$0xff] %v8390_v50  ;;  %v8395_v27 = vadd.f32 %v2010_v32, %v1707_v42  ;;  %v1322_v14 = vadd.f32 %v8190_v36, %v902_v59 }
 0x187   : > { %v8384_v55 = vpop.f32.mrf.mxu1  ;;  %v6565_v57 = vpop.f32.mrf.mxu0 }
 0x188   : > { %9183 = vst [vmem:[#allocation29_spill] sm:$0xff] %v8395_v27  ;;  %v8403_v3 = vadd.f32 %v6565_v57, %v8210_v5  ;;  %v1713_v54 = vadd.f32 %v8236_v51, %v1322_v14  ;;  %v1324_v57 = vadd.f32 %v8200_v25, %v912_v4 }
 0x189   : > { %v8392_v23 = vpop.f32.mrf.mxu1  ;;  %v2020_v17 = vpop.f32.mrf.mxu0 }
 0x18a   : > { %9184 = vst [vmem:[#allocation32_spill] sm:$0xff] %v8403_v3  ;;  %v8408_v63 = vadd.f32 %v2020_v17, %v1709_v46  ;;  %v9194_v17 = vld [vmem:[#allocation28_spill] sm:$0xff]  ;;  %v1715_v47 = vadd.f32 %v8245_v62, %v1324_v57 }
 0x18b   : > { %v8397_v11 = vpop.f32.mrf.mxu1  ;;  %v6568_v30 = vpop.f32.mrf.mxu0  ;;  %v922_v38 = vadd.f32 %v8071_v19, %v9194_v17  ;;  %v8475_v17 = vld [vmem:[%s9035_s3] sm:$0xff] }
 0x18c   : > { %9185 = vst [vmem:[#allocation33_spill] sm:$0xff] %v8408_v63  ;;  %v8416_v34 = vadd.f32 %v6568_v30, %v8225_v15  ;;  %6795 = vmatprep.subr.mxu1 %v8475_v17 }
 0x18d   : > { %v8405_v24 = vpop.f32.mrf.mxu1  ;;  %v2030_v5 = vpop.f32.mrf.mxu0  ;;  %v1326_v30 = vadd.f32 %v8217_v29, %v922_v38 }
 0x18e   : > { %9186 = vst [vmem:[#allocation34_spill] sm:$0xff] %v8416_v34  ;;  %v8421_v42 = vadd.f32 %v2030_v5, %v1711_v12  ;;  %v9199_v5 = vld [vmem:[#allocation30_spill] sm:$0xff] }
 0x18f   : > { %v8410_v61 = vpop.f32.mrf.mxu1  ;;  %v6571_v39 = vpop.f32.mrf.mxu0  ;;  %v932_v14 = vadd.f32 %v8085_v56, %v9199_v5  ;;  %v1717_v19 = vadd.f32 %v8306_v28, %v1326_v30 }
 0x190   : > { %9188 = vst [vmem:[#allocation36_spill] sm:$0xff] %v8421_v42  ;;  %v8429_v26 = vadd.f32 %v6571_v39, %v8231_v10 }
 0x191   : > { %v8418_v21 = vpop.f32.mrf.mxu1  ;;  %v2040_v15 = vpop.f32.mrf.mxu0  ;;  %v1328_v4 = vadd.f32 %v8227_v6, %v932_v14 }
 0x192   : > { %9187 = vst [vmem:[#allocation35_spill] sm:$0xff] %v8418_v21  ;;  %9190 = vst [vmem:[#allocation38_spill] sm:$0xff] %v8429_v26  ;;  %v8434_v53 = vadd.f32 %v2040_v15, %v1713_v54 }
 0x193   : > { %v8423_v32 = vpop.f32.mrf.mxu1  ;;  %v6574_v36 = vpop.f32.mrf.mxu0  ;;  %v1719_v57 = vadd.f32 %v8316_v18, %v1328_v4  ;;  %v8503_v4 = vld [vmem:[%s9035_s3 + $0x30] sm:$0xff] }
 0x194   : > { %9189 = vst [vmem:[#allocation37_spill] sm:$0xff] %v8423_v32  ;;  %9192 = vst [vmem:[#allocation40_spill] sm:$0xff] %v8434_v53  ;;  %v8442_v8 = vadd.f32 %v6574_v36, %v8240_v37  ;;  %6865 = vmatprep.subr.mxu0 %v8503_v4 }
 0x195   : > { %v8431_v2 = vpop.f32.mrf.mxu1  ;;  %v2050_v10 = vpop.f32.mrf.mxu0  ;;  %9213 = vst [vmem:[#allocation55_spill] sm:$0xff] %v8503_v4 }
 0x196   : > { %9191 = vst [vmem:[#allocation39_spill] sm:$0xff] %v8431_v2  ;;  %9195 = vst [vmem:[#allocation25_spill] sm:$0xff] %v8442_v8  ;;  %v8447_v59 = vadd.f32 %v2050_v10, %v1715_v47 }
 0x197   : > { %v8436_v46 = vpop.f32.mrf.mxu1  ;;  %v6577_v25 = vpop.f32.mrf.mxu0 }
 0x198   : > { %9193 = vst [vmem:[#allocation41_spill] sm:$0xff] %v8436_v46  ;;  %9197 = vst [vmem:[#allocation28_spill] sm:$0xff] %v8447_v59  ;;  %v8455_v62 = vadd.f32 %v6577_v25, %v8301_v49 }
 0x199   : > { %v8444_v51 = vpop.f32.mrf.mxu1  ;;  %v2060_v37 = vpop.f32.mrf.mxu0 }
 0x19a   : > { %9196 = vst [vmem:[#allocation27_spill] sm:$0xff] %v8444_v51  ;;  %9200 = vst [vmem:[#allocation30_spill] sm:$0xff] %v8455_v62  ;;  %v8460_v54 = vadd.f32 %v2060_v37, %v1717_v19 }
 0x19b   : > { %v8449_v12 = vpop.f32.mrf.mxu1  ;;  %v6580_v29 = vpop.f32.mrf.mxu0 }
 0x19c   : > { %9198 = vst [vmem:[#allocation42_spill] sm:$0xff] %v8449_v12  ;;  %9202 = vst [vmem:[#allocation44_spill] sm:$0xff] %v8460_v54  ;;  %v8466_v36 = vadd.f32 %v6580_v29, %v8311_v35 }
 0x19d   : > { %v8457_v39 = vpop.f32.mrf.mxu1  ;;  %v2070_v56 = vpop.f32.mrf.mxu0 }
 0x19e   : > { %9201 = vst [vmem:[#allocation43_spill] sm:$0xff] %v8457_v39  ;;  %9204 = vst [vmem:[#allocation46_spill] sm:$0xff] %v8466_v36  ;;  %v8470_v49 = vadd.f32 %v2070_v56, %v1719_v57 }
 0x19f   : > { %v8462_v15 = vpop.f32.mrf.mxu1  ;;  %v6635_v38 = vpop.f32.mrf.mxu0 }
 0x1a0   : > { %9203 = vst [vmem:[#allocation45_spill] sm:$0xff] %v8462_v15  ;;  %9206 = vst [vmem:[#allocation48_spill] sm:$0xff] %v8470_v49 }
 0x1a1   : > { %v8468_v28 = vpop.f32.mrf.mxu1  ;;  %v8482_v18 = vpop.f32.mrf.mxu0 }
 0x1a2   : > { %9205 = vst [vmem:[#allocation47_spill] sm:$0xff] %v8468_v28 }
 0x1a3   : > { %v8477_v6 = vpop.f32.mrf.mxu1  ;;  %v8486_v10 = vpop.f32.mrf.mxu0 }
 0x1a4   : > { %9207 = vst [vmem:[#allocation49_spill] sm:$0xff] %v8477_v6 }
 0x1a5   : > { %v8480_v47 = vpop.f32.mrf.mxu1  ;;  %v8490_v25 = vpop.f32.mrf.mxu0 }
 0x1a6   : > { %9208 = vst [vmem:[#allocation50_spill] sm:$0xff] %v8480_v47 }
 0x1a7   : > { %v8484_v35 = vpop.f32.mrf.mxu1  ;;  %v8494_v14 = vpop.f32.mrf.mxu0 }
 0x1a8   : > { %9209 = vst [vmem:[#allocation51_spill] sm:$0xff] %v8484_v35 }
 0x1a9   : > { %v8488_v30 = vpop.f32.mrf.mxu1  ;;  %v8498_v37 = vpop.f32.mrf.mxu0 }
 0x1aa   : > { %9210 = vst [vmem:[#allocation52_spill] sm:$0xff] %v8488_v30 }
 0x1ab   : > { %v8492_v5 = vpop.f32.mrf.mxu1  ;;  %v8507_v57 = vpop.f32.mrf.mxu0 }
 0x1ac   : > { %9211 = vst [vmem:[#allocation53_spill] sm:$0xff] %v8492_v5 }
 0x1ad   : > { %v8496_v19 = vpop.f32.mrf.mxu1  ;;  %v8512_v49 = vpop.f32.mrf.mxu0 }
 0x1ae   : > { %9212 = vst [vmem:[#allocation54_spill] sm:$0xff] %v8496_v19 }
 0x1af   : > { %v8505_v29 = vpop.f32.mrf.mxu1  ;;  %v8514_v36 = vpop.f32.mrf.mxu0 }
 0x1b0   : > { %9214 = vst [vmem:[#allocation56_spill] sm:$0xff] %v8505_v29 }
 0x1b1   : > { %v8510_v56 = vpop.f32.mrf.mxu1  ;;  %v8516_v54 = vpop.f32.mrf.mxu0 }
 0x1b2   : > { %9215 = vst [vmem:[#allocation57_spill] sm:$0xff] %v8510_v56 }
 0x1b3   : > { %v6685_v19 = vpop.f32.mrf.mxu1  ;;  %v8518_v62 = vpop.f32.mrf.mxu0 }
 0x1b5   : > { %v3091_v5 = vpop.f32.mrf.mxu1  ;;  %v8520_v59 = vpop.f32.mrf.mxu0 }
 0x1b7   : > { %v6688_v30 = vpop.f32.mrf.mxu1  ;;  %v8524_v35 = vpop.f32.mrf.mxu0 }
 0x1b9   : > { %v8522_v29 = vpop.f32.mrf.mxu1  ;;  %v8528_v56 = vpop.f32.mrf.mxu0 }
 0x1bb   : > { %v8526_v8 = vpop.f32.mrf.mxu1  ;;  %v8532_v53 = vpop.f32.mrf.mxu0 }
 0x1bc   : > { %9216 = vst [vmem:[#allocation58_spill] sm:$0xff] %v8532_v53 }
 0x1bd   : > { %v8530_v47 = vpop.f32.mrf.mxu1  ;;  %v8536_v26 = vpop.f32.mrf.mxu0 }
 0x1be   : > { %9217 = vst [vmem:[#allocation59_spill] sm:$0xff] %v8536_v26 }
 0x1bf   : > { %v8534_v6 = vpop.f32.mrf.mxu1  ;;  %v8540_v42 = vpop.f32.mrf.mxu0 }
 0x1c0   : > { %9218 = vst [vmem:[#allocation60_spill] sm:$0xff] %v8540_v42 }
 0x1c1   : > { %v8538_v28 = vpop.f32.mrf.mxu1  ;;  %v8544_v34 = vpop.f32.mrf.mxu0 }
 0x1c2   : > { %9219 = vst [vmem:[#allocation61_spill] sm:$0xff] %v8544_v34 }
 0x1c3   : > { %v8542_v15 = vpop.f32.mrf.mxu1  ;;  %v8548_v63 = vpop.f32.mrf.mxu0 }
 0x1c4   : > { %9220 = vst [vmem:[#allocation62_spill] sm:$0xff] %v8548_v63 }
 0x1c5   : > { %v8546_v39 = vpop.f32.mrf.mxu1  ;;  %v8552_v3 = vpop.f32.mrf.mxu0 }
 0x1c6   : > { %9221 = vst [vmem:[#allocation63_spill] sm:$0xff] %v8552_v3 }
 0x1c7   : > { %v8550_v12 = vpop.f32.mrf.mxu1  ;;  %v8554_v51 = vpop.f32.mrf.mxu0 }
 0x1c8   : > { %9222 = vst [vmem:[#allocation64_spill] sm:$0xff] %v8554_v51 }
 0x1c9   : > { %v8556_v27 = vpop.f32.mrf.mxu1  ;;  %v8558_v46 = vpop.f32.mrf.mxu0 }
 0x1ca   : > { %9223 = vst [vmem:[#allocation65_spill] sm:$0xff] %v8558_v46 }
 0x1cb   : > { %v8560_v50 = vpop.f32.mrf.mxu0  ;;  %v8562_v42 = vpop.f32.mrf.mxu1 }
 0x1cc   : > { %9224 = vst [vmem:[#allocation66_spill] sm:$0xff] %v8560_v50  ;;  %9225 = vst [vmem:[#allocation67_spill] sm:$0xff] %v8562_v42  ;;  %v1689_v50 = vadd.f32 %v8097_v52, %v8041_v0  ;;  %v9241_v52 = vld [vmem:[#allocation14_spill] sm:$0xff] }
 0x1cd   : > { %v8564_v2 = vpop.f32.mrf.mxu0  ;;  %v8568_v13 = vpop.f32.mrf.mxu1 }
 0x1ce   : > { %9226 = vst [vmem:[#allocation68_spill] sm:$0xff] %v8564_v2  ;;  %9228 = vst [vmem:[#allocation70_spill] sm:$0xff] %v8568_v13 }
 0x1cf   : > { %v8566_v34 = vpop.f32.mrf.mxu0  ;;  %v8574_v3 = vpop.f32.mrf.mxu1 }
 0x1d0   : > { %9227 = vst [vmem:[#allocation69_spill] sm:$0xff] %v8566_v34  ;;  %9231 = vst [vmem:[#allocation73_spill] sm:$0xff] %v8574_v3  ;;  %v9236_v34 = vld [vmem:[#allocation12_spill] sm:$0xff] }
 0x1d1   : > { %v8570_v63 = vpop.f32.mrf.mxu0  ;;  %v8582_v46 = vpop.f32.mrf.mxu1  ;;  %v2079_v32 = vadd.f32 %v9236_v34, %v1689_v50  ;;  %v9240_v3 = vld [vmem:[#allocation8_spill] sm:$0xff] }
 0x1d2   : > { %9229 = vst [vmem:[#allocation71_spill] sm:$0xff] %v8570_v63  ;;  %9234 = vst [vmem:[#allocation76_spill] sm:$0xff] %v8582_v46  ;;  %v2470_v63 = vadd.f32 %v8320_v33, %v9237_v9  ;;  %v9243_v9 = vld [vmem:[#allocation6_spill] sm:$0xff] }
 0x1d3   : > { %v8572_v4 = vpop.f32.mrf.mxu0  ;;  %v8594_v21 = vpop.f32.mrf.mxu1 }
 0x1d4   : > { %9230 = vst [vmem:[#allocation72_spill] sm:$0xff] %v8572_v4  ;;  %v9239_v4 = vld [vmem:[#allocation31_spill] sm:$0xff] }
 0x1d5   : > { %v8576_v51 = vpop.f32.mrf.mxu0  ;;  %v1691_v53 = vadd.f32 %v9240_v3, %v9239_v4 }
 0x1d6   : > { %9232 = vst [vmem:[#allocation74_spill] sm:$0xff] %v8576_v51  ;;  %v2469_v51 = vadd.f32 %v8327_v1, %v2079_v32  ;;  %v8607_v1 = vld [vmem:[%s9034_s2] ss:$0 sm:$0xff] }
 0x1d7   : > { %v8578_v26 = vpop.f32.mrf.mxu0  ;;  %v2081_v46 = vadd.f32 %v9241_v52, %v1691_v53 }
 0x1d8   : > { %9233 = vst [vmem:[#allocation75_spill] sm:$0xff] %v8578_v26  ;;  %v2861_v26 = vadd.f32 %v6635_v38, %v2470_v63  ;;  %v2860_v34 = vadd.f32 %v8482_v18, %v2469_v51  ;;  %v9245_v38 = vld [vmem:[#allocation16_spill] sm:$0xff]  ;;  %v8614_v51 = vpop.f32.mrf.mxu1 }
 0x1d9   : > { %v8584_v2 = vpop.f32.mrf.mxu0  ;;  %v2471_v3 = vadd.f32 %v8339_v40, %v2081_v46  ;;  %v9248_v40 = vld [vmem:[#allocation10_spill] sm:$0xff] }
 0x1da   : > { %9235 = vst [vmem:[#allocation77_spill] sm:$0xff] %v8584_v2  ;;  %v9242_v2 = vld [vmem:[#allocation13_spill] sm:$0xff]  ;;  %v3251_v33 = vadd.f32 %v6685_v19, %v2861_v26  ;;  %v3250_v32 = vadd.f32 %v3091_v5, %v2860_v34 }
 0x1db   : > { %v8589_v13 = vpop.f32.mrf.mxu0  ;;  %v2472_v50 = vadd.f32 %v8331_v58, %v9242_v2  ;;  %v9246_v2 = vld [vmem:[#allocation15_spill] sm:$0xff]  ;;  %v2862_v18 = vadd.f32 %v8490_v25, %v2471_v3 }
 0x1dc   : > { %9238 = vst [vmem:[#allocation12_spill] sm:$0xff] %v8589_v13  ;;  %v9244_v13 = vld [vmem:[#allocation9_spill] sm:$0xff]  ;;  %v2474_v26 = vadd.f32 %v8346_v16, %v9246_v2 }
 0x1dd   : > { %v8596_v0 = vpop.f32.mrf.mxu0  ;;  %v1693_v20 = vadd.f32 %v9244_v13, %v9243_v9  ;;  %v2863_v63 = vadd.f32 %v8486_v10, %v2472_v50  ;;  %v9247_v9 = vld [vmem:[#allocation7_spill] sm:$0xff]  ;;  %v3252_v5 = vadd.f32 %v8522_v29, %v2862_v18 }
 0x1de   : > { %v1695_v46 = vadd.f32 %v9248_v40, %v9247_v9  ;;  %v9251_v40 = vld [vmem:[#allocation19_spill] sm:$0xff] }
 0x1df   : > { %v6735_v42 = vpop.f32.mrf.mxu0  ;;  %v2083_v58 = vadd.f32 %v9245_v38, %v1693_v20  ;;  %v3253_v19 = vadd.f32 %v6688_v30, %v2863_v63  ;;  %v9250_v30 = vld [vmem:[#allocation17_spill] sm:$0xff] }
 0x1e0   : > { %v3641_v53 = vadd.f32 %v6735_v42, %v3251_v33  ;;  %v2865_v42 = vadd.f32 %v8494_v14, %v2474_v26  ;;  %v9249_v33 = vld [vmem:[#allocation18_spill] sm:$0xff]  ;;  %v2476_v3 = vadd.f32 %v8357_v31, %v9250_v30 }
 0x1e1   : > { %v3481_v13 = vpop.f32.mrf.mxu0  ;;  %v2473_v10 = vadd.f32 %v8353_v60, %v2083_v58  ;;  %v2085_v25 = vadd.f32 %v9249_v33, %v1695_v46  ;;  %v2477_v46 = vadd.f32 %v8379_v45, %v9251_v40 }
 0x1e2   : > { %v3680_v4 = vadd.f32 %v8607_v1, %v3641_v53  ;;  %v3640_v52 = vadd.f32 %v3481_v13, %v3250_v32  ;;  %v8628_v32 = vpop.f32.mrf.mxu1  ;;  %v3255_v60 = vadd.f32 %v8526_v8, %v2865_v42  ;;  %v2867_v2 = vadd.f32 %v8507_v57, %v2476_v3 }
 0x1e3   : > { %v6738_v20 = vpop.f32.mrf.mxu0  ;;  %v2864_v63 = vadd.f32 %v8498_v37, %v2473_v10  ;;  %v2475_v58 = vadd.f32 %v8366_v48, %v2085_v25  ;;  %v2478_v8 = vadd.f32 %v8371_v43, %v8325_v41  ;;  %v2479_v25 = vadd.f32 %v8392_v23, %v8344_v7 }
 0x1e4   : > { %v3712_v16 = vmax.f32 %v3680_v4, 0.0  ;;  %v3679_v50 = vadd.f32 %v8607_v1, %v3640_v52  ;;  %v3643_v34 = vadd.f32 %v6738_v20, %v3253_v19  ;;  %v8641_v4 = vpop.f32.mrf.mxu1  ;;  %v3257_v48 = vadd.f32 %v8534_v6, %v2867_v2  ;;  %v9252_v20 = vld [vmem:[#allocation20_spill] sm:$0xff] }
 0x1e5   : > { %v3491_v53 = vpop.f32.mrf.mxu0  ;;  %v3254_v31 = vadd.f32 %v8530_v47, %v2864_v63  ;;  %v2866_v19 = vadd.f32 %v8512_v49, %v2475_v58  ;;  %v2869_v10 = vadd.f32 %v8514_v36, %v2478_v8  ;;  %v9253_v58 = vld [vmem:[#allocation21_spill] sm:$0xff] }
 0x1e6   : > { %3801 = vst.msk [vmem:[#allocation2 + $0x21] sm:$0xff] %vm3743_vm2, %v3712_v16  ;;  %v3711_v14 = vmax.f32 %v3679_v50, 0.0  ;;  %v3682_v29 = vadd.f32 %v8607_v1, %v3643_v34  ;;  %v3642_v38 = vadd.f32 %v3491_v53, %v3252_v5  ;;  %v2480_v5 = vadd.f32 %v8384_v55, %v9252_v20  ;;  %v8655_v50 = vpop.f32.mrf.mxu1  ;;  %v9260_v20 = vld [vmem:[#allocation37_spill] sm:$0xff] }
 0x1e7   : > { %v6741_v26 = vpop.f32.mrf.mxu0  ;;  %v3256_v41 = vadd.f32 %v8538_v28, %v2866_v19  ;;  %v2868_v16 = vadd.f32 %v8516_v54, %v2477_v46  ;;  %v3259_v45 = vadd.f32 %v8542_v15, %v2869_v10  ;;  %v2481_v2 = vadd.f32 %v8405_v24, %v9253_v58  ;;  %v9254_v19 = vld [vmem:[#allocation67_spill] sm:$0xff]  ;;  %v9258_v10 = vld [vmem:[#allocation70_spill] sm:$0xff] }
 0x1e8   : > { %3800 = vst.msk [vmem:[#allocation2 + $0x19] sm:$0xff] %vm3743_vm2, %v3711_v14  ;;  %v3714_v37 = vmax.f32 %v3682_v29, 0.0  ;;  %v3681_v13 = vadd.f32 %v8607_v1, %v3642_v38  ;;  %v3645_v18 = vadd.f32 %v6741_v26, %v3255_v60  ;;  %v2871_v30 = vadd.f32 %v8518_v62, %v2480_v5  ;;  %v8670_v7 = vpop.f32.mrf.mxu1 }
 0x1e9   : > { %v3501_v52 = vpop.f32.mrf.mxu0  ;;  %v3258_v54 = vadd.f32 %v8546_v39, %v2868_v16  ;;  %v2482_v60 = vadd.f32 %v8397_v11, %v8351_v44  ;;  %v2870_v14 = vadd.f32 %v8520_v59, %v2479_v25  ;;  %v8681_v11 = vld [vmem:[%s9035_s3 + $0x10] sm:$0xff]  ;;  %v2484_v24 = vadd.f32 %v8410_v61, %v8364_v22  ;;  %v9261_v16 = vld [vmem:[#allocation59_spill] sm:$0xff] }
 0x1ea   : > { %3803 = vst.msk [vmem:[#allocation2 + $0x39] sm:$0xff] %vm3743_vm2, %v3714_v37  ;;  %v3713_v57 = vmax.f32 %v3681_v13, 0.0  ;;  %v3684_v47 = vadd.f32 %v8607_v1, %v3645_v18  ;;  %v3644_v9 = vadd.f32 %v3501_v52, %v3254_v31  ;;  %v3261_v62 = vadd.f32 %v8550_v12, %v2871_v30  ;;  %v8690_v18 = vpop.f32.mrf.mxu1  ;;  %v9257_v61 = vld [vmem:[#allocation58_spill] sm:$0xff] }
 0x1eb   : > { %v6744_v42 = vpop.f32.mrf.mxu0  ;;  %v2873_v26 = vadd.f32 %v8524_v35, %v2482_v60  ;;  %v3260_v59 = vadd.f32 %v8556_v27, %v2870_v14  ;;  %v2872_v35 = vadd.f32 %v8528_v56, %v2481_v2  ;;  %v2875_v56 = vadd.f32 %v9257_v61, %v2484_v24  ;;  %v9268_v2 = vld [vmem:[#allocation26_spill] sm:$0xff] }
 0x1ec   : > { %3802 = vst.msk [vmem:[#allocation2 + $0x31] sm:$0xff] %vm3743_vm2, %v3713_v57  ;;  %v3716_v43 = vmax.f32 %v3684_v47, 0.0  ;;  %v3683_v49 = vadd.f32 %v8607_v1, %v3644_v9  ;;  %v3647_v6 = vadd.f32 %v6744_v42, %v3257_v48  ;;  %v9255_v47 = vld [vmem:[#allocation22_spill] sm:$0xff]  ;;  %v9256_v9 = vld [vmem:[#allocation35_spill] sm:$0xff] }
 0x1ed   : > { %v3511_v34 = vpop.f32.mrf.mxu0  ;;  %v3263_v27 = vadd.f32 %v9254_v19, %v2873_v26  ;;  %v2483_v22 = vadd.f32 %v9256_v9, %v9255_v47  ;;  %v3262_v42 = vadd.f32 %v9258_v10, %v2872_v35  ;;  %v9269_v26 = vld [vmem:[#allocation41_spill] sm:$0xff] }
 0x1ee   : > { %3805 = vst.msk [vmem:[#allocation2 + $0x51] sm:$0xff] %vm3743_vm2, %v3716_v43  ;;  %v3715_v36 = vmax.f32 %v3683_v49, 0.0  ;;  %v3686_v28 = vadd.f32 %v8607_v1, %v3647_v6  ;;  %v3646_v33 = vadd.f32 %v3511_v34, %v3256_v41  ;;  %v9259_v6 = vld [vmem:[#allocation23_spill] sm:$0xff]  ;;  %v9271_v19 = vld [vmem:[#allocation29_spill] sm:$0xff] }
 0x1ef   : > { %v6747_v3 = vpop.f32.mrf.mxu0  ;;  %v4434_v55 = vld [vmem:[#allocation2 + $0x19] ss:$2 sm:$0xff]  ;;  %v2486_v5 = vadd.f32 %v9260_v20, %v9259_v6  ;;  %v2874_v34 = vadd.f32 %v9261_v16, %v2483_v22  ;;  %v9277_v16 = vld [vmem:[#allocation33_spill] sm:$0xff] }
 0x1f0   : > { %3804 = vst.msk [vmem:[#allocation2 + $0x49] sm:$0xff] %vm3743_vm2, %v3715_v36  ;;  %v3718_v63 = vmax.f32 %v3686_v28, 0.0  ;;  %v3685_v15 = vadd.f32 %v8607_v1, %v3646_v33  ;;  %v3649_v53 = vadd.f32 %v6747_v3, %v3259_v45  ;;  %6839 = vmatprep.mubr.msk.f32.mxu0 %vm3743_vm2, %v4434_v55  ;;  %v8712_v45 = vpop.f32.mrf.mxu1  ;;  %v9262_v28 = vld [vmem:[#allocation55_spill] sm:$0xff]  ;;  %v9263_v33 = vld [vmem:[#allocation73_spill] sm:$0xff] }
 0x1f1   : > { %v3521_v23 = vpop.f32.mrf.mxu0  ;;  %v3265_v25 = vadd.f32 %v9263_v33, %v2875_v56 }
 0x1f2   : > { %3807 = vst.msk [vmem:[#allocation2 + $0x69] sm:$0xff] %vm3743_vm2, %v3718_v63  ;;  %v3717_v39 = vmax.f32 %v3685_v15, 0.0  ;;  %v3688_v29 = vadd.f32 %v8607_v1, %v3649_v53  ;;  %v3648_v38 = vadd.f32 %v3521_v23, %v3258_v54  ;;  %v9264_v54 = vld [vmem:[#allocation24_spill] sm:$0xff]  ;;  %v9265_v63 = vld [vmem:[#allocation39_spill] sm:$0xff] }
 0x1f3   : > { %v6750_v31 = vpop.f32.mrf.mxu0  ;;  %v3851_v44 = vld [vmem:[#allocation2 + $0x31] ss:$2 sm:$0xff]  ;;  %v2485_v15 = vadd.f32 %v9265_v63, %v9264_v54  ;;  %v9266_v53 = vld [vmem:[#allocation60_spill] sm:$0xff] }
 0x1f4   : > { %3806 = vst.msk [vmem:[#allocation2 + $0x61] sm:$0xff] %vm3743_vm2, %v3717_v39  ;;  %v3720_v12 = vmax.f32 %v3688_v29, 0.0  ;;  %v3687_v37 = vadd.f32 %v8607_v1, %v3648_v38  ;;  %v3651_v13 = vadd.f32 %v6750_v31, %v3261_v62  ;;  %6784 = vmatmul.mubr.msk.f32.vlgmr.msra.gmra.mxu1 %vm3743_vm2, %v3851_v44  ;;  %v2877_v60 = vadd.f32 %v9266_v53, %v2486_v5  ;;  %v9267_v62 = vld [vmem:[#allocation76_spill] sm:$0xff]  ;;  %v9270_v44 = vld [vmem:[#allocation61_spill] sm:$0xff]  ;;  %v9280_v63 = vld [vmem:[#allocation34_spill] sm:$0xff] }
 0x1f5   : > { %v3531_v8 = vpop.f32.mrf.mxu0  ;;  %6796 = vmatpush3.msra.mxu1 %v8475_v17  ;;  %v8703_v17 = vld [vmem:[%s9035_s3 + $0x40] sm:$0xff]  ;;  %v3264_v39 = vadd.f32 %v9267_v62, %v2874_v34  ;;  %v2488_v31 = vadd.f32 %v9269_v26, %v9268_v2  ;;  %v9278_v34 = vld [vmem:[#allocation43_spill] sm:$0xff] }
 0x1f6   : > { %3809 = vst.msk [vmem:[#allocation2 + $0x81] sm:$0xff] %vm3743_vm2, %v3720_v12  ;;  %v3719_v52 = vmax.f32 %v3687_v37, 0.0  ;;  %v3690_v48 = vadd.f32 %v8607_v1, %v3651_v13  ;;  %v3650_v57 = vadd.f32 %v3531_v8, %v3260_v59  ;;  %6809 = vmatprep.subr.mxu1 %v8681_v11  ;;  %v2876_v59 = vadd.f32 %v9270_v44, %v2485_v15  ;;  %v8729_v12 = vpop.f32.mrf.mxu1  ;;  %v9281_v15 = vld [vmem:[#allocation45_spill] sm:$0xff]  ;;  %v9284_v2 = vld [vmem:[#allocation47_spill] sm:$0xff] }
 0x1f7   : > { %v6753_v40 = vpop.f32.mrf.mxu0  ;;  %v4436_v46 = vld [vmem:[#allocation2 + $0x49] ss:$2 sm:$0xff]  ;;  %v3267_v13 = vadd.f32 %v8594_v21, %v2877_v60  ;;  %v2492_v53 = vadd.f32 %v9281_v15, %v9280_v63  ;;  %v9297_v63 = vld [vmem:[#allocation72_spill] sm:$0xff] }
 0x1f8   : > { %3808 = vst.msk [vmem:[#allocation2 + $0x79] sm:$0xff] %vm3743_vm2, %v3719_v52  ;;  %v3722_v41 = vmax.f32 %v3690_v48, 0.0  ;;  %v3689_v43 = vadd.f32 %v8607_v1, %v3650_v57  ;;  %v3653_v49 = vadd.f32 %v6753_v40, %v3263_v27  ;;  %6840 = vmatmul.mubr.msk.f32.vlgmr.msra.gmra.mxu0 %vm3743_vm2, %v4436_v46  ;;  %v9272_v27 = vld [vmem:[#allocation27_spill] sm:$0xff]  ;;  %v9273_v48 = vld [vmem:[#allocation62_spill] sm:$0xff]  ;;  %v3266_v22 = vadd.f32 %v8614_v51, %v2876_v59  ;;  %v9274_v40 = vld [vmem:[#allocation32_spill] sm:$0xff] }
 0x1f9   : > { %v3541_v36 = vpop.f32.mrf.mxu0  ;;  %6866 = vmatpush3.msra.mxu0 %v9262_v28  ;;  %v2487_v52 = vadd.f32 %v9272_v27, %v9271_v19  ;;  %v2879_v57 = vadd.f32 %v9273_v48, %v2488_v31  ;;  %v9275_v46 = vld [vmem:[#allocation42_spill] sm:$0xff]  ;;  %v9279_v28 = vld [vmem:[#allocation64_spill] sm:$0xff]  ;;  %v9282_v60 = vld [vmem:[#allocation65_spill] sm:$0xff] }
 0x1fa   : > { %3811 = vst.msk [vmem:[#allocation2 + $0x99] sm:$0xff] %vm3743_vm2, %v3722_v41  ;;  %v3721_v30 = vmax.f32 %v3689_v43, 0.0  ;;  %v3692_v3 = vadd.f32 %v8607_v1, %v3653_v49  ;;  %v3652_v55 = vadd.f32 %v3541_v36, %v3262_v42  ;;  %6893 = vmatprep.subr.mxu0 %v8703_v17  ;;  %v2490_v10 = vadd.f32 %v9275_v46, %v9274_v40  ;;  %v9276_v42 = vld [vmem:[#allocation63_spill] sm:$0xff]  ;;  %v8744_v43 = vpop.f32.mrf.mxu1  ;;  %v9285_v31 = vld [vmem:[#allocation66_spill] sm:$0xff]  ;;  %v9287_v19 = vld [vmem:[#allocation49_spill] sm:$0xff] }
 0x1fb   : > { %v6756_v14 = vpop.f32.mrf.mxu0  ;;  %v3853_v23 = vld [vmem:[#allocation2 + $0x61] ss:$2 sm:$0xff]  ;;  %v2878_v41 = vadd.f32 %v9276_v42, %v2487_v52  ;;  %v3269_v6 = vadd.f32 %v8628_v32, %v2879_v57  ;;  %v2489_v36 = vadd.f32 %v9278_v34, %v9277_v16  ;;  %v2883_v44 = vadd.f32 %v9285_v31, %v2492_v53  ;;  %v9294_v34 = vld [vmem:[#allocation71_spill] sm:$0xff] }
 0x1fc   : > { %3810 = vst.msk [vmem:[#allocation2 + $0x91] sm:$0xff] %vm3743_vm2, %v3721_v30  ;;  %v3724_v29 = vmax.f32 %v3692_v3, 0.0  ;;  %v3691_v38 = vadd.f32 %v8607_v1, %v3652_v55  ;;  %v3655_v58 = vadd.f32 %v6756_v14, %v3265_v25  ;;  %6786 = vmatprep.mubr.msk.f32.mxu1 %vm3743_vm2, %v3853_v23  ;;  %v2881_v33 = vadd.f32 %v9279_v28, %v2490_v10  ;;  %v6724_v23 = vpop.f32.mrf.mxu1  ;;  %v9288_v52 = vld [vmem:[#allocation68_spill] sm:$0xff]  ;;  %v9291_v46 = vld [vmem:[#allocation69_spill] sm:$0xff] }
 0x1fd   : > { %v3551_v37 = vpop.f32.mrf.mxu0  ;;  %v3268_v3 = vadd.f32 %v8641_v4, %v2878_v41  ;;  %v2880_v14 = vadd.f32 %v9282_v60, %v2489_v36 }
 0x1fe   : > { %3813 = vst.msk [vmem:[#allocation2 + $0xb1] sm:$0xff] %vm3743_vm2, %v3724_v29  ;;  %v3723_v24 = vmax.f32 %v3691_v38, 0.0  ;;  %v3694_v35 = vadd.f32 %v8607_v1, %v3655_v58  ;;  %v3654_v8 = vadd.f32 %v3551_v37, %v3264_v39  ;;  %v3271_v39 = vadd.f32 %v8655_v50, %v2881_v33  ;;  %v9283_v58 = vld [vmem:[#allocation36_spill] sm:$0xff]  ;;  %v3221_v57 = vpop.f32.mrf.mxu1 }
 0x1ff   : > { %v6759_v47 = vpop.f32.mrf.mxu0  ;;  %v4438_v9 = vld [vmem:[#allocation2 + $0x79] ss:$2 sm:$0xff]  ;;  %v2491_v26 = vadd.f32 %v9284_v2, %v9283_v58  ;;  %v9300_v58 = vld [vmem:[#allocation74_spill] sm:$0xff] }
 0x200   : > { %3812 = vst.msk [vmem:[#allocation2 + $0xa9] sm:$0xff] %vm3743_vm2, %v3723_v24  ;;  %v3726_v61 = vmax.f32 %v3694_v35, 0.0  ;;  %v3693_v21 = vadd.f32 %v8607_v1, %v3654_v8  ;;  %v3657_v56 = vadd.f32 %v6759_v47, %v3267_v13  ;;  %6842 = vmatprep.mubr.msk.f32.mxu0 %vm3743_vm2, %v4438_v9  ;;  %v3270_v13 = vadd.f32 %v8670_v7, %v2880_v14  ;;  %v9286_v8 = vld [vmem:[#allocation38_spill] sm:$0xff]  ;;  %v6727_v28 = vpop.f32.mrf.mxu1 }
 0x201   : > { %v3561_v49 = vpop.f32.mrf.mxu0  ;;  %v2494_v27 = vadd.f32 %v9287_v19, %v9286_v8  ;;  %v2882_v48 = vadd.f32 %v9288_v52, %v2491_v26  ;;  %v3273_v9 = vadd.f32 %v8690_v18, %v2883_v44 }
 0x202   : > { %3815 = vst.msk [vmem:[#allocation2 + $0xc9] sm:$0xff] %vm3743_vm2, %v3726_v61  ;;  %v3725_v51 = vmax.f32 %v3693_v21, 0.0  ;;  %v3696_v20 = vadd.f32 %v8607_v1, %v3657_v56  ;;  %v3656_v5 = vadd.f32 %v3561_v49, %v3266_v22  ;;  %v9289_v21 = vld [vmem:[#allocation40_spill] sm:$0xff]  ;;  %v9290_v56 = vld [vmem:[#allocation50_spill] sm:$0xff]  ;;  %v3231_v26 = vpop.f32.mrf.mxu1 }
 0x203   : > { %v6762_v25 = vpop.f32.mrf.mxu0  ;;  %v3855_v30 = vld [vmem:[#allocation2 + $0x91] ss:$2 sm:$0xff]  ;;  %v2493_v40 = vadd.f32 %v9290_v56, %v9289_v21  ;;  %v2885_v10 = vadd.f32 %v9291_v46, %v2494_v27  ;;  %v3272_v49 = vadd.f32 %v8712_v45, %v2882_v48 }
 0x204   : > { %3814 = vst.msk [vmem:[#allocation2 + $0xc1] sm:$0xff] %vm3743_vm2, %v3725_v51  ;;  %v3728_v55 = vmax.f32 %v3696_v20, 0.0  ;;  %v3695_v32 = vadd.f32 %v8607_v1, %v3656_v5  ;;  %v3659_v54 = vadd.f32 %v6762_v25, %v3269_v6  ;;  %6787 = vmatmul.mubr.msk.f32.gmra.mxu1 %vm3743_vm2, %v3855_v30  ;;  %v9292_v20 = vld [vmem:[#allocation25_spill] sm:$0xff]  ;;  %v9293_v5 = vld [vmem:[#allocation51_spill] sm:$0xff]  ;;  %v6730_v56 = vpop.f32.mrf.mxu1 }
 0x205   : > { %v3571_v62 = vpop.f32.mrf.mxu0  ;;  %v2496_v16 = vadd.f32 %v9293_v5, %v9292_v20  ;;  %v2884_v36 = vadd.f32 %v9294_v34, %v2493_v40  ;;  %v3275_v25 = vadd.f32 %v8729_v12, %v2885_v10 }
 0x206   : > { %3817 = vst.msk [vmem:[#allocation2 + $0xe1] sm:$0xff] %vm3743_vm2, %v3728_v55  ;;  %v3727_v4 = vmax.f32 %v3695_v32, 0.0  ;;  %v3698_v29 = vadd.f32 %v8607_v1, %v3659_v54  ;;  %v3658_v38 = vadd.f32 %v3571_v62, %v3268_v3  ;;  %v9295_v55 = vld [vmem:[#allocation28_spill] sm:$0xff] }
 0x207   : > { %v6765_v59 = vpop.f32.mrf.mxu0  ;;  %v4440_v37 = vld [vmem:[#allocation2 + $0xa9] ss:$2 sm:$0xff]  ;;  %v9296_v32 = vld [vmem:[#allocation52_spill] sm:$0xff]  ;;  %v2887_v15 = vadd.f32 %v9297_v63, %v2496_v16  ;;  %v3274_v14 = vadd.f32 %v8744_v43, %v2884_v36 }
 0x208   : > { %3816 = vst.msk [vmem:[#allocation2 + $0xd9] sm:$0xff] %vm3743_vm2, %v3727_v4  ;;  %v3730_v24 = vmax.f32 %v3698_v29, 0.0  ;;  %v3697_v50 = vadd.f32 %v8607_v1, %v3658_v38  ;;  %v3661_v35 = vadd.f32 %v6765_v59, %v3271_v39  ;;  %6843 = vmatmul.mubr.msk.f32.gmra.mxu0 %vm3743_vm2, %v4440_v37  ;;  %v2495_v54 = vadd.f32 %v9296_v32, %v9295_v55  ;;  %v9298_v4 = vld [vmem:[#allocation30_spill] sm:$0xff]  ;;  %v9299_v29 = vld [vmem:[#allocation53_spill] sm:$0xff] }
 0x209   : > { %v3581_v47 = vpop.f32.mrf.mxu0  ;;  %v2498_v38 = vadd.f32 %v9299_v29, %v9298_v4  ;;  %v3277_v44 = vadd.f32 %v6724_v23, %v2887_v15 }
 0x20a   : > { %3819 = vst.msk [vmem:[#allocation2 + $0xf9] sm:$0xff] %vm3743_vm2, %v3730_v24  ;;  %v3729_v7 = vmax.f32 %v3697_v50, 0.0  ;;  %v3700_v22 = vadd.f32 %v8607_v1, %v3661_v35  ;;  %v3660_v61 = vadd.f32 %v3581_v47, %v3270_v13  ;;  %v2886_v2 = vadd.f32 %v9300_v58, %v2495_v54  ;;  %v9301_v13 = vld [vmem:[#allocation44_spill] sm:$0xff]  ;;  %v9302_v24 = vld [vmem:[#allocation54_spill] sm:$0xff]  ;;  %v9303_v35 = vld [vmem:[#allocation75_spill] sm:$0xff] }
 0x20b   : > { %v6768_v42 = vpop.f32.mrf.mxu0  ;;  %v3857_v41 = vld [vmem:[#allocation2 + $0xc1] ss:$2 sm:$0xff]  ;;  %v2497_v50 = vadd.f32 %v9302_v24, %v9301_v13  ;;  %v2889_v8 = vadd.f32 %v9303_v35, %v2498_v38  ;;  %v4746_v13 = vld [vmem:[#allocation2 + $0x60] ss:$2 sm:$0xff] }
 0x20c   : > { %3818 = vst.msk [vmem:[#allocation2 + $0xf1] sm:$0xff] %vm3743_vm2, %v3729_v7  ;;  %v3732_v6 = vmax.f32 %v3700_v22, 0.0  ;;  %v3699_v18 = vadd.f32 %v8607_v1, %v3660_v61  ;;  %v3663_v51 = vadd.f32 %v6768_v42, %v3273_v9  ;;  %6789 = vmatprep.mubr.msk.f32.mxu1 %vm3743_vm2, %v3857_v41  ;;  %v3276_v52 = vadd.f32 %v3221_v57, %v2886_v2  ;;  %v9304_v9 = vld [vmem:[#allocation46_spill] sm:$0xff]  ;;  %v9305_v7 = vld [vmem:[#allocation56_spill] sm:$0xff]  ;;  %v9306_v61 = vld [vmem:[#allocation77_spill] sm:$0xff] }
 0x20d   : > { %v3591_v33 = vpop.f32.mrf.mxu0  ;;  %v2500_v22 = vadd.f32 %v9305_v7, %v9304_v9  ;;  %v2888_v21 = vadd.f32 %v9306_v61, %v2497_v50  ;;  %v3279_v46 = vadd.f32 %v6727_v28, %v2889_v8  ;;  %v9307_v41 = vld [vmem:[#allocation48_spill] sm:$0xff]  ;;  %v4748_v50 = vld [vmem:[#allocation2 + $0x90] ss:$2 sm:$0xff]  ;;  %v5910_v9 = vld [vmem:[%s9035_s3 + $0x28] sm:$0xff] }
 0x20e   : > { %3821 = vst.msk [vmem:[#allocation2 + $0x111] sm:$0xff] %vm3743_vm2, %v3732_v6  ;;  %v3731_v45 = vmax.f32 %v3699_v18, 0.0  ;;  %v3702_v30 = vadd.f32 %v8607_v1, %v3663_v51  ;;  %v3662_v3 = vadd.f32 %v3591_v33, %v3272_v49  ;;  %v9308_v49 = vld [vmem:[#allocation57_spill] sm:$0xff]  ;;  %v9309_v18 = vld [vmem:[#allocation12_spill] sm:$0xff] }
 0x20f   : > { %v6771_v53 = vpop.f32.mrf.mxu0  ;;  %v4442_v60 = vld [vmem:[#allocation2 + $0xd9] ss:$2 sm:$0xff]  ;;  %v2499_v6 = vadd.f32 %v9308_v49, %v9307_v41  ;;  %v2891_v51 = vadd.f32 %v9309_v18, %v2500_v22  ;;  %v3278_v16 = vadd.f32 %v3231_v26, %v2888_v21  ;;  %v3832_v2 = vld [vmem:[#allocation2] ss:$2 sm:$0xff] }
 0x210   : > { %3820 = vst.msk [vmem:[#allocation2 + $0x109] sm:$0xff] %vm3743_vm2, %v3731_v45  ;;  %v3734_v62 = vmax.f32 %v3702_v30, 0.0  ;;  %v3701_v12 = vadd.f32 %v8607_v1, %v3662_v3  ;;  %v3665_v39 = vadd.f32 %v6771_v53, %v3275_v25  ;;  %6845 = vmatprep.mubr.msk.f32.mxu0 %vm3743_vm2, %v4442_v60  ;;  %v3241_v25 = vpop.f32.mrf.mxu1  ;;  %v3840_v24 = vld [vmem:[#allocation2 + $0xc0] ss:$2 sm:$0xff] }
 0x211   : > { %v3601_v31 = vpop.f32.mrf.mxu0  ;;  %v2890_v33 = vadd.f32 %v8596_v0, %v2499_v6  ;;  %v3281_v30 = vadd.f32 %v6730_v56, %v2891_v51  ;;  %v4750_v35 = vld [vmem:[#allocation2 + $0xc0] ss:$2 sm:$0xff] }
 0x212   : > { %3823 = vst.msk [vmem:[#allocation2 + $0x129] sm:$0xff] %vm3743_vm2, %v3734_v62  ;;  %v3733_v59 = vmax.f32 %v3701_v12, 0.0  ;;  %v3704_v43 = vadd.f32 %v8607_v1, %v3665_v39  ;;  %v3664_v37 = vadd.f32 %v3601_v31, %v3274_v14  ;;  %v3834_v31 = vld [vmem:[#allocation2 + $0x30] ss:$2 sm:$0xff] }
 0x213   : > { %v6774_v19 = vpop.f32.mrf.mxu0  ;;  %v3859_v27 = vld [vmem:[#allocation2 + $0xf1] ss:$2 sm:$0xff]  ;;  %v3280_v15 = vadd.f32 %v3241_v25, %v2890_v33  ;;  %v4129_v7 = vld [vmem:[#allocation2 + $0x62] ss:$2 sm:$0xff]  ;;  %v5054_v22 = vld [vmem:[#allocation2 + $0x32] ss:$2 sm:$0xff] }
 0x214   : > { %3822 = vst.msk [vmem:[#allocation2 + $0x121] sm:$0xff] %vm3743_vm2, %v3733_v59  ;;  %v3736_v48 = vmax.f32 %v3704_v43, 0.0  ;;  %v3703_v47 = vadd.f32 %v8607_v1, %v3664_v37  ;;  %v3667_v23 = vadd.f32 %v6774_v19, %v3277_v44  ;;  %6790 = vmatmul.mubr.msk.f32.gmra.mxu1 %vm3743_vm2, %v3859_v27  ;;  %v5892_v59 = vld [vmem:[%s9035_s3 + $0x18] sm:$0xff]  ;;  %v4125_v27 = vld [vmem:[#allocation2 + $0x2] ss:$2 sm:$0xff] }
 0x215   : > { %v3611_v40 = vpop.f32.mrf.mxu0  ;;  %v4744_v43 = vld [vmem:[#allocation2 + $0x30] ss:$2 sm:$0xff] }
 0x216   : > { %3825 = vst.msk [vmem:[#allocation2 + $0x141] sm:$0xff] %vm3743_vm2, %v3736_v48  ;;  %v3735_v10 = vmax.f32 %v3703_v47, 0.0  ;;  %v3706_v57 = vadd.f32 %v8607_v1, %v3667_v23  ;;  %v3666_v42 = vadd.f32 %v3611_v40, %v3276_v52  ;;  %v3838_v37 = vld [vmem:[#allocation2 + $0x90] ss:$2 sm:$0xff] }
 0x217   : > { %v6777_v20 = vpop.f32.mrf.mxu0  ;;  %v4444_v5 = vld [vmem:[#allocation2 + $0x109] ss:$2 sm:$0xff]  ;;  %v4752_v19 = vld [vmem:[#allocation2 + $0xf0] ss:$2 sm:$0xff] }
 0x218   : > { %3824 = vst.msk [vmem:[#allocation2 + $0x139] sm:$0xff] %vm3743_vm2, %v3735_v10  ;;  %v3738_v34 = vmax.f32 %v3706_v57, 0.0  ;;  %v3705_v36 = vadd.f32 %v8607_v1, %v3666_v42  ;;  %v3669_v28 = vadd.f32 %v6777_v20, %v3279_v46  ;;  %6846 = vmatmul.mubr.msk.f32.gmra.mxu0 %vm3743_vm2, %v4444_v5  ;;  %v4127_v47 = vld [vmem:[#allocation2 + $0x32] ss:$2 sm:$0xff]  ;;  %v5056_v21 = vld [vmem:[#allocation2 + $0x62] ss:$2 sm:$0xff] }
 0x219   : > { %v3621_v45 = vpop.f32.mrf.mxu0  ;;  %v4131_v61 = vld [vmem:[#allocation2 + $0x92] ss:$2 sm:$0xff]  ;;  %v4133_v56 = vld [vmem:[#allocation2 + $0xc2] ss:$2 sm:$0xff] }
 0x21a   : > { %3827 = vst.msk [vmem:[#allocation2 + $0x159] sm:$0xff] %vm3743_vm2, %v3738_v34  ;;  %v3737_v3 = vmax.f32 %v3705_v36, 0.0  ;;  %v3708_v55 = vadd.f32 %v8607_v1, %v3669_v28  ;;  %v3668_v32 = vadd.f32 %v3621_v45, %v3278_v16  ;;  %v5058_v40 = vld [vmem:[#allocation2 + $0x92] ss:$2 sm:$0xff]  ;;  %v5060_v10 = vld [vmem:[#allocation2 + $0xc2] ss:$2 sm:$0xff] }
 0x21b   : > { %v6780_v54 = vpop.f32.mrf.mxu0  ;;  %v3861_v63 = vld [vmem:[#allocation2 + $0x121] ss:$2 sm:$0xff]  ;;  %v3844_v8 = vld [vmem:[#allocation2 + $0x120] ss:$2 sm:$0xff]  ;;  %v5928_v5 = vld [vmem:[%s9035_s3 + $0x38] sm:$0xff] }
 0x21c   : > { %3826 = vst.msk [vmem:[#allocation2 + $0x151] sm:$0xff] %vm3743_vm2, %v3737_v3  ;;  %v3740_v53 = vmax.f32 %v3708_v55, 0.0  ;;  %v3707_v60 = vadd.f32 %v8607_v1, %v3668_v32  ;;  %v3671_v14 = vadd.f32 %v6780_v54, %v3281_v30  ;;  %6792 = vmatprep.mubr.msk.f32.mxu1 %vm3743_vm2, %v3861_v63  ;;  %v4754_v48 = vld [vmem:[#allocation2 + $0x120] ss:$2 sm:$0xff] }
 0x21d   : > { %v3631_v0 = vpop.f32.mrf.mxu0  ;;  %v4135_v46 = vld [vmem:[#allocation2 + $0xf2] ss:$2 sm:$0xff]  ;;  %v4137_v57 = vld [vmem:[#allocation2 + $0x122] ss:$2 sm:$0xff] }
 0x21e   : > { %3829 = vst.msk [vmem:[#allocation2 + $0x171] sm:$0xff] %vm3743_vm2, %v3740_v53  ;;  %v3739_v62 = vmax.f32 %v3707_v60, 0.0  ;;  %v3710_v12 = vadd.f32 %v8607_v1, %v3671_v14  ;;  %v3670_v39 = vadd.f32 %v3631_v0, %v3280_v15  ;;  %v5062_v42 = vld [vmem:[#allocation2 + $0xf2] ss:$2 sm:$0xff]  ;;  %v5064_v49 = vld [vmem:[#allocation2 + $0x122] ss:$2 sm:$0xff] }
 0x21f   : > { %v4446_v4 = vld [vmem:[#allocation2 + $0x139] ss:$2 sm:$0xff]  ;;  %v4279_v6 = vld [vmem:[#allocation2 + $0x18] ss:$2 sm:$0xff]  ;;  %v4281_v51 = vld [vmem:[#allocation2 + $0x48] ss:$2 sm:$0xff] }
 0x220   : > { %3828 = vst.msk [vmem:[#allocation2 + $0x169] sm:$0xff] %vm3743_vm2, %v3739_v62  ;;  %v3742_v29 = vmax.f32 %v3710_v12, 0.0  ;;  %v3709_v38 = vadd.f32 %v8607_v1, %v3670_v39  ;;  %6848 = vmatprep.mubr.msk.f32.mxu0 %vm3743_vm2, %v4446_v4  ;;  %v3836_v1 = vld [vmem:[#allocation2 + $0x60] ss:$2 sm:$0xff]  ;;  %v4899_v53 = vld [vmem:[#allocation2 + $0x31] ss:$2 sm:$0xff] }
 0x221   : > { %v4283_v16 = vld [vmem:[#allocation2 + $0x78] ss:$2 sm:$0xff]  ;;  %v4285_v34 = vld [vmem:[#allocation2 + $0xa8] ss:$2 sm:$0xff]  ;;  %v4901_v60 = vld [vmem:[#allocation2 + $0x61] ss:$2 sm:$0xff] }
 0x222   : > { %3831 = vst.msk [vmem:[#allocation2 + $0x189] sm:$0xff] %vm3743_vm2, %v3742_v29  ;;  %v3741_v58 = vmax.f32 %v3709_v38, 0.0  ;;  %v4287_v36 = vld [vmem:[#allocation2 + $0xd8] ss:$2 sm:$0xff]  ;;  %v4289_v28 = vld [vmem:[#allocation2 + $0x108] ss:$2 sm:$0xff] }
 0x223   : > { %v3863_v26 = vld [vmem:[#allocation2 + $0x151] ss:$2 sm:$0xff]  ;;  %v3846_v52 = vld [vmem:[#allocation2 + $0x150] ss:$2 sm:$0xff]  ;;  %v4905_v0 = vld [vmem:[#allocation2 + $0xc1] ss:$2 sm:$0xff] }
 0x224   : > { %3830 = vst.msk [vmem:[#allocation2 + $0x181] sm:$0xff] %vm3743_vm2, %v3741_v58  ;;  %6793 = vmatmul.mubr.msk.f32.gmra.mxu1 %vm3743_vm2, %v3863_v26  ;;  %v4139_v41 = vld [vmem:[#allocation2 + $0x152] ss:$2 sm:$0xff]  ;;  %v4903_v14 = vld [vmem:[#allocation2 + $0x91] ss:$2 sm:$0xff] }
 0x225   : > { %6797 = vmatprep.mubr.msk.f32.mxu1 %vm3743_vm2, %v3832_v2  ;;  %v5066_v18 = vld [vmem:[#allocation2 + $0x152] ss:$2 sm:$0xff]  ;;  %v4907_v62 = vld [vmem:[#allocation2 + $0xf1] ss:$2 sm:$0xff]  ;;  %v4909_v12 = vld [vmem:[#allocation2 + $0x121] ss:$2 sm:$0xff] }
 0x226   : > { %v4291_v33 = vld [vmem:[#allocation2 + $0x138] ss:$2 sm:$0xff]  ;;  %v4911_v39 = vld [vmem:[#allocation2 + $0x151] ss:$2 sm:$0xff] }
 0x227   : > { %v4448_v44 = vld [vmem:[#allocation2 + $0x169] ss:$2 sm:$0xff]  ;;  %v4293_v25 = vld [vmem:[#allocation2 + $0x168] ss:$2 sm:$0xff] }
 0x228   : > { %6798 = vmatmul.mubr.msk.f32.vlgmr.msra.gmra.mxu1 %vm3743_vm2, %v3834_v31  ;;  %6849 = vmatmul.mubr.msk.f32.gmra.mxu0 %vm3743_vm2, %v4448_v44  ;;  %v4589_v45 = vld [vmem:[#allocation2 + $0x1a] ss:$2 sm:$0xff]  ;;  %v4591_v30 = vld [vmem:[#allocation2 + $0x4a] ss:$2 sm:$0xff] }
 0x229   : > { %6810 = vmatpush3.msra.mxu1 %v8681_v11  ;;  %6800 = vmatprep.mubr.msk.f32.mxu1 %vm3743_vm2, %v3836_v1  ;;  %v3842_v11 = vld [vmem:[#allocation2 + $0xf0] ss:$2 sm:$0xff] }
 0x22a   : > { %6867 = vmatprep.mubr.msk.f32.mxu0 %vm3743_vm2, %v4744_v43  ;;  %6823 = vmatprep.subr.mxu1 %v5892_v59  ;;  %v4593_v3 = vld [vmem:[#allocation2 + $0x7a] ss:$2 sm:$0xff]  ;;  %v4595_v55 = vld [vmem:[#allocation2 + $0xaa] ss:$2 sm:$0xff] }
 0x22b   : > { %v4758_v23 = vld [vmem:[#allocation2 + $0x180] ss:$2 sm:$0xff]  ;;  %v4913_v4 = vld [vmem:[#allocation2 + $0x181] ss:$2 sm:$0xff] }
 0x22c   : > { %6801 = vmatmul.mubr.msk.f32.gmra.mxu1 %vm3743_vm2, %v3838_v37  ;;  %6868 = vmatmul.mubr.msk.f32.vlgmr.msra.gmra.mxu0 %vm3743_vm2, %v4746_v13  ;;  %v5068_v20 = vld [vmem:[#allocation2 + $0x182] ss:$2 sm:$0xff] }
 0x22d   : > { %6803 = vmatprep.mubr.msk.f32.mxu1 %vm3743_vm2, %v3840_v24  ;;  %6870 = vmatprep.mubr.msk.f32.mxu0 %vm3743_vm2, %v4748_v50  ;;  %v4597_v32 = vld [vmem:[#allocation2 + $0xda] ss:$2 sm:$0xff]  ;;  %v4599_v54 = vld [vmem:[#allocation2 + $0x10a] ss:$2 sm:$0xff] }
 0x22e   : > { %6894 = vmatpush3.msra.mxu0 %v8703_v17  ;;  %v4756_v17 = vld [vmem:[#allocation2 + $0x150] ss:$2 sm:$0xff] }
 0x22f   : > { %v4601_v63 = vld [vmem:[#allocation2 + $0x13a] ss:$2 sm:$0xff]  ;;  %v4603_v15 = vld [vmem:[#allocation2 + $0x16a] ss:$2 sm:$0xff] }
 0x230   : > { %6804 = vmatmul.mubr.msk.f32.gmra.mxu1 %vm3743_vm2, %v3842_v11  ;;  %6871 = vmatmul.mubr.msk.f32.gmra.mxu0 %vm3743_vm2, %v4750_v35 }
 0x231   : > { %6806 = vmatprep.mubr.msk.f32.mxu1 %vm3743_vm2, %v3844_v8  ;;  %6873 = vmatprep.mubr.msk.f32.mxu0 %vm3743_vm2, %v4752_v19 }
 0x234   : > { %6807 = vmatmul.mubr.msk.f32.gmra.mxu1 %vm3743_vm2, %v3846_v52  ;;  %6874 = vmatmul.mubr.msk.f32.gmra.mxu0 %vm3743_vm2, %v4754_v48 }
 0x235   : > { %6876 = vmatprep.mubr.msk.f32.mxu0 %vm3743_vm2, %v4756_v17  ;;  %6811 = vmatprep.mubr.msk.f32.mxu1 %vm3743_vm2, %v4125_v27 }
 0x238   : > { %6812 = vmatmul.mubr.msk.f32.vlgmr.msra.gmra.mxu1 %vm3743_vm2, %v4127_v47  ;;  %6877 = vmatmul.mubr.msk.f32.gmra.mxu0 %vm3743_vm2, %v4758_v23 }
 0x239   : > { %6824 = vmatpush3.msra.mxu1 %v5892_v59  ;;  %6814 = vmatprep.mubr.msk.f32.mxu1 %vm3743_vm2, %v4129_v7 }
 0x23a   : > { %6895 = vmatprep.mubr.msk.f32.mxu0 %vm3743_vm2, %v5054_v22  ;;  %6851 = vmatprep.subr.mxu1 %v5910_v9 }
 0x23c   : > { %6815 = vmatmul.mubr.msk.f32.gmra.mxu1 %vm3743_vm2, %v4131_v61  ;;  %6896 = vmatmul.mubr.msk.f32.vlgmr.msra.gmra.mxu0 %vm3743_vm2, %v5056_v21 }
 0x23d   : > { %6817 = vmatprep.mubr.msk.f32.mxu1 %vm3743_vm2, %v4133_v56  ;;  %6898 = vmatprep.mubr.msk.f32.mxu0 %vm3743_vm2, %v5058_v40 }
 0x240   : > { %6818 = vmatmul.mubr.msk.f32.gmra.mxu1 %vm3743_vm2, %v4135_v46  ;;  %6899 = vmatmul.mubr.msk.f32.gmra.mxu0 %vm3743_vm2, %v5060_v10 }
 0x241   : > { %6820 = vmatprep.mubr.msk.f32.mxu1 %vm3743_vm2, %v4137_v57  ;;  %6901 = vmatprep.mubr.msk.f32.mxu0 %vm3743_vm2, %v5062_v42 }
 0x244   : > { %6821 = vmatmul.mubr.msk.f32.gmra.mxu1 %vm3743_vm2, %v4139_v41  ;;  %6902 = vmatmul.mubr.msk.f32.gmra.mxu0 %vm3743_vm2, %v5064_v49 }
 0x245   : > { %6825 = vmatprep.mubr.msk.f32.mxu1 %vm3743_vm2, %v4279_v6  ;;  %6904 = vmatprep.mubr.msk.f32.mxu0 %vm3743_vm2, %v5066_v18 }
 0x248   : > { %6826 = vmatmul.mubr.msk.f32.vlgmr.msra.gmra.mxu1 %vm3743_vm2, %v4281_v51  ;;  %6905 = vmatmul.mubr.msk.f32.gmra.mxu0 %vm3743_vm2, %v5068_v20 }
 0x249   : > { %6852 = vmatpush3.msra.mxu1 %v5910_v9  ;;  %6828 = vmatprep.mubr.msk.f32.mxu1 %vm3743_vm2, %v4283_v16 }
 0x24a   : > { %6879 = vmatprep.subr.mxu1 %v5928_v5 }
 0x24c   : > { %6829 = vmatmul.mubr.msk.f32.gmra.mxu1 %vm3743_vm2, %v4285_v34 }
 0x24d   : > { %6831 = vmatprep.mubr.msk.f32.mxu1 %vm3743_vm2, %v4287_v36 }
 0x250   : > { %6832 = vmatmul.mubr.msk.f32.gmra.mxu1 %vm3743_vm2, %v4289_v28 }
 0x251   : > { %6834 = vmatprep.mubr.msk.f32.mxu1 %vm3743_vm2, %v4291_v33 }
 0x254   : > { %6835 = vmatmul.mubr.msk.f32.gmra.mxu1 %vm3743_vm2, %v4293_v25 }
 0x255   : > { %6853 = vmatprep.mubr.msk.f32.mxu1 %vm3743_vm2, %v4589_v45 }
 0x258   : > { %6854 = vmatmul.mubr.msk.f32.vlgmr.msra.gmra.mxu1 %vm3743_vm2, %v4591_v30 }
 0x259   : > { %6880 = vmatpush3.msra.mxu1 %v5928_v5  ;;  %6856 = vmatprep.mubr.msk.f32.mxu1 %vm3743_vm2, %v4593_v3 }
 0x25c   : > { %6857 = vmatmul.mubr.msk.f32.gmra.mxu1 %vm3743_vm2, %v4595_v55 }
 0x25d   : > { %6859 = vmatprep.mubr.msk.f32.mxu1 %vm3743_vm2, %v4597_v32 }
 0x260   : > { %6860 = vmatmul.mubr.msk.f32.gmra.mxu1 %vm3743_vm2, %v4599_v54 }
 0x261   : > { %6862 = vmatprep.mubr.msk.f32.mxu1 %vm3743_vm2, %v4601_v63 }
 0x264   : > { %6863 = vmatmul.mubr.msk.f32.gmra.mxu1 %vm3743_vm2, %v4603_v15 }
 0x265   : > { %6881 = vmatprep.mubr.msk.f32.mxu1 %vm3743_vm2, %v4899_v53 }
 0x268   : > { %6882 = vmatmul.mubr.msk.f32.vlgmr.msra.gmra.mxu1 %vm3743_vm2, %v4901_v60 }
 0x269   : > { %6884 = vmatprep.mubr.msk.f32.mxu1 %vm3743_vm2, %v4903_v14 }
 0x26c   : > { %6885 = vmatmul.mubr.msk.f32.gmra.mxu1 %vm3743_vm2, %v4905_v0 }
 0x26d   : > { %6887 = vmatprep.mubr.msk.f32.mxu1 %vm3743_vm2, %v4907_v62 }
 0x270   : > { %6888 = vmatmul.mubr.msk.f32.gmra.mxu1 %vm3743_vm2, %v4909_v12 }
 0x271   : > { %6890 = vmatprep.mubr.msk.f32.mxu1 %vm3743_vm2, %v4911_v39 }
 0x274   : > { %6891 = vmatmul.mubr.msk.f32.gmra.mxu1 %vm3743_vm2, %v4913_v4 }
 0x2b4   : > { %v6785_v29 = vpop.f32.mrf.mxu1 }
 0x2b6   : > { %v3956_v38 = vpop.f32.mrf.mxu1 }
 0x2b8   : > { %v6841_v31 = vpop.f32.mrf.mxu0 }
 0x2ba   : > { %v8901_v1 = vpop.f32.mrf.mxu0 }
 0x2c4   : > { %v6788_v58 = vpop.f32.mrf.mxu1 }
 0x2c6   : > { %v3966_v2 = vpop.f32.mrf.mxu1 }
 0x2c8   : > { %v8905_v37 = vpop.f32.mrf.mxu0 }
 0x2ca   : > { %v8907_v50 = vpop.f32.mrf.mxu0 }
 0x2d4   : > { %v6791_v26 = vpop.f32.mrf.mxu1 }
 0x2d6   : > { %v3976_v44 = vpop.f32.mrf.mxu1 }
 0x2d8   : > { %v8909_v35 = vpop.f32.mrf.mxu0 }
 0x2da   : > { %v8911_v27 = vpop.f32.mrf.mxu0 }
 0x2e4   : > { %v8899_v59 = vpop.f32.mrf.mxu1 }
 0x2e6   : > { %v8903_v43 = vpop.f32.mrf.mxu1 }
 0x2e8   : > { %v6799_v13 = vpop.f32.mrf.mxu1  ;;  %v8913_v48 = vpop.f32.mrf.mxu0 }
 0x2e9   : > { %v4091_v30 = vadd.f32 %v6799_v13, %v6785_v29 }
 0x2ea   : > { %v4085_v24 = vpop.f32.mrf.mxu1  ;;  %v8915_v23 = vpop.f32.mrf.mxu0 }
 0x2eb   : > { %9310 = vst [vmem:[#allocation11_spill] sm:$0xff] %v8915_v23  ;;  %v4086_v55 = vadd.f32 %v4085_v24, %v3956_v38 }
 0x2ec   : > { %v6802_v11 = vpop.f32.mrf.mxu1  ;;  %v6869_v22 = vpop.f32.mrf.mxu0 }
 0x2ed   : > { %v4101_v15 = vadd.f32 %v6802_v11, %v6788_v58 }
 0x2ee   : > { %v4095_v8 = vpop.f32.mrf.mxu1  ;;  %v8917_v56 = vpop.f32.mrf.mxu0 }
 0x2ef   : > { %v4096_v0 = vadd.f32 %v4095_v8, %v3966_v2 }
 0x2f0   : > { %v6805_v19 = vpop.f32.mrf.mxu1  ;;  %v8919_v10 = vpop.f32.mrf.mxu0 }
 0x2f1   : > { %v4111_v39 = vadd.f32 %v6805_v19, %v6791_v26 }
 0x2f2   : > { %v4105_v52 = vpop.f32.mrf.mxu1  ;;  %v8921_v41 = vpop.f32.mrf.mxu0 }
 0x2f3   : > { %v4106_v23 = vadd.f32 %v4105_v52, %v3976_v44 }
 0x2f4   : > { %v6808_v17 = vpop.f32.mrf.mxu1  ;;  %v8923_v18 = vpop.f32.mrf.mxu0 }
 0x2f5   : > { %9311 = vst [vmem:[#allocation31_spill] sm:$0xff] %v8923_v18  ;;  %v4121_v58 = vadd.f32 %v6808_v17, %v8899_v59 }
 0x2f6   : > { %v4115_v47 = vpop.f32.mrf.mxu1  ;;  %v8925_v5 = vpop.f32.mrf.mxu0 }
 0x2f7   : > { %9312 = vst [vmem:[#allocation8_spill] sm:$0xff] %v8925_v5 }
 0x2f8   : > { %v6813_v9 = vpop.f32.mrf.mxu1  ;;  %v8927_v36 = vpop.f32.mrf.mxu0 }
 0x2f9   : > { %9313 = vst [vmem:[#allocation14_spill] sm:$0xff] %v8927_v36  ;;  %v4272_v32 = vadd.f32 %v6813_v9, %v4091_v30 }
 0x2fa   : > { %v4232_v7 = vpop.f32.mrf.mxu1  ;;  %v8929_v25 = vpop.f32.mrf.mxu0 }
 0x2fb   : > { %9314 = vst [vmem:[#allocation13_spill] sm:$0xff] %v8929_v25  ;;  %v4271_v53 = vadd.f32 %v4232_v7, %v4086_v55 }
 0x2fc   : > { %v6816_v61 = vpop.f32.mrf.mxu1  ;;  %v6897_v54 = vpop.f32.mrf.mxu0 }
 0x2fd   : > { %v4274_v62 = vadd.f32 %v6816_v61, %v4101_v15  ;;  %v4116_v61 = vadd.f32 %v4115_v47, %v8903_v43 }
 0x2fe   : > { %v4242_v21 = vpop.f32.mrf.mxu1  ;;  %v5161_v4 = vpop.f32.mrf.mxu0 }
 0x2ff   : > { %v4273_v5 = vadd.f32 %v4242_v21, %v4096_v0 }
 0x300   : > { %v6819_v40 = vpop.f32.mrf.mxu1  ;;  %v6900_v11 = vpop.f32.mrf.mxu0 }
 0x301   : > { %v4276_v29 = vadd.f32 %v6819_v40, %v4111_v39 }
 0x302   : > { %v4252_v46 = vpop.f32.mrf.mxu1 }
 0x303   : > { %v4275_v7 = vadd.f32 %v4252_v46, %v4106_v23 }
 0x304   : > { %v6822_v57 = vpop.f32.mrf.mxu1 }
 0x306   : > { %v4262_v42 = vpop.f32.mrf.mxu1 }
 0x307   : > { %v4277_v59 = vadd.f32 %v4262_v42, %v4116_v61 }
 0x308   : > { %v6827_v49 = vpop.f32.mrf.mxu1 }
 0x309   : > { %v4426_v60 = vadd.f32 %v6827_v49, %v4272_v32  ;;  %v5171_v49 = vpop.f32.mrf.mxu0 }
 0x30a   : > { %v4386_v6 = vpop.f32.mrf.mxu1 }
 0x30b   : > { %v4425_v12 = vadd.f32 %v4386_v6, %v4271_v53  ;;  %v4581_v25 = vadd.f32 %v6841_v31, %v4426_v60  ;;  %v4278_v31 = vadd.f32 %v6822_v57, %v4121_v58  ;;  %v9317_v60 = vld [vmem:[#allocation8_spill] sm:$0xff] }
 0x30c   : > { %v6830_v51 = vpop.f32.mrf.mxu1 }
 0x30d   : > { %v4428_v18 = vadd.f32 %v6830_v51, %v4274_v62  ;;  %v4580_v9 = vadd.f32 %v8901_v1, %v4425_v12 }
 0x30e   : > { %v4396_v20 = vpop.f32.mrf.mxu1 }
 0x30f   : > { %v4427_v38 = vadd.f32 %v4396_v20, %v4273_v5  ;;  %v4583_v19 = vadd.f32 %v8905_v37, %v4428_v18  ;;  %v6903_v20 = vpop.f32.mrf.mxu0 }
 0x310   : > { %v6833_v16 = vpop.f32.mrf.mxu1 }
 0x311   : > { %v4430_v2 = vadd.f32 %v6833_v16, %v4276_v29  ;;  %v4582_v40 = vadd.f32 %v8907_v50, %v4427_v38  ;;  %v8943_v50 = vld [vmem:[%s9036_s4] ss:$0 sm:$0xff] }
 0x312   : > { %v4406_v34 = vpop.f32.mrf.mxu1 }
 0x313   : > { %v4429_v44 = vadd.f32 %v4406_v34, %v4275_v7  ;;  %v4585_v23 = vadd.f32 %v8909_v35, %v4430_v2  ;;  %v9319_v7 = vld [vmem:[#allocation13_spill] sm:$0xff] }
 0x314   : > { %v6836_v28 = vpop.f32.mrf.mxu1 }
 0x315   : > { %v4432_v17 = vadd.f32 %v6836_v28, %v4278_v31  ;;  %v4584_v57 = vadd.f32 %v8911_v27, %v4429_v44 }
 0x316   : > { %v4416_v33 = vpop.f32.mrf.mxu1 }
 0x317   : > { %v4431_v43 = vadd.f32 %v4416_v33, %v4277_v59 }
 0x318   : > { %v6855_v45 = vpop.f32.mrf.mxu1 }
 0x319   : > { %v4736_v24 = vadd.f32 %v6855_v45, %v4581_v25  ;;  %v9315_v25 = vld [vmem:[#allocation11_spill] sm:$0xff] }
 0x31a   : > { %v4696_v3 = vpop.f32.mrf.mxu1  ;;  %v4586_v45 = vadd.f32 %v9315_v25, %v4431_v43 }
 0x31b   : > { %v4735_v26 = vadd.f32 %v4696_v3, %v4580_v9  ;;  %v4891_v1 = vadd.f32 %v6869_v22, %v4736_v24  ;;  %v9316_v3 = vld [vmem:[#allocation31_spill] sm:$0xff] }
 0x31c   : > { %v6858_v63 = vpop.f32.mrf.mxu1 }
 0x31d   : > { %v4738_v21 = vadd.f32 %v6858_v63, %v4583_v19  ;;  %v4890_v37 = vadd.f32 %v8917_v56, %v4735_v26  ;;  %v4587_v56 = vadd.f32 %v8913_v48, %v4432_v17  ;;  %v5181_v48 = vpop.f32.mrf.mxu0 }
 0x31e   : > { %v4706_v14 = vpop.f32.mrf.mxu1 }
 0x31f   : > { %v4737_v6 = vadd.f32 %v4706_v14, %v4582_v40  ;;  %v4893_v18 = vadd.f32 %v8919_v10, %v4738_v21  ;;  %v6906_v58 = vpop.f32.mrf.mxu0 }
 0x320   : > { %v6861_v36 = vpop.f32.mrf.mxu1 }
 0x321   : > { %v4740_v47 = vadd.f32 %v6861_v36, %v4585_v23  ;;  %v4892_v28 = vadd.f32 %v8921_v41, %v4737_v6 }
 0x322   : > { %v4716_v13 = vpop.f32.mrf.mxu1 }
 0x323   : > { %v4739_v5 = vadd.f32 %v4716_v13, %v4584_v57  ;;  %v4895_v55 = vadd.f32 %v9316_v3, %v4740_v47 }
 0x324   : > { %v6864_v8 = vpop.f32.mrf.mxu1 }
 0x325   : > { %v4742_v33 = vadd.f32 %v6864_v8, %v4587_v56  ;;  %v4894_v14 = vadd.f32 %v9317_v60, %v4739_v5 }
 0x326   : > { %v4726_v52 = vpop.f32.mrf.mxu1 }
 0x327   : > { %v4741_v15 = vadd.f32 %v4726_v52, %v4586_v45 }
 0x328   : > { %v6883_v46 = vpop.f32.mrf.mxu1 }
 0x329   : > { %v5046_v51 = vadd.f32 %v6883_v46, %v4891_v1  ;;  %v4896_v2 = vadd.f32 %v9319_v7, %v4741_v15  ;;  %v5191_v1 = vpop.f32.mrf.mxu0 }
 0x32a   : > { %v5006_v22 = vpop.f32.mrf.mxu1 }
 0x32b   : > { %v5201_v42 = vadd.f32 %v6897_v54, %v5046_v51  ;;  %v5045_v35 = vadd.f32 %v5006_v22, %v4890_v37 }
 0x32c   : > { %v6886_v16 = vpop.f32.mrf.mxu1 }
 0x32d   : > { %v5216_v34 = vadd.f32 %v8943_v50, %v5201_v42  ;;  %v5200_v27 = vadd.f32 %v5161_v4, %v5045_v35  ;;  %v5048_v36 = vadd.f32 %v6886_v16, %v4893_v18  ;;  %v9318_v4 = vld [vmem:[#allocation14_spill] sm:$0xff] }
 0x32e   : > { %v5016_v30 = vpop.f32.mrf.mxu1  ;;  %v4897_v29 = vadd.f32 %v9318_v4, %v4742_v33 }
 0x32f   : > { %v5224_v32 = vmax.f32 %v5216_v34, 0.0  ;;  %v5215_v10 = vadd.f32 %v8943_v50, %v5200_v27  ;;  %v5203_v54 = vadd.f32 %v6900_v11, %v5048_v36  ;;  %v5047_v63 = vadd.f32 %v5016_v30, %v4892_v28 }
 0x330   : > { %v6889_v53 = vpop.f32.mrf.mxu1 }
 0x331   : > { %5233 = vst.msk [vmem:[%s8955_s26 + $0x8] sm:$0xff] %vm5231_vm4, %v5224_v32  ;;  %v5223_v41 = vmax.f32 %v5215_v10, 0.0  ;;  %v5218_v0 = vadd.f32 %v8943_v50, %v5203_v54  ;;  %v5202_v62 = vadd.f32 %v5171_v49, %v5047_v63  ;;  %v5050_v12 = vadd.f32 %v6889_v53, %v4895_v55 }
 0x332   : > { %v5026_v39 = vpop.f32.mrf.mxu1 }
 0x333   : > { %5232 = vst.msk [vmem:[%s8955_s26] sm:$0xff] %vm5231_vm4, %v5223_v41  ;;  %v5226_v13 = vmax.f32 %v5218_v0, 0.0  ;;  %v5217_v38 = vadd.f32 %v8943_v50, %v5202_v62  ;;  %v5205_v24 = vadd.f32 %v6903_v20, %v5050_v12  ;;  %v5049_v9 = vadd.f32 %v5026_v39, %v4894_v14 }
 0x334   : > { %v6892_v11 = vpop.f32.mrf.mxu1 }
 0x335   : > { %5235 = vst.msk [vmem:[%s8955_s26 + $0x18] sm:$0xff] %vm5231_vm4, %v5226_v13  ;;  %v5225_v8 = vmax.f32 %v5217_v38, 0.0  ;;  %v5220_v26 = vadd.f32 %v8943_v50, %v5205_v24  ;;  %v5204_v19 = vadd.f32 %v5181_v48, %v5049_v9  ;;  %v5052_v61 = vadd.f32 %v6892_v11, %v4897_v29 }
 0x336   : > { %v5036_v31 = vpop.f32.mrf.mxu1 }
 0x337   : > { %5234 = vst.msk [vmem:[%s8955_s26 + $0x10] sm:$0xff] %vm5231_vm4, %v5225_v8  ;;  %v5228_v44 = vmax.f32 %v5220_v26, 0.0  ;;  %v5219_v52 = vadd.f32 %v8943_v50, %v5204_v19  ;;  %v5207_v21 = vadd.f32 %v6906_v58, %v5052_v61  ;;  %v5051_v40 = vadd.f32 %v5036_v31, %v4896_v2 }
 0x339   : > { %5237 = vst.msk [vmem:[%s8955_s26 + $0x28] sm:$0xff] %vm5231_vm4, %v5228_v44  ;;  %v5227_v49 = vmax.f32 %v5219_v52, 0.0  ;;  %v5222_v59 = vadd.f32 %v8943_v50, %v5207_v21  ;;  %v5206_v17 = vadd.f32 %v5191_v1, %v5051_v40 }
 0x33b   : > { %5236 = vst.msk [vmem:[%s8955_s26 + $0x20] sm:$0xff] %vm5231_vm4, %v5227_v49  ;;  %v5230_v23 = vmax.f32 %v5222_v59, 0.0  ;;  %v5221_v46 = vadd.f32 %v8943_v50, %v5206_v17 }
 0x33d   : > { %5239 = vst.msk [vmem:[%s8955_s26 + $0x38] sm:$0xff] %vm5231_vm4, %v5230_v23  ;;  %v5229_v6 = vmax.f32 %v5221_v46, 0.0 }
 0x33f   : > { %5238 = vst.msk [vmem:[%s8955_s26 + $0x30] sm:$0xff] %vm5231_vm4, %v5229_v6 }
 0x340   : > { %6965 = shalt.err (!%p6962_p3)
}
 0x341   : > { %s6966_s14 = scalar_lea.hbm %s8982_s9, 1024  ;;  %s6970_s17 = scalar_lea.hbm %s9037_s5, 2048 }
 0x342   : > { %p6967_p4 = scmp.ne.s32.totalorder %s8982_s9, %s6966_s14  ;;  %p6971_p9 = scmp.lt.s32.totalorder %s8982_s9, %s9037_s5 }
 0x343   : > { %p6972_p10 = scmp.lt.s32.totalorder %s6970_s17, %s6966_s14 }
 0x344   : > { %p6968_p7 = pnand %p6967_p4, %p7086_p5 }
 0x345   : > { %p6973_p11 = por %p6972_p10, %p6971_p9 }
 0x346   : > { %p6969_p8 = pneg %p6968_p7 }
 0x348   : > { %p6974_p12 = pnand %p6973_p11, %p6969_p8 }
 0x34a   : > { %6977 = shalt.err (!%p6974_p12)
}
 0x34b   : > { %s7016_s26 = smov 128   ;;  %s7017_s30 = smov 8  }
 0x34c   : > { %6910 = dma.vmem_to_hbm [thread:$0]  (%p7086_p5), %s8984_s6, 1024, %s8982_s9, %s8992_s22, %s7016_s26, %s7016_s26, %s7017_s30  }
 0x34d PF: > { %p6916_p13 = scmp.ge.s32.totalorder %s7012_s21, 2  ;;  %s5269_s7 = sand.u32 1, %s7000_s18  }
 0x34e   : > { %s5270_s8 = scalar_lea.sflag [#allocation4], %s5269_s7 }
 0x34f   : > { %p6913_p0 = pnand %p6916_p13, %p7090_p6 }
 0x351   : > { %p6914_p1 = pneg %p6913_p0 }
 0x353   : > { %6995 = dma.done.wait (%p6914_p1), %s5270_s8, 1024  }
 0x354   : > { %6997 = vsyncadd (%p6914_p1), %s5270_s8, 4294966272  ;;  %p15_p2 = scmp.ge.s32.totalorder %s7073_s24, 4   ;;  %s9320_s18 = smov %s7004_s19 }
 0x355   : > { %s9321_s19 = smov %s7008_s20  ;;  %s9322_s20 = smov %s7084_s27 }
 0x356   : > { %s9323_s21 = smov %s7073_s24  ;;  %17 = sbr.rel (!%p15_p2) target bundleno = 3 (0x3), region = 164 }
 0x35b   :  { %5275 = vsyncpa [#allocation4], 1 }
 0x35c   :  { %5277 = vsyncpa [#allocation4 + $0x1], 1 }

</bundles_post_ra>
